<compile_context>
chip_gen: v6e
topology: v6e:2x2x1
jax: 0.10.0
libtpu: 0.0.40
codegen_flags: <defaults>
</compile_context>

<pallas_src>
import functools
import math

import jax
import jax.numpy as jnp
from jax.experimental import pallas as pl
from jax.experimental.pallas import tpu as pltpu


def _round_up(x, m):
    return (x + m - 1) // m * m


# ----------------------------- Pallas kernel --------------------------------

def _fused_matmul_kernel(a_ref, w_ref, shift_ref, o_ref, *, act):
    # a_ref: (TM, K) bf16 patches; w_ref: (K, C) bf16 (BN scale pre-folded);
    # shift_ref: (1, C) f32 BN shift.
    acc = jnp.dot(a_ref[...], w_ref[...], preferred_element_type=jnp.float32)
    y = acc + shift_ref[...]
    if act == "leaky_relu":
        y = jnp.where(y > 0, y, 0.2 * y)
    else:  # exact sigmoid (final layer is tiny; approximation not worth it)
        y = 1.0 / (1.0 + jnp.exp(-y))
    o_ref[...] = y.astype(o_ref.dtype)


def fused_matmul(a, w, shift, act, out_dtype, *, tm=1024):
    """act(a @ w + shift), M-tiled Pallas call.  K must be a multiple of 128."""
    M, K = a.shape
    K2, C = w.shape
    assert K == K2 and K % 128 == 0, (K, K2)

    # M tiling: bf16 sublane packing wants multiples of 16; pad M only when
    # it does not already divide into whole tiles (rare for this network).
    m_align = _round_up(M, 16)
    tm_eff = min(tm, m_align)
    Mp = _round_up(M, tm_eff)

    a_p = a.astype(jnp.bfloat16)
    if Mp != M:
        a_p = jnp.pad(a_p, ((0, Mp - M), (0, 0)))
    w_p = w.astype(jnp.bfloat16)
    shift_p = shift.reshape(1, C).astype(jnp.float32)

    grid = (Mp // tm_eff,)
    kernel = functools.partial(_fused_matmul_kernel, act=act)

    out_itemsize = jnp.dtype(out_dtype).itemsize
    cost = pl.CostEstimate(
        flops=2 * Mp * K * C,
        transcendentals=(Mp * C if act == "sigmoid" else 0),
        bytes_accessed=(Mp * K * 2 + K * C * 2 + C * 4 + Mp * C * out_itemsize),
    )

    out_p = pl.pallas_call(
        kernel,
        out_shape=jax.ShapeDtypeStruct((Mp, C), out_dtype),
        grid_spec=pltpu.PrefetchScalarGridSpec(
            num_scalar_prefetch=0,
            grid=grid,
            in_specs=[
                pl.BlockSpec((tm_eff, K), lambda i: (i, 0)),   # patch tile
                pl.BlockSpec((K, C), lambda i: (0, 0)),        # folded weights
                pl.BlockSpec((1, C), lambda i: (0, 0)),        # BN shift
            ],
            out_specs=pl.BlockSpec((tm_eff, C), lambda i: (i, 0)),
        ),
        compiler_params=pltpu.CompilerParams(
            dimension_semantics=("parallel",),
            # Let XLA fuse the im2col/pad/cast producer into the patch operand
            # instead of materializing another HBM copy.
            allow_input_fusion=[True, False, False],
        ),
        cost_estimate=cost,
    )(a_p, w_p, shift_p)

    return out_p if Mp == M else out_p[:M]


# ------------------------------ conv helpers --------------------------------

def im2col(x, k, s, p):
    """x: (N, H, W, C) -> (N*Ho*Wo, k*k*C) patches (kh, kw major; C minor)."""
    N, H, W, C = x.shape
    xp = jnp.pad(x, ((0, 0), (p, p), (p, p), (0, 0)))
    Ho = (H + 2 * p - k) // s + 1
    Wo = (W + 2 * p - k) // s + 1
    cols = []
    for kh in range(k):
        for kw in range(k):
            cols.append(xp[:, kh:kh + s * Ho:s, kw:kw + s * Wo:s, :])
    cols = jnp.stack(cols, axis=3)                 # (N, Ho, Wo, k*k, C)
    return cols.reshape(N * Ho * Wo, k * k * C), (N, Ho, Wo)


def conv_block(x, w, scale, shift, act, k, s, p, out_dtype=jnp.bfloat16,
               tm=1024):
    """Conv2d(bias=False) + folded BN + activation.  w: (k, k, Cin, Cout)."""
    cin = x.shape[-1]
    cout = w.shape[-1]
    # Pad Cin so K = k*k*Cin is a multiple of 128 (lane-dense patches, no
    # separate patch-matrix pad pass).  Zero channels x zero weights = no-op.
    cmul = 128 // math.gcd(k * k, 128)
    cin_p = _round_up(cin, cmul)
    if cin_p != cin:
        x = jnp.pad(x, ((0, 0), (0, 0), (0, 0), (0, cin_p - cin)))
        w = jnp.pad(w, ((0, 0), (0, 0), (0, cin_p - cin), (0, 0)))

    x = x.astype(jnp.bfloat16)                     # im2col intermediate in bf16
    a, (N, Ho, Wo) = im2col(x, k, s, p)

    # Fold BN per-channel scale into the weights (in f32), then cast to bf16.
    wm = (w.reshape(k * k * cin_p, cout).astype(jnp.float32)
          * scale.reshape(1, cout).astype(jnp.float32)).astype(jnp.bfloat16)

    out = fused_matmul(a, wm, shift, act, out_dtype, tm=tm)
    return out.reshape(N, Ho, Wo, cout)


# ----------------------------- Discriminator --------------------------------

class DiscriminatorPallas:
    """DCGAN discriminator; requires 64x64 input images (NCHW)."""

    def __init__(self, ndf=16, nc=3, key=jax.random.PRNGKey(0)):
        self.ndf, self.nc = ndf, nc
        ks = jax.random.split(key, 8)

        def conv_w(k_, cin, cout, ksz=4):
            return jax.random.normal(k_, (ksz, ksz, cin, cout), jnp.float32) * 0.02

        self.w1 = conv_w(ks[0], nc, ndf)
        self.w2 = conv_w(ks[1], ndf, ndf * 2)
        self.w3 = conv_w(ks[2], ndf * 2, ndf * 4)
        self.w4 = conv_w(ks[3], ndf * 4, ndf * 8)
        self.w5 = conv_w(ks[4], ndf * 8, 1)

        def bn_params(k_, c, eps=1e-5):
            k1, k2, k3, k4 = jax.random.split(k_, 4)
            gamma = 1.0 + 0.1 * jax.random.normal(k1, (c,), jnp.float32)
            beta = 0.1 * jax.random.normal(k2, (c,), jnp.float32)
            mean = 0.05 * jax.random.normal(k3, (c,), jnp.float32)
            var = 1.0 + 0.1 * jax.random.uniform(k4, (c,), jnp.float32)
            scale = gamma / jnp.sqrt(var + eps)
            shift = beta - mean * scale
            return scale, shift

        self.bn2 = bn_params(ks[5], ndf * 2)
        self.bn3 = bn_params(ks[6], ndf * 4)
        self.bn4 = bn_params(ks[7], ndf * 8)

    def __call__(self, x_nchw):
        x = jnp.transpose(x_nchw, (0, 2, 3, 1))      # NCHW -> NHWC
        ndf = self.ndf
        ones = lambda c: jnp.ones((c,), jnp.float32)
        zeros = lambda c: jnp.zeros((c,), jnp.float32)
        # Layer 1: M = N*1024, K = 128 -> tm=1024 gives an even step count for
        # even batch (keeps both v7x TensorCores busy on the only heavy layer).
        x = conv_block(x, self.w1, ones(ndf), zeros(ndf), "leaky_relu",
                       4, 2, 1, tm=1024)
        x = conv_block(x, self.w2, *self.bn2, act="leaky_relu", k=4, s=2, p=1,
                       tm=1024)
        x = conv_block(x, self.w3, *self.bn3, act="leaky_relu", k=4, s=2, p=1,
                       tm=1024)
        # Tail layers have large K (1024/2048) but tiny M: smaller tm.
        x = conv_block(x, self.w4, *self.bn4, act="leaky_relu", k=4, s=2, p=1,
                       tm=512)
        x = conv_block(x, self.w5, ones(1), zeros(1), "sigmoid", 4, 1, 0,
                       out_dtype=jnp.float32, tm=512)
        return x.reshape(-1)                         # (N,)


# ----------------------------- pure-JAX reference ---------------------------

def _ref_forward(model, x_nchw, compute_dtype):
    """Reference conv network.  compute_dtype=bf16 mirrors the kernel numerics
    (bf16 operands with BN scale folded into weights, f32 accumulation, bf16
    inter-layer activations)."""
    x = jnp.transpose(x_nchw, (0, 2, 3, 1))
    dn = ("NHWC", "HWIO", "NHWC")
    precision = (jax.lax.Precision.HIGHEST
                 if compute_dtype == jnp.float32 else None)

    def block(x, w, sc, sh, act, s, p):
        wf = w * sc.reshape(1, 1, 1, -1)             # same folding as kernel
        y = jax.lax.conv_general_dilated(
            x.astype(compute_dtype), wf.astype(compute_dtype),
            (s, s), [(p, p), (p, p)],
            dimension_numbers=dn, precision=precision,
            preferred_element_type=jnp.float32) + sh
        if act == "leaky_relu":
            return jnp.where(y > 0, y, 0.2 * y).astype(compute_dtype)
        return jax.nn.sigmoid(y)                      # final probs in f32

    ndf = model.ndf
    x = block(x, model.w1, jnp.ones(ndf), jnp.zeros(ndf), "leaky_relu", 2, 1)
    x = block(x, model.w2, *model.bn2, act="leaky_relu", s=2, p=1)
    x = block(x, model.w3, *model.bn3, act="leaky_relu", s=2, p=1)
    x = block(x, model.w4, *model.bn4, act="leaky_relu", s=2, p=1)
    x = block(x, model.w5, jnp.ones(1), jnp.zeros(1), "sigmoid", 1, 0)
    return x.reshape(-1).astype(jnp.float32)


# --------------------------------- main --------------------------------------

if __name__ == "__main__":
    key = jax.random.PRNGKey(0)
    k_x, k_w = jax.random.split(key)

    # 64x64 spatial size is required by the architecture (5 conv stages -> 1x1).
    batch, nc, ndf = 2, 3, 16
    x = jax.random.normal(k_x, (batch, nc, 64, 64), jnp.float32)

    model = DiscriminatorPallas(ndf=ndf, nc=nc, key=k_w)

    fwd = jax.jit(lambda xx: model(xx))
    out = jax.block_until_ready(fwd(x))
    assert out.shape == (batch,), out.shape
    assert jnp.all(jnp.isfinite(out))

    # Tight check against a reference with matching numerics (bf16 operands,
    # folded BN scale, f32 accumulation, bf16 inter-layer activations).
    ref_bf16 = jax.block_until_ready(_ref_forward(model, x, jnp.bfloat16))
    assert jnp.allclose(out, ref_bf16, rtol=1e-2, atol=5e-3), (out, ref_bf16)

    # Loose sanity check against the full-f32 reference semantics.
    ref_f32 = jax.block_until_ready(_ref_forward(model, x, jnp.float32))
    assert jnp.allclose(out, ref_f32, rtol=5e-2, atol=3e-2), (out, ref_f32)

    print("KERNEL_OK")
</pallas_src>

<mosaic_0001>
module attributes {stable_mosaic.version = 11 : i64} {
  func.func @_fused_matmul_kernel(%arg0: i32, %arg1: memref<1024x128xbf16, #tpu.memory_space<vmem>>, %arg2: memref<128x16xbf16, #tpu.memory_space<vmem>>, %arg3: memref<1x16xf32, #tpu.memory_space<vmem>>, %arg4: memref<1024x16xbf16, #tpu.memory_space<vmem>>) attributes {dimension_semantics = [#tpu.dimension_semantics<parallel>], iteration_bounds = array<i64: 2>, scalar_prefetch = 0 : i64, scratch_operands = 0 : i64, tpu.core_type = #tpu.core_type<tc>, window_params = [{transform_indices = @transform_0, window_bounds = array<i64: 1024, 128>}, {pipeline_mode = #tpu.pipeline_mode<synchronous>, transform_indices = @transform_1, window_bounds = array<i64: 128, 16>}, {pipeline_mode = #tpu.pipeline_mode<synchronous>, transform_indices = @transform_2, window_bounds = array<i64: 1, 16>}, {transform_indices = @transform_3, window_bounds = array<i64: 1024, 16>}]} {
    %c0 = arith.constant 0 : index
    %c0_0 = arith.constant 0 : index
    %0 = vector.load %arg1[%c0, %c0_0] : memref<1024x128xbf16, #tpu.memory_space<vmem>>, vector<1024x128xbf16>
    %c0_1 = arith.constant 0 : index
    %c0_2 = arith.constant 0 : index
    %1 = vector.load %arg2[%c0_1, %c0_2] : memref<128x16xbf16, #tpu.memory_space<vmem>>, vector<128x16xbf16>
    %cst = arith.constant dense<0.000000e+00> : vector<1024x16xf32>
    %2 = tpu.matmul %0, %1, %cst {dimension_numbers = #tpu.dot_dimension_numbers<[1], [0], [0], [1], [0, 0, 1, 1], [], []>} : vector<1024x128xbf16>, vector<128x16xbf16>, vector<1024x16xf32> -> vector<1024x16xf32>
    %c0_3 = arith.constant 0 : index
    %c0_4 = arith.constant 0 : index
    %3 = vector.load %arg3[%c0_3, %c0_4] : memref<1x16xf32, #tpu.memory_space<vmem>>, vector<1x16xf32>
    %4 = vector.broadcast %3 : vector<1x16xf32> to vector<1024x16xf32>
    %5 = arith.addf %2, %4 : vector<1024x16xf32>
    %cst_5 = arith.constant 0.000000e+00 : f32
    %6 = vector.broadcast %cst_5 : f32 to vector<1024x16xf32>
    %7 = arith.cmpf ogt, %5, %6 : vector<1024x16xf32>
    %cst_6 = arith.constant 2.000000e-01 : f32
    %8 = vector.broadcast %cst_6 : f32 to vector<1024x16xf32>
    %9 = arith.mulf %8, %5 : vector<1024x16xf32>
    %10 = arith.select %7, %5, %9 : vector<1024x16xi1>, vector<1024x16xf32>
    %11 = arith.truncf %10 : vector<1024x16xf32> to vector<1024x16xbf16>
    %c0_7 = arith.constant 0 : index
    %c0_8 = arith.constant 0 : index
    %12 = vector.load %arg4[%c0_7, %c0_8] : memref<1024x16xbf16, #tpu.memory_space<vmem>>, vector<1024x16xbf16>
    tpu.vector_store %arg4[%c0_7, %c0_8], %11 {strides = array<i32>} : memref<1024x16xbf16, #tpu.memory_space<vmem>>, vector<1024x16xbf16>,
    return
  }
  func.func @transform_0(%arg0: i32) -> (i32, i32) {
    %c0_i32 = arith.constant 0 : i32
    %c0_i32_0 = arith.constant 0 : i32
    return %arg0, %c0_i32 : i32, i32
  }
  func.func @transform_1(%arg0: i32) -> (i32, i32) {
    %c0_i32 = arith.constant 0 : i32
    %c0_i32_0 = arith.constant 0 : i32
    %c0_i32_1 = arith.constant 0 : i32
    return %c0_i32, %c0_i32_0 : i32, i32
  }
  func.func @transform_2(%arg0: i32) -> (i32, i32) {
    %c0_i32 = arith.constant 0 : i32
    %c0_i32_0 = arith.constant 0 : i32
    %c0_i32_1 = arith.constant 0 : i32
    return %c0_i32, %c0_i32_0 : i32, i32
  }
  func.func @transform_3(%arg0: i32) -> (i32, i32) {
    %c0_i32 = arith.constant 0 : i32
    %c0_i32_0 = arith.constant 0 : i32
    return %arg0, %c0_i32 : i32, i32
  }
}

module attributes {stable_mosaic.version = 11 : i64} {
  func.func @_fused_matmul_kernel(%arg0: i32, %arg1: memref<512x256xbf16, #tpu.memory_space<vmem>>, %arg2: memref<256x32xbf16, #tpu.memory_space<vmem>>, %arg3: memref<1x32xf32, #tpu.memory_space<vmem>>, %arg4: memref<512x32xbf16, #tpu.memory_space<vmem>>) attributes {dimension_semantics = [#tpu.dimension_semantics<parallel>], iteration_bounds = array<i64: 1>, scalar_prefetch = 0 : i64, scratch_operands = 0 : i64, tpu.core_type = #tpu.core_type<tc>, window_params = [{transform_indices = @transform_0, window_bounds = array<i64: 512, 256>}, {pipeline_mode = #tpu.pipeline_mode<synchronous>, transform_indices = @transform_1, window_bounds = array<i64: 256, 32>}, {pipeline_mode = #tpu.pipeline_mode<synchronous>, transform_indices = @transform_2, window_bounds = array<i64: 1, 32>}, {transform_indices = @transform_3, window_bounds = array<i64: 512, 32>}]} {
    %c0 = arith.constant 0 : index
    %c0_0 = arith.constant 0 : index
    %0 = vector.load %arg1[%c0, %c0_0] : memref<512x256xbf16, #tpu.memory_space<vmem>>, vector<512x256xbf16>
    %c0_1 = arith.constant 0 : index
    %c0_2 = arith.constant 0 : index
    %1 = vector.load %arg2[%c0_1, %c0_2] : memref<256x32xbf16, #tpu.memory_space<vmem>>, vector<256x32xbf16>
    %cst = arith.constant dense<0.000000e+00> : vector<512x32xf32>
    %2 = tpu.matmul %0, %1, %cst {dimension_numbers = #tpu.dot_dimension_numbers<[1], [0], [0], [1], [0, 0, 1, 1], [], []>} : vector<512x256xbf16>, vector<256x32xbf16>, vector<512x32xf32> -> vector<512x32xf32>
    %c0_3 = arith.constant 0 : index
    %c0_4 = arith.constant 0 : index
    %3 = vector.load %arg3[%c0_3, %c0_4] : memref<1x32xf32, #tpu.memory_space<vmem>>, vector<1x32xf32>
    %4 = vector.broadcast %3 : vector<1x32xf32> to vector<512x32xf32>
    %5 = arith.addf %2, %4 : vector<512x32xf32>
    %cst_5 = arith.constant 0.000000e+00 : f32
    %6 = vector.broadcast %cst_5 : f32 to vector<512x32xf32>
    %7 = arith.cmpf ogt, %5, %6 : vector<512x32xf32>
    %cst_6 = arith.constant 2.000000e-01 : f32
    %8 = vector.broadcast %cst_6 : f32 to vector<512x32xf32>
    %9 = arith.mulf %8, %5 : vector<512x32xf32>
    %10 = arith.select %7, %5, %9 : vector<512x32xi1>, vector<512x32xf32>
    %11 = arith.truncf %10 : vector<512x32xf32> to vector<512x32xbf16>
    %c0_7 = arith.constant 0 : index
    %c0_8 = arith.constant 0 : index
    %12 = vector.load %arg4[%c0_7, %c0_8] : memref<512x32xbf16, #tpu.memory_space<vmem>>, vector<512x32xbf16>
    tpu.vector_store %arg4[%c0_7, %c0_8], %11 {strides = array<i32>} : memref<512x32xbf16, #tpu.memory_space<vmem>>, vector<512x32xbf16>,
    return
  }
  func.func @transform_0(%arg0: i32) -> (i32, i32) {
    %c0_i32 = arith.constant 0 : i32
    %c0_i32_0 = arith.constant 0 : i32
    return %arg0, %c0_i32 : i32, i32
  }
  func.func @transform_1(%arg0: i32) -> (i32, i32) {
    %c0_i32 = arith.constant 0 : i32
    %c0_i32_0 = arith.constant 0 : i32
    %c0_i32_1 = arith.constant 0 : i32
    return %c0_i32, %c0_i32_0 : i32, i32
  }
  func.func @transform_2(%arg0: i32) -> (i32, i32) {
    %c0_i32 = arith.constant 0 : i32
    %c0_i32_0 = arith.constant 0 : i32
    %c0_i32_1 = arith.constant 0 : i32
    return %c0_i32, %c0_i32_0 : i32, i32
  }
  func.func @transform_3(%arg0: i32) -> (i32, i32) {
    %c0_i32 = arith.constant 0 : i32
    %c0_i32_0 = arith.constant 0 : i32
    return %arg0, %c0_i32 : i32, i32
  }
}

module attributes {stable_mosaic.version = 11 : i64} {
  func.func @_fused_matmul_kernel(%arg0: i32, %arg1: memref<128x512xbf16, #tpu.memory_space<vmem>>, %arg2: memref<512x64xbf16, #tpu.memory_space<vmem>>, %arg3: memref<1x64xf32, #tpu.memory_space<vmem>>, %arg4: memref<128x64xbf16, #tpu.memory_space<vmem>>) attributes {dimension_semantics = [#tpu.dimension_semantics<parallel>], iteration_bounds = array<i64: 1>, scalar_prefetch = 0 : i64, scratch_operands = 0 : i64, tpu.core_type = #tpu.core_type<tc>, window_params = [{transform_indices = @transform_0, window_bounds = array<i64: 128, 512>}, {pipeline_mode = #tpu.pipeline_mode<synchronous>, transform_indices = @transform_1, window_bounds = array<i64: 512, 64>}, {pipeline_mode = #tpu.pipeline_mode<synchronous>, transform_indices = @transform_2, window_bounds = array<i64: 1, 64>}, {transform_indices = @transform_3, window_bounds = array<i64: 128, 64>}]} {
    %c0 = arith.constant 0 : index
    %c0_0 = arith.constant 0 : index
    %0 = vector.load %arg1[%c0, %c0_0] : memref<128x512xbf16, #tpu.memory_space<vmem>>, vector<128x512xbf16>
    %c0_1 = arith.constant 0 : index
    %c0_2 = arith.constant 0 : index
    %1 = vector.load %arg2[%c0_1, %c0_2] : memref<512x64xbf16, #tpu.memory_space<vmem>>, vector<512x64xbf16>
    %cst = arith.constant dense<0.000000e+00> : vector<128x64xf32>
    %2 = tpu.matmul %0, %1, %cst {dimension_numbers = #tpu.dot_dimension_numbers<[1], [0], [0], [1], [0, 0, 1, 1], [], []>} : vector<128x512xbf16>, vector<512x64xbf16>, vector<128x64xf32> -> vector<128x64xf32>
    %c0_3 = arith.constant 0 : index
    %c0_4 = arith.constant 0 : index
    %3 = vector.load %arg3[%c0_3, %c0_4] : memref<1x64xf32, #tpu.memory_space<vmem>>, vector<1x64xf32>
    %4 = vector.broadcast %3 : vector<1x64xf32> to vector<128x64xf32>
    %5 = arith.addf %2, %4 : vector<128x64xf32>
    %cst_5 = arith.constant 0.000000e+00 : f32
    %6 = vector.broadcast %cst_5 : f32 to vector<128x64xf32>
    %7 = arith.cmpf ogt, %5, %6 : vector<128x64xf32>
    %cst_6 = arith.constant 2.000000e-01 : f32
    %8 = vector.broadcast %cst_6 : f32 to vector<128x64xf32>
    %9 = arith.mulf %8, %5 : vector<128x64xf32>
    %10 = arith.select %7, %5, %9 : vector<128x64xi1>, vector<128x64xf32>
    %11 = arith.truncf %10 : vector<128x64xf32> to vector<128x64xbf16>
    %c0_7 = arith.constant 0 : index
    %c0_8 = arith.constant 0 : index
    %12 = vector.load %arg4[%c0_7, %c0_8] : memref<128x64xbf16, #tpu.memory_space<vmem>>, vector<128x64xbf16>
    tpu.vector_store %arg4[%c0_7, %c0_8], %11 {strides = array<i32>} : memref<128x64xbf16, #tpu.memory_space<vmem>>, vector<128x64xbf16>,
    return
  }
  func.func @transform_0(%arg0: i32) -> (i32, i32) {
    %c0_i32 = arith.constant 0 : i32
    %c0_i32_0 = arith.constant 0 : i32
    return %arg0, %c0_i32 : i32, i32
  }
  func.func @transform_1(%arg0: i32) -> (i32, i32) {
    %c0_i32 = arith.constant 0 : i32
    %c0_i32_0 = arith.constant 0 : i32
    %c0_i32_1 = arith.constant 0 : i32
    return %c0_i32, %c0_i32_0 : i32, i32
  }
  func.func @transform_2(%arg0: i32) -> (i32, i32) {
    %c0_i32 = arith.constant 0 : i32
    %c0_i32_0 = arith.constant 0 : i32
    %c0_i32_1 = arith.constant 0 : i32
    return %c0_i32, %c0_i32_0 : i32, i32
  }
  func.func @transform_3(%arg0: i32) -> (i32, i32) {
    %c0_i32 = arith.constant 0 : i32
    %c0_i32_0 = arith.constant 0 : i32
    return %arg0, %c0_i32 : i32, i32
  }
}

module attributes {stable_mosaic.version = 11 : i64} {
  func.func @_fused_matmul_kernel(%arg0: i32, %arg1: memref<32x1024xbf16, #tpu.memory_space<vmem>>, %arg2: memref<1024x128xbf16, #tpu.memory_space<vmem>>, %arg3: memref<1x128xf32, #tpu.memory_space<vmem>>, %arg4: memref<32x128xbf16, #tpu.memory_space<vmem>>) attributes {dimension_semantics = [#tpu.dimension_semantics<parallel>], iteration_bounds = array<i64: 1>, scalar_prefetch = 0 : i64, scratch_operands = 0 : i64, tpu.core_type = #tpu.core_type<tc>, window_params = [{transform_indices = @transform_0, window_bounds = array<i64: 32, 1024>}, {pipeline_mode = #tpu.pipeline_mode<synchronous>, transform_indices = @transform_1, window_bounds = array<i64: 1024, 128>}, {pipeline_mode = #tpu.pipeline_mode<synchronous>, transform_indices = @transform_2, window_bounds = array<i64: 1, 128>}, {transform_indices = @transform_3, window_bounds = array<i64: 32, 128>}]} {
    %c0 = arith.constant 0 : index
    %c0_0 = arith.constant 0 : index
    %0 = vector.load %arg1[%c0, %c0_0] : memref<32x1024xbf16, #tpu.memory_space<vmem>>, vector<32x1024xbf16>
    %c0_1 = arith.constant 0 : index
    %c0_2 = arith.constant 0 : index
    %1 = vector.load %arg2[%c0_1, %c0_2] : memref<1024x128xbf16, #tpu.memory_space<vmem>>, vector<1024x128xbf16>
    %cst = arith.constant dense<0.000000e+00> : vector<32x128xf32>
    %2 = tpu.matmul %0, %1, %cst {dimension_numbers = #tpu.dot_dimension_numbers<[1], [0], [0], [1], [0, 0, 1, 1], [], []>} : vector<32x1024xbf16>, vector<1024x128xbf16>, vector<32x128xf32> -> vector<32x128xf32>
    %c0_3 = arith.constant 0 : index
    %c0_4 = arith.constant 0 : index
    %3 = vector.load %arg3[%c0_3, %c0_4] : memref<1x128xf32, #tpu.memory_space<vmem>>, vector<1x128xf32>
    %4 = vector.broadcast %3 : vector<1x128xf32> to vector<32x128xf32>
    %5 = arith.addf %2, %4 : vector<32x128xf32>
    %cst_5 = arith.constant 0.000000e+00 : f32
    %6 = vector.broadcast %cst_5 : f32 to vector<32x128xf32>
    %7 = arith.cmpf ogt, %5, %6 : vector<32x128xf32>
    %cst_6 = arith.constant 2.000000e-01 : f32
    %8 = vector.broadcast %cst_6 : f32 to vector<32x128xf32>
    %9 = arith.mulf %8, %5 : vector<32x128xf32>
    %10 = arith.select %7, %5, %9 : vector<32x128xi1>, vector<32x128xf32>
    %11 = arith.truncf %10 : vector<32x128xf32> to vector<32x128xbf16>
    %c0_7 = arith.constant 0 : index
    %c0_8 = arith.constant 0 : index
    %12 = vector.load %arg4[%c0_7, %c0_8] : memref<32x128xbf16, #tpu.memory_space<vmem>>, vector<32x128xbf16>
    tpu.vector_store %arg4[%c0_7, %c0_8], %11 {strides = array<i32>} : memref<32x128xbf16, #tpu.memory_space<vmem>>, vector<32x128xbf16>,
    return
  }
  func.func @transform_0(%arg0: i32) -> (i32, i32) {
    %c0_i32 = arith.constant 0 : i32
    %c0_i32_0 = arith.constant 0 : i32
    return %arg0, %c0_i32 : i32, i32
  }
  func.func @transform_1(%arg0: i32) -> (i32, i32) {
    %c0_i32 = arith.constant 0 : i32
    %c0_i32_0 = arith.constant 0 : i32
    %c0_i32_1 = arith.constant 0 : i32
    return %c0_i32, %c0_i32_0 : i32, i32
  }
  func.func @transform_2(%arg0: i32) -> (i32, i32) {
    %c0_i32 = arith.constant 0 : i32
    %c0_i32_0 = arith.constant 0 : i32
    %c0_i32_1 = arith.constant 0 : i32
    return %c0_i32, %c0_i32_0 : i32, i32
  }
  func.func @transform_3(%arg0: i32) -> (i32, i32) {
    %c0_i32 = arith.constant 0 : i32
    %c0_i32_0 = arith.constant 0 : i32
    return %arg0, %c0_i32 : i32, i32
  }
}

module attributes {stable_mosaic.version = 11 : i64} {
  func.func @_fused_matmul_kernel(%arg0: i32, %arg1: memref<16x2048xbf16, #tpu.memory_space<vmem>>, %arg2: memref<2048x1xbf16, #tpu.memory_space<vmem>>, %arg3: memref<1x1xf32, #tpu.memory_space<vmem>>, %arg4: memref<16x1xf32, #tpu.memory_space<vmem>>) attributes {dimension_semantics = [#tpu.dimension_semantics<parallel>], iteration_bounds = array<i64: 1>, scalar_prefetch = 0 : i64, scratch_operands = 0 : i64, tpu.core_type = #tpu.core_type<tc>, window_params = [{transform_indices = @transform_0, window_bounds = array<i64: 16, 2048>}, {pipeline_mode = #tpu.pipeline_mode<synchronous>, transform_indices = @transform_1, window_bounds = array<i64: 2048, 1>}, {pipeline_mode = #tpu.pipeline_mode<synchronous>, transform_indices = @transform_2, window_bounds = array<i64: 1, 1>}, {transform_indices = @transform_3, window_bounds = array<i64: 16, 1>}]} {
    %c0 = arith.constant 0 : index
    %c0_0 = arith.constant 0 : index
    %0 = vector.load %arg1[%c0, %c0_0] : memref<16x2048xbf16, #tpu.memory_space<vmem>>, vector<16x2048xbf16>
    %c0_1 = arith.constant 0 : index
    %c0_2 = arith.constant 0 : index
    %1 = vector.load %arg2[%c0_1, %c0_2] : memref<2048x1xbf16, #tpu.memory_space<vmem>>, vector<2048x1xbf16>
    %cst = arith.constant dense<0.000000e+00> : vector<16x1xf32>
    %2 = tpu.matmul %0, %1, %cst {dimension_numbers = #tpu.dot_dimension_numbers<[1], [0], [0], [1], [0, 0, 1, 1], [], []>} : vector<16x2048xbf16>, vector<2048x1xbf16>, vector<16x1xf32> -> vector<16x1xf32>
    %c0_3 = arith.constant 0 : index
    %c0_4 = arith.constant 0 : index
    %3 = vector.load %arg3[%c0_3, %c0_4] : memref<1x1xf32, #tpu.memory_space<vmem>>, vector<1x1xf32>
    %4 = vector.broadcast %3 : vector<1x1xf32> to vector<16x1xf32>
    %5 = arith.addf %2, %4 : vector<16x1xf32>
    %cst_5 = arith.constant 0.000000e+00 : f32
    %6 = vector.broadcast %cst_5 : f32 to vector<16x1xf32>
    %7 = arith.subf %6, %5 : vector<16x1xf32>
    %8 = math.exp %7 : vector<16x1xf32>
    %cst_6 = arith.constant 1.000000e+00 : f32
    %9 = vector.broadcast %cst_6 : f32 to vector<16x1xf32>
    %10 = arith.addf %9, %8 : vector<16x1xf32>
    %cst_7 = arith.constant 1.000000e+00 : f32
    %11 = vector.broadcast %cst_7 : f32 to vector<16x1xf32>
    %12 = arith.divf %11, %10 : vector<16x1xf32>
    %c0_8 = arith.constant 0 : index
    %c0_9 = arith.constant 0 : index
    %13 = vector.load %arg4[%c0_8, %c0_9] : memref<16x1xf32, #tpu.memory_space<vmem>>, vector<16x1xf32>
    tpu.vector_store %arg4[%c0_8, %c0_9], %12 {strides = array<i32>} : memref<16x1xf32, #tpu.memory_space<vmem>>, vector<16x1xf32>,
    return
  }
  func.func @transform_0(%arg0: i32) -> (i32, i32) {
    %c0_i32 = arith.constant 0 : i32
    %c0_i32_0 = arith.constant 0 : i32
    return %arg0, %c0_i32 : i32, i32
  }
  func.func @transform_1(%arg0: i32) -> (i32, i32) {
    %c0_i32 = arith.constant 0 : i32
    %c0_i32_0 = arith.constant 0 : i32
    %c0_i32_1 = arith.constant 0 : i32
    return %c0_i32, %c0_i32_0 : i32, i32
  }
  func.func @transform_2(%arg0: i32) -> (i32, i32) {
    %c0_i32 = arith.constant 0 : i32
    %c0_i32_0 = arith.constant 0 : i32
    %c0_i32_1 = arith.constant 0 : i32
    return %c0_i32, %c0_i32_0 : i32, i32
  }
  func.func @transform_3(%arg0: i32) -> (i32, i32) {
    %c0_i32 = arith.constant 0 : i32
    %c0_i32_0 = arith.constant 0 : i32
    return %arg0, %c0_i32 : i32, i32
  }
}

</mosaic_0001>

<bundles_post_ra>
// kernel: _lambda_.6
= control target key start
LH: loop header
LB: loop body
LE: loop exit
PB: predicated region body
PF: predicated region fallthrough
CT: control target
= control target key end

     0   :  { %s3065_s12 = smov 0   ;;  %s3806_s0 = inlined_call_operand.vmem [shape: bf16[2048,128], index: 0, kind: input, shape index: {}]   ;;  %s3807_s1 = inlined_call_operand.vmem [shape: bf16[128,16], index: 1, kind: input, shape index: {}]   ;;  %s3808_s2 = inlined_call_operand.vmem [shape: f32[1,16], index: 2, kind: input, shape index: {}]   ;;  %s3809_s3 = inlined_call_operand.vmem [shape: bf16[2048,16], index: 3, kind: output, shape index: {}]  }
   0x1 LB: > { %s2384_s13 = sadd.s32 4294967295, %s3043_s12   ;;  %p2388_p0 = scmp.ge.s32.totalorder %s3043_s12, 1  ;;  %s3043_s12 = sphi %s3065_s12, %s13_s12  }
   0x2   : > { %p138_p1 = scmp.lt.s32.totalorder %s3043_s12, 3 }
   0x4   : > { %p139_p2 = pnand %p2388_p0, %p138_p1 }
   0x5   : > { %s2389_s16 = sshll.u32 (!%p139_p2), %s2384_s13, 7 }
   0x6   : > { %142 = sbr.rel (%p139_p2) target bundleno = 404 (0x194), region = 32  ;;  %p163_p3 = scmp.lt.s32.totalorder (!%p139_p2), %s2389_s16, 255 }
   0xb   : > { %v2964_v0 = vld [vmem:[%s3807_s1 + $0x38] sm:$0xff]   ;;  %v2965_v1 = vld [vmem:[%s3807_s1 + $0x30] sm:$0xff]   ;;  %s3811_s16 = smov (!%p163_p3, %s2389_s16), 255  ;;  %v2966_v2 = vld [vmem:[%s3807_s1 + $0x28] sm:$0xff]   ;;  %vm2199_vm2 = vcmask 125952  }
   0xc   : > { %2796 = vmatprep.subr.bf16.mxu0 %v2964_v0  ;;  %2940 = vmatprep.subr.bf16.mxu1 %v2964_v0  ;;  %s2390_s21 = sshll.u32 %s3811_s16, 2  ;;  %v2967_v3 = vld [vmem:[%s3807_s1 + $0x20] sm:$0xff]   ;;  %v2968_v6 = vld [vmem:[%s3807_s1 + $0x18] sm:$0xff]   ;;  %v2969_v7 = vld [vmem:[%s3807_s1 + $0x10] sm:$0xff]  }
   0xd   : > { %2797 = vmatpush3.bf16.msra.mxu0 %v2964_v0  ;;  %2948 = vmatpush3.bf16.msra.mxu1 %v2964_v0  ;;  %s3090_s24 = scalar_lea.vmem %s3806_s0, %s2390_s21  ;;  %v2970_v8 = vld [vmem:[%s3807_s1 + $0x8] sm:$0xff]   ;;  %v2971_v9 = vld [vmem:[%s3807_s1] sm:$0xff]   ;;  %s3185_s13 = scalar_lea.vmem %s3809_s3, %s2390_s21 }
   0xe   : > { %2798 = vmatprep.subr.bf16.mxu0 %v2965_v1  ;;  %2941 = vmatprep.subr.bf16.mxu1 %v2965_v1  ;;  %v2972_v4 = vld [vmem:[%s3090_s24] sm:$0xff]   ;;  %v2974_v10 = vld [vmem:[%s3090_s24 + $0x8] sm:$0xff]   ;;  %v2976_v12 = vld [vmem:[%s3090_s24 + $0x10] sm:$0xff]  }
   0xf   : > { %v2973_v5 = vld [vmem:[%s3090_s24 + $0x100] sm:$0xff]   ;;  %2812 = vmatprep.mubr.bf16.mxu0 %v2972_v4  ;;  %v2975_v11 = vld [vmem:[%s3090_s24 + $0x108] sm:$0xff]   ;;  %v2977_v13 = vld [vmem:[%s3090_s24 + $0x110] sm:$0xff]  }
  0x10   : > { %2876 = vmatprep.mubr.bf16.mxu1 %v2973_v5  ;;  %v2978_v14 = vld [vmem:[%s3090_s24 + $0x18] sm:$0xff]   ;;  %v2980_v16 = vld [vmem:[%s3090_s24 + $0x20] sm:$0xff]   ;;  %v2982_v18 = vld [vmem:[%s3090_s24 + $0x28] sm:$0xff]  }
  0x11   : > { %2799 = vmatpush3.bf16.msra.mxu0 %v2965_v1  ;;  %2949 = vmatpush3.bf16.msra.mxu1 %v2965_v1  ;;  %v2979_v15 = vld [vmem:[%s3090_s24 + $0x118] sm:$0xff]   ;;  %v2981_v17 = vld [vmem:[%s3090_s24 + $0x120] sm:$0xff]   ;;  %v2983_v19 = vld [vmem:[%s3090_s24 + $0x128] sm:$0xff]  }
  0x12   : > { %2800 = vmatprep.subr.bf16.mxu0 %v2966_v2  ;;  %2942 = vmatprep.subr.bf16.mxu1 %v2966_v2  ;;  %v2984_v20 = vld [vmem:[%s3090_s24 + $0x30] sm:$0xff]   ;;  %v2986_v22 = vld [vmem:[%s3090_s24 + $0x38] sm:$0xff]   ;;  %v2988_v24 = vld [vmem:[%s3090_s24 + $0x40] sm:$0xff]  }
  0x13   : > { %v2985_v21 = vld [vmem:[%s3090_s24 + $0x130] sm:$0xff]   ;;  %v2987_v23 = vld [vmem:[%s3090_s24 + $0x138] sm:$0xff]   ;;  %v2989_v25 = vld [vmem:[%s3090_s24 + $0x140] sm:$0xff]  }
  0x14   : > { %v2990_v26 = vld [vmem:[%s3090_s24 + $0x48] sm:$0xff]   ;;  %v2992_v28 = vld [vmem:[%s3090_s24 + $0x50] sm:$0xff]   ;;  %v2994_v30 = vld [vmem:[%s3090_s24 + $0x58] sm:$0xff]  }
  0x15   : > { %2801 = vmatpush3.bf16.msra.mxu0 %v2966_v2  ;;  %2950 = vmatpush3.bf16.msra.mxu1 %v2966_v2  ;;  %v2991_v27 = vld [vmem:[%s3090_s24 + $0x148] sm:$0xff]   ;;  %v2993_v29 = vld [vmem:[%s3090_s24 + $0x150] sm:$0xff]   ;;  %v2995_v31 = vld [vmem:[%s3090_s24 + $0x158] sm:$0xff]  }
  0x16   : > { %2802 = vmatprep.subr.bf16.mxu0 %v2967_v3  ;;  %2943 = vmatprep.subr.bf16.mxu1 %v2967_v3  ;;  %v2996_v32 = vld [vmem:[%s3090_s24 + $0x60] sm:$0xff]   ;;  %v2998_v34 = vld [vmem:[%s3090_s24 + $0x68] sm:$0xff]   ;;  %v3000_v36 = vld [vmem:[%s3090_s24 + $0x70] sm:$0xff]  }
  0x17   : > { %v2997_v33 = vld [vmem:[%s3090_s24 + $0x160] sm:$0xff]   ;;  %v2999_v35 = vld [vmem:[%s3090_s24 + $0x168] sm:$0xff]   ;;  %v3001_v37 = vld [vmem:[%s3090_s24 + $0x170] sm:$0xff]  }
  0x18   : > { %v3002_v38 = vld [vmem:[%s3090_s24 + $0x78] sm:$0xff]   ;;  %v3004_v40 = vld [vmem:[%s3090_s24 + $0x80] sm:$0xff]   ;;  %v3006_v42 = vld [vmem:[%s3090_s24 + $0x88] sm:$0xff]  }
  0x19   : > { %2803 = vmatpush3.bf16.msra.mxu0 %v2967_v3  ;;  %2951 = vmatpush3.bf16.msra.mxu1 %v2967_v3  ;;  %v3003_v39 = vld [vmem:[%s3090_s24 + $0x178] sm:$0xff]   ;;  %v3005_v41 = vld [vmem:[%s3090_s24 + $0x180] sm:$0xff]   ;;  %v3007_v43 = vld [vmem:[%s3090_s24 + $0x188] sm:$0xff]  }
  0x1a   : > { %2804 = vmatprep.subr.bf16.mxu0 %v2968_v6  ;;  %2944 = vmatprep.subr.bf16.mxu1 %v2968_v6  ;;  %v3008_v44 = vld [vmem:[%s3090_s24 + $0x90] sm:$0xff]   ;;  %v3010_v46 = vld [vmem:[%s3090_s24 + $0x98] sm:$0xff]   ;;  %v3012_v48 = vld [vmem:[%s3090_s24 + $0xa0] sm:$0xff]  }
  0x1b   : > { %v3009_v45 = vld [vmem:[%s3090_s24 + $0x190] sm:$0xff]   ;;  %v3011_v47 = vld [vmem:[%s3090_s24 + $0x198] sm:$0xff]   ;;  %v3013_v49 = vld [vmem:[%s3090_s24 + $0x1a0] sm:$0xff]  }
  0x1c   : > { %v3014_v50 = vld [vmem:[%s3090_s24 + $0xa8] sm:$0xff]   ;;  %v3016_v52 = vld [vmem:[%s3090_s24 + $0xb0] sm:$0xff]   ;;  %v3018_v54 = vld [vmem:[%s3090_s24 + $0xb8] sm:$0xff]  }
  0x1d   : > { %2805 = vmatpush3.bf16.msra.mxu0 %v2968_v6  ;;  %2952 = vmatpush3.bf16.msra.mxu1 %v2968_v6  ;;  %v3015_v51 = vld [vmem:[%s3090_s24 + $0x1a8] sm:$0xff]   ;;  %v3017_v53 = vld [vmem:[%s3090_s24 + $0x1b0] sm:$0xff]   ;;  %v3019_v55 = vld [vmem:[%s3090_s24 + $0x1b8] sm:$0xff]  }
  0x1e   : > { %2806 = vmatprep.subr.bf16.mxu0 %v2969_v7  ;;  %2945 = vmatprep.subr.bf16.mxu1 %v2969_v7  ;;  %v3020_v56 = vld [vmem:[%s3090_s24 + $0xc0] sm:$0xff]   ;;  %v3022_v58 = vld [vmem:[%s3090_s24 + $0xc8] sm:$0xff]   ;;  %v3024_v60 = vld [vmem:[%s3090_s24 + $0xd0] sm:$0xff]  }
  0x1f   : > { %v3021_v57 = vld [vmem:[%s3090_s24 + $0x1c0] sm:$0xff]   ;;  %v3023_v59 = vld [vmem:[%s3090_s24 + $0x1c8] sm:$0xff]   ;;  %v3025_v61 = vld [vmem:[%s3090_s24 + $0x1d0] sm:$0xff]  }
  0x20   : > { %v3026_v62 = vld [vmem:[%s3090_s24 + $0xd8] sm:$0xff]   ;;  %v3028_v0 = vld [vmem:[%s3090_s24 + $0xe0] sm:$0xff]   ;;  %v3030_v2 = vld [vmem:[%s3090_s24 + $0xe8] sm:$0xff]  }
  0x21   : > { %2807 = vmatpush3.bf16.msra.mxu0 %v2969_v7  ;;  %2953 = vmatpush3.bf16.msra.mxu1 %v2969_v7  ;;  %v3027_v63 = vld [vmem:[%s3090_s24 + $0x1d8] sm:$0xff]   ;;  %v3029_v1 = vld [vmem:[%s3090_s24 + $0x1e0] sm:$0xff]   ;;  %v3031_v3 = vld [vmem:[%s3090_s24 + $0x1e8] sm:$0xff]  }
  0x22   : > { %2808 = vmatprep.subr.bf16.mxu0 %v2970_v8  ;;  %2946 = vmatprep.subr.bf16.mxu1 %v2970_v8  ;;  %v3032_v4 = vld [vmem:[%s3090_s24 + $0xf0] sm:$0xff]   ;;  %v3034_v6 = vld [vmem:[%s3090_s24 + $0xf8] sm:$0xff]  }
  0x23   : > { %v3033_v5 = vld [vmem:[%s3090_s24 + $0x1f0] sm:$0xff]   ;;  %v3035_v7 = vld [vmem:[%s3090_s24 + $0x1f8] sm:$0xff]  }
  0x25   : > { %2809 = vmatpush3.bf16.msra.mxu0 %v2970_v8  ;;  %2954 = vmatpush3.bf16.msra.mxu1 %v2970_v8  ;;  %v3174_v8 = vld [vmem:[%s3808_s2] ss:$0 sm:$0xff] }
  0x26   : > { %2810 = vmatprep.subr.bf16.mxu0 %v2971_v9  ;;  %2947 = vmatprep.subr.bf16.mxu1 %v2971_v9 }
  0x29   : > { %2811 = vmatpush3.bf16.msra.mxu0 %v2971_v9  ;;  %2955 = vmatpush3.bf16.msra.mxu1 %v2971_v9 }
  0x2c   : > { %2813 = vmatmul.mubr.bf16.vlgmr.msra.gmra.mxu0 %v2974_v10  ;;  %2877 = vmatmul.mubr.bf16.vlgmr.msra.gmra.mxu1 %v2975_v11 }
  0x2d   : > { %2816 = vmatprep.mubr.bf16.mxu0 %v2976_v12  ;;  %2880 = vmatprep.mubr.bf16.mxu1 %v2977_v13 }
  0x34   : > { %2817 = vmatmul.mubr.bf16.gmra.mxu0 %v2978_v14  ;;  %2881 = vmatmul.mubr.bf16.gmra.mxu1 %v2979_v15 }
  0x35   : > { %2820 = vmatprep.mubr.bf16.mxu0 %v2980_v16  ;;  %2884 = vmatprep.mubr.bf16.mxu1 %v2981_v17 }
  0x3c   : > { %2821 = vmatmul.mubr.bf16.gmra.mxu0 %v2982_v18  ;;  %2885 = vmatmul.mubr.bf16.gmra.mxu1 %v2983_v19 }
  0x3d   : > { %2824 = vmatprep.mubr.bf16.mxu0 %v2984_v20  ;;  %2888 = vmatprep.mubr.bf16.mxu1 %v2985_v21 }
  0x44   : > { %2825 = vmatmul.mubr.bf16.gmra.mxu0 %v2986_v22  ;;  %2889 = vmatmul.mubr.bf16.gmra.mxu1 %v2987_v23 }
  0x45   : > { %2828 = vmatprep.mubr.bf16.mxu0 %v2988_v24  ;;  %2892 = vmatprep.mubr.bf16.mxu1 %v2989_v25 }
  0x4c   : > { %2829 = vmatmul.mubr.bf16.gmra.mxu0 %v2990_v26  ;;  %2893 = vmatmul.mubr.bf16.gmra.mxu1 %v2991_v27 }
  0x4d   : > { %2832 = vmatprep.mubr.bf16.mxu0 %v2992_v28  ;;  %2896 = vmatprep.mubr.bf16.mxu1 %v2993_v29 }
  0x54   : > { %2833 = vmatmul.mubr.bf16.gmra.mxu0 %v2994_v30  ;;  %2897 = vmatmul.mubr.bf16.gmra.mxu1 %v2995_v31 }
  0x55   : > { %2836 = vmatprep.mubr.bf16.mxu0 %v2996_v32  ;;  %2900 = vmatprep.mubr.bf16.mxu1 %v2997_v33 }
  0x5c   : > { %2837 = vmatmul.mubr.bf16.gmra.mxu0 %v2998_v34  ;;  %2901 = vmatmul.mubr.bf16.gmra.mxu1 %v2999_v35 }
  0x5d   : > { %2840 = vmatprep.mubr.bf16.mxu0 %v3000_v36  ;;  %2904 = vmatprep.mubr.bf16.mxu1 %v3001_v37 }
  0x64   : > { %2841 = vmatmul.mubr.bf16.gmra.mxu0 %v3002_v38  ;;  %2905 = vmatmul.mubr.bf16.gmra.mxu1 %v3003_v39 }
  0x65   : > { %2844 = vmatprep.mubr.bf16.mxu0 %v3004_v40  ;;  %2908 = vmatprep.mubr.bf16.mxu1 %v3005_v41 }
  0x6c   : > { %2845 = vmatmul.mubr.bf16.gmra.mxu0 %v3006_v42  ;;  %2909 = vmatmul.mubr.bf16.gmra.mxu1 %v3007_v43 }
  0x6d   : > { %2848 = vmatprep.mubr.bf16.mxu0 %v3008_v44  ;;  %2912 = vmatprep.mubr.bf16.mxu1 %v3009_v45 }
  0x74   : > { %2849 = vmatmul.mubr.bf16.gmra.mxu0 %v3010_v46  ;;  %2913 = vmatmul.mubr.bf16.gmra.mxu1 %v3011_v47 }
  0x75   : > { %2852 = vmatprep.mubr.bf16.mxu0 %v3012_v48  ;;  %2916 = vmatprep.mubr.bf16.mxu1 %v3013_v49 }
  0x7c   : > { %2853 = vmatmul.mubr.bf16.gmra.mxu0 %v3014_v50  ;;  %2917 = vmatmul.mubr.bf16.gmra.mxu1 %v3015_v51 }
  0x7d   : > { %2856 = vmatprep.mubr.bf16.mxu0 %v3016_v52  ;;  %2920 = vmatprep.mubr.bf16.mxu1 %v3017_v53 }
  0x84   : > { %2857 = vmatmul.mubr.bf16.gmra.mxu0 %v3018_v54  ;;  %2921 = vmatmul.mubr.bf16.gmra.mxu1 %v3019_v55 }
  0x85   : > { %2860 = vmatprep.mubr.bf16.mxu0 %v3020_v56  ;;  %2924 = vmatprep.mubr.bf16.mxu1 %v3021_v57 }
  0x8c   : > { %2861 = vmatmul.mubr.bf16.gmra.mxu0 %v3022_v58  ;;  %2925 = vmatmul.mubr.bf16.gmra.mxu1 %v3023_v59 }
  0x8d   : > { %2864 = vmatprep.mubr.bf16.mxu0 %v3024_v60  ;;  %2928 = vmatprep.mubr.bf16.mxu1 %v3025_v61 }
  0x94   : > { %2865 = vmatmul.mubr.bf16.gmra.mxu0 %v3026_v62  ;;  %2929 = vmatmul.mubr.bf16.gmra.mxu1 %v3027_v63 }
  0x95   : > { %2868 = vmatprep.mubr.bf16.mxu0 %v3028_v0  ;;  %2932 = vmatprep.mubr.bf16.mxu1 %v3029_v1 }
  0x9c   : > { %2869 = vmatmul.mubr.bf16.gmra.mxu0 %v3030_v2  ;;  %2933 = vmatmul.mubr.bf16.gmra.mxu1 %v3031_v3 }
  0x9d   : > { %2872 = vmatprep.mubr.bf16.mxu0 %v3032_v4  ;;  %2936 = vmatprep.mubr.bf16.mxu1 %v3033_v5 }
  0xa4   : > { %2873 = vmatmul.mubr.bf16.gmra.mxu0 %v3034_v6  ;;  %2937 = vmatmul.mubr.bf16.gmra.mxu1 %v3035_v7 }
  0xec   : > { %v2814_v9 = vpop.f32.mrf.mxu0  ;;  %v2878_v10 = vpop.f32.mrf.mxu1 }
  0xed   : > { %v801_v11 = vadd.f32 %v2814_v9, %v3174_v8  ;;  %v1057_v12 = vadd.f32 %v2878_v10, %v3174_v8 }
  0xee   : > { %v792_v13 = vpop.f32.mrf.mxu0  ;;  %v1048_v14 = vpop.f32.mrf.mxu1 }
  0xef   : > { %vm1305_vm0 = vcmp.gt.f32.partialorder %v801_v11, 0.0  ;;  %v1433_v15 = vmul.f32 0.2, %v801_v11  ;;  %vm1369_vm1 = vcmp.gt.f32.partialorder %v1057_v12, 0.0  ;;  %v1497_v16 = vmul.f32 0.2, %v1057_v12 }
  0xf0   : > { %v793_v17 = vadd.f32 %v3174_v8, %v792_v13  ;;  %v1049_v18 = vadd.f32 %v3174_v8, %v1048_v14  ;;  %v2815_v19 = vpop.f32.mrf.mxu0  ;;  %v2879_v20 = vpop.f32.mrf.mxu1 }
  0xf1   : > { %v1561_v21 = vsel %vm1305_vm0, %v801_v11, %v1433_v15  ;;  %v1625_v22 = vsel %vm1369_vm1, %v1057_v12, %v1497_v16  ;;  %v804_v23 = vadd.f32 %v2815_v19, %v3174_v8  ;;  %v1060_v24 = vadd.f32 %v2879_v20, %v3174_v8 }
  0xf2   : > { %v2598_v25 = vpack.c.bf16 %v1561_v21, %v1561_v21  ;;  %v2662_v26 = vpack.c.bf16 %v1625_v22, %v1625_v22  ;;  %vm1303_vm3 = vcmp.gt.f32.partialorder %v793_v17, 0.0  ;;  %v1431_v27 = vmul.f32 0.2, %v793_v17  ;;  %v795_v28 = vpop.f32.mrf.mxu0  ;;  %v1051_v29 = vpop.f32.mrf.mxu1 }
  0xf3   : > { %vm1367_vm4 = vcmp.gt.f32.partialorder %v1049_v18, 0.0  ;;  %v1495_v30 = vmul.f32 0.2, %v1049_v18  ;;  %vm1306_vm5 = vcmp.gt.f32.partialorder %v804_v23, 0.0  ;;  %v1434_v31 = vmul.f32 0.2, %v804_v23 }
  0xf4   : > { %2202 = vst.msk [vmem:[%s3185_s13 + $0x8] sm:$0xf] %vm2199_vm2, %v2598_v25  ;;  %2266 = vst.msk [vmem:[%s3185_s13 + $0x108] sm:$0xf] %vm2199_vm2, %v2662_v26  ;;  %v1559_v32 = vsel %vm1303_vm3, %v793_v17, %v1431_v27  ;;  %vm1370_vm6 = vcmp.gt.f32.partialorder %v1060_v24, 0.0  ;;  %v796_v34 = vadd.f32 %v3174_v8, %v795_v28  ;;  %v2818_v35 = vpop.f32.mrf.mxu0  ;;  %v2882_v36 = vpop.f32.mrf.mxu1  ;;  %v1052_v40 = vadd.f32 %v3174_v8, %v1051_v29 }
  0xf5   : > { %v1498_v33 = vmul.f32 0.2, %v1060_v24  ;;  %v2596_v37 = vpack.c.bf16 %v1559_v32, %v1559_v32  ;;  %v1623_v38 = vsel %vm1367_vm4, %v1049_v18, %v1495_v30  ;;  %v1562_v39 = vsel %vm1306_vm5, %v804_v23, %v1434_v31 }
  0xf6   : > { %v2660_v41 = vpack.c.bf16 %v1623_v38, %v1623_v38  ;;  %v2599_v42 = vpack.c.bf16 %v1562_v39, %v1562_v39  ;;  %vm1304_vm7 = vcmp.gt.f32.partialorder %v796_v34, 0.0  ;;  %v808_v44 = vpop.f32.mrf.mxu0  ;;  %v1064_v45 = vpop.f32.mrf.mxu1  ;;  %v1432_v47 = vmul.f32 0.2, %v796_v34 }
  0xf7   : > { %v1626_v43 = vsel %vm1370_vm6, %v1060_v24, %v1498_v33  ;;  %2200 = vst.msk [vmem:[%s3185_s13] sm:$0xf] %vm2199_vm2, %v2596_v37  ;;  %vm1368_vm8 = vcmp.gt.f32.partialorder %v1052_v40, 0.0  ;;  %v1496_v48 = vmul.f32 0.2, %v1052_v40  ;;  %v817_v49 = vadd.f32 %v2818_v35, %v3174_v8 }
  0xf8   : > { %v2663_v46 = vpack.c.bf16 %v1626_v43, %v1626_v43  ;;  %2264 = vst.msk [vmem:[%s3185_s13 + $0x100] sm:$0xf] %vm2199_vm2, %v2660_v41  ;;  %2203 = vst.msk [vmem:[%s3185_s13 + $0xc] sm:$0xf] %vm2199_vm2, %v2599_v42  ;;  %v1073_v50 = vadd.f32 %v2882_v36, %v3174_v8  ;;  %v809_v51 = vadd.f32 %v3174_v8, %v808_v44  ;;  %v2819_v53 = vpop.f32.mrf.mxu0  ;;  %v2883_v54 = vpop.f32.mrf.mxu1 }
  0xf9   : > { %v1065_v52 = vadd.f32 %v3174_v8, %v1064_v45  ;;  %v1560_v55 = vsel %vm1304_vm7, %v796_v34, %v1432_v47  ;;  %v1624_v56 = vsel %vm1368_vm8, %v1052_v40, %v1496_v48  ;;  %v820_v57 = vadd.f32 %v2819_v53, %v3174_v8 }
  0xfa   : > { %2267 = vst.msk [vmem:[%s3185_s13 + $0x10c] sm:$0xf] %vm2199_vm2, %v2663_v46  ;;  %v1076_v58 = vadd.f32 %v2883_v54, %v3174_v8  ;;  %v2597_v59 = vpack.c.bf16 %v1560_v55, %v1560_v55  ;;  %v2661_v60 = vpack.c.bf16 %v1624_v56, %v1624_v56  ;;  %vm1309_vm9 = vcmp.gt.f32.partialorder %v817_v49, 0.0  ;;  %v811_v62 = vpop.f32.mrf.mxu0  ;;  %v1067_v63 = vpop.f32.mrf.mxu1 }
  0xfb   : > { %v1437_v61 = vmul.f32 0.2, %v817_v49  ;;  %vm1373_vm10 = vcmp.gt.f32.partialorder %v1073_v50, 0.0  ;;  %v1501_v0 = vmul.f32 0.2, %v1073_v50  ;;  %vm1307_vm11 = vcmp.gt.f32.partialorder %v809_v51, 0.0 }
  0xfc   : > { %v1435_v1 = vmul.f32 0.2, %v809_v51  ;;  %2201 = vst.msk [vmem:[%s3185_s13 + $0x4] sm:$0xf] %vm2199_vm2, %v2597_v59  ;;  %2265 = vst.msk [vmem:[%s3185_s13 + $0x104] sm:$0xf] %vm2199_vm2, %v2661_v60  ;;  %v2822_v4 = vpop.f32.mrf.mxu0  ;;  %v2886_v5 = vpop.f32.mrf.mxu1  ;;  %v812_v19 = vadd.f32 %v3174_v8, %v811_v62  ;;  %v1068_v21 = vadd.f32 %v3174_v8, %v1067_v63 }
  0xfd   : > { %v1565_v2 = vsel %vm1309_vm9, %v817_v49, %v1437_v61  ;;  %vm1371_vm12 = vcmp.gt.f32.partialorder %v1065_v52, 0.0  ;;  %v1499_v3 = vmul.f32 0.2, %v1065_v52  ;;  %vm1310_vm13 = vcmp.gt.f32.partialorder %v820_v57, 0.0 }
  0xfe   : > { %v2602_v6 = vpack.c.bf16 %v1565_v2, %v1565_v2  ;;  %v1629_v7 = vsel %vm1373_vm10, %v1073_v50, %v1501_v0  ;;  %v1563_v9 = vsel %vm1307_vm11, %v809_v51, %v1435_v1  ;;  %v1438_v10 = vmul.f32 0.2, %v820_v57  ;;  %v824_v14 = vpop.f32.mrf.mxu0  ;;  %v1080_v15 = vpop.f32.mrf.mxu1 }
  0xff   : > { %v2666_v11 = vpack.c.bf16 %v1629_v7, %v1629_v7  ;;  %v2600_v12 = vpack.c.bf16 %v1563_v9, %v1563_v9  ;;  %v1627_v13 = vsel %vm1371_vm12, %v1065_v52, %v1499_v3  ;;  %vm1374_vm14 = vcmp.gt.f32.partialorder %v1076_v58, 0.0 }
 0x100   : > { %2206 = vst.msk [vmem:[%s3185_s13 + $0x18] sm:$0xf] %vm2199_vm2, %v2602_v6  ;;  %v2664_v16 = vpack.c.bf16 %v1627_v13, %v1627_v13  ;;  %v1566_v17 = vsel %vm1310_vm13, %v820_v57, %v1438_v10  ;;  %v1502_v18 = vmul.f32 0.2, %v1076_v58  ;;  %v833_v22 = vadd.f32 %v2822_v4, %v3174_v8  ;;  %v2823_v24 = vpop.f32.mrf.mxu0  ;;  %v2887_v25 = vpop.f32.mrf.mxu1 }
 0x101   : > { %2270 = vst.msk [vmem:[%s3185_s13 + $0x118] sm:$0xf] %vm2199_vm2, %v2666_v11  ;;  %2204 = vst.msk [vmem:[%s3185_s13 + $0x10] sm:$0xf] %vm2199_vm2, %v2600_v12  ;;  %v2603_v20 = vpack.c.bf16 %v1566_v17, %v1566_v17  ;;  %v1089_v23 = vadd.f32 %v2886_v5, %v3174_v8  ;;  %vm1308_vm15 = vcmp.gt.f32.partialorder %v812_v19, 0.0  ;;  %v825_v28 = vadd.f32 %v3174_v8, %v824_v14 }
 0x102   : > { %2268 = vst.msk [vmem:[%s3185_s13 + $0x110] sm:$0xf] %vm2199_vm2, %v2664_v16  ;;  %v1630_v26 = vsel %vm1374_vm14, %v1076_v58, %v1502_v18  ;;  %v1436_v27 = vmul.f32 0.2, %v812_v19  ;;  %vm1372_vm0 = vcmp.gt.f32.partialorder %v1068_v21, 0.0  ;;  %vm1313_vm1 = vcmp.gt.f32.partialorder %v833_v22, 0.0  ;;  %v827_v31 = vpop.f32.mrf.mxu0  ;;  %v1083_v32 = vpop.f32.mrf.mxu1 }
 0x103   : > { %2207 = vst.msk [vmem:[%s3185_s13 + $0x1c] sm:$0xf] %vm2199_vm2, %v2603_v20  ;;  %v2667_v29 = vpack.c.bf16 %v1630_v26, %v1630_v26  ;;  %v1500_v30 = vmul.f32 0.2, %v1068_v21  ;;  %v1441_v34 = vmul.f32 0.2, %v833_v22  ;;  %v1081_v44 = vadd.f32 %v3174_v8, %v1080_v15 }
 0x104   : > { %v1564_v33 = vsel %vm1308_vm15, %v812_v19, %v1436_v27  ;;  %vm1377_vm3 = vcmp.gt.f32.partialorder %v1089_v23, 0.0  ;;  %v1505_v35 = vmul.f32 0.2, %v1089_v23  ;;  %vm1311_vm4 = vcmp.gt.f32.partialorder %v825_v28, 0.0  ;;  %v2826_v39 = vpop.f32.mrf.mxu0  ;;  %v2890_v40 = vpop.f32.mrf.mxu1 }
 0x105   : > { %2271 = vst.msk [vmem:[%s3185_s13 + $0x11c] sm:$0xf] %vm2199_vm2, %v2667_v29  ;;  %v2601_v36 = vpack.c.bf16 %v1564_v33, %v1564_v33  ;;  %v1628_v37 = vsel %vm1372_vm0, %v1068_v21, %v1500_v30  ;;  %v1439_v38 = vmul.f32 0.2, %v825_v28  ;;  %v1569_v42 = vsel %vm1313_vm1, %v833_v22, %v1441_v34 }
 0x106   : > { %v2665_v41 = vpack.c.bf16 %v1628_v37, %v1628_v37  ;;  %v1633_v43 = vsel %vm1377_vm3, %v1089_v23, %v1505_v35  ;;  %v2606_v45 = vpack.c.bf16 %v1569_v42, %v1569_v42  ;;  %v836_v48 = vadd.f32 %v2823_v24, %v3174_v8  ;;  %v840_v49 = vpop.f32.mrf.mxu0  ;;  %v1096_v50 = vpop.f32.mrf.mxu1 }
 0x107   : > { %2205 = vst.msk [vmem:[%s3185_s13 + $0x14] sm:$0xf] %vm2199_vm2, %v2601_v36  ;;  %v2670_v46 = vpack.c.bf16 %v1633_v43, %v1633_v43  ;;  %v1567_v47 = vsel %vm1311_vm4, %v825_v28, %v1439_v38  ;;  %vm1375_vm5 = vcmp.gt.f32.partialorder %v1081_v44, 0.0  ;;  %v1503_v52 = vmul.f32 0.2, %v1081_v44 }
 0x108   : > { %2269 = vst.msk [vmem:[%s3185_s13 + $0x114] sm:$0xf] %vm2199_vm2, %v2665_v41  ;;  %v2604_v51 = vpack.c.bf16 %v1567_v47, %v1567_v47  ;;  %v1092_v53 = vadd.f32 %v2887_v25, %v3174_v8  ;;  %2210 = vst.msk [vmem:[%s3185_s13 + $0x28] sm:$0xf] %vm2199_vm2, %v2606_v45  ;;  %vm1314_vm6 = vcmp.gt.f32.partialorder %v836_v48, 0.0  ;;  %v828_v55 = vadd.f32 %v3174_v8, %v827_v31  ;;  %v2827_v57 = vpop.f32.mrf.mxu0  ;;  %v2891_v58 = vpop.f32.mrf.mxu1 }
 0x109   : > { %2274 = vst.msk [vmem:[%s3185_s13 + $0x128] sm:$0xf] %vm2199_vm2, %v2670_v46  ;;  %v1442_v54 = vmul.f32 0.2, %v836_v48  ;;  %v1084_v56 = vadd.f32 %v3174_v8, %v1083_v32  ;;  %v1631_v59 = vsel %vm1375_vm5, %v1081_v44, %v1503_v52  ;;  %v849_v61 = vadd.f32 %v2826_v39, %v3174_v8 }
 0x10a   : > { %2208 = vst.msk [vmem:[%s3185_s13 + $0x20] sm:$0xf] %vm2199_vm2, %v2604_v51  ;;  %vm1378_vm7 = vcmp.gt.f32.partialorder %v1092_v53, 0.0  ;;  %v1506_v60 = vmul.f32 0.2, %v1092_v53  ;;  %v2668_v62 = vpack.c.bf16 %v1631_v59, %v1631_v59  ;;  %vm1312_vm8 = vcmp.gt.f32.partialorder %v828_v55, 0.0  ;;  %v843_v1 = vpop.f32.mrf.mxu0  ;;  %v1099_v2 = vpop.f32.mrf.mxu1 }
 0x10b   : > { %v1570_v63 = vsel %vm1314_vm6, %v836_v48, %v1442_v54  ;;  %v1440_v0 = vmul.f32 0.2, %v828_v55  ;;  %vm1376_vm9 = vcmp.gt.f32.partialorder %v1084_v56, 0.0  ;;  %v1504_v5 = vmul.f32 0.2, %v1084_v56 }
 0x10c   : > { %v2607_v3 = vpack.c.bf16 %v1570_v63, %v1570_v63  ;;  %v1634_v4 = vsel %vm1378_vm7, %v1092_v53, %v1506_v60  ;;  %2272 = vst.msk [vmem:[%s3185_s13 + $0x120] sm:$0xf] %vm2199_vm2, %v2668_v62  ;;  %vm1317_vm10 = vcmp.gt.f32.partialorder %v849_v61, 0.0  ;;  %v1445_v9 = vmul.f32 0.2, %v849_v61  ;;  %v2830_v10 = vpop.f32.mrf.mxu0  ;;  %v2894_v11 = vpop.f32.mrf.mxu1 }
 0x10d   : > { %v2671_v6 = vpack.c.bf16 %v1634_v4, %v1634_v4  ;;  %v1568_v7 = vsel %vm1312_vm8, %v828_v55, %v1440_v0  ;;  %v1632_v13 = vsel %vm1376_vm9, %v1084_v56, %v1504_v5  ;;  %v1105_v14 = vadd.f32 %v2890_v40, %v3174_v8 }
 0x10e   : > { %2211 = vst.msk [vmem:[%s3185_s13 + $0x2c] sm:$0xf] %vm2199_vm2, %v2607_v3  ;;  %v2605_v12 = vpack.c.bf16 %v1568_v7, %v1568_v7  ;;  %v841_v15 = vadd.f32 %v3174_v8, %v840_v49  ;;  %v2669_v16 = vpack.c.bf16 %v1632_v13, %v1632_v13  ;;  %v1573_v17 = vsel %vm1317_vm10, %v849_v61, %v1445_v9  ;;  %v856_v20 = vpop.f32.mrf.mxu0  ;;  %v1112_v21 = vpop.f32.mrf.mxu1 }
 0x10f   : > { %2275 = vst.msk [vmem:[%s3185_s13 + $0x12c] sm:$0xf] %vm2199_vm2, %v2671_v6  ;;  %v1097_v18 = vadd.f32 %v3174_v8, %v1096_v50  ;;  %v852_v19 = vadd.f32 %v2827_v57, %v3174_v8  ;;  %v2610_v22 = vpack.c.bf16 %v1573_v17, %v1573_v17  ;;  %vm1381_vm11 = vcmp.gt.f32.partialorder %v1105_v14, 0.0 }
 0x110   : > { %2209 = vst.msk [vmem:[%s3185_s13 + $0x24] sm:$0xf] %vm2199_vm2, %v2605_v12  ;;  %v1509_v23 = vmul.f32 0.2, %v1105_v14  ;;  %vm1315_vm12 = vcmp.gt.f32.partialorder %v841_v15, 0.0  ;;  %v2831_v26 = vpop.f32.mrf.mxu0  ;;  %v2895_v27 = vpop.f32.mrf.mxu1  ;;  %v1108_v30 = vadd.f32 %v2891_v58, %v3174_v8  ;;  %v844_v31 = vadd.f32 %v3174_v8, %v843_v1 }
 0x111   : > { %2273 = vst.msk [vmem:[%s3185_s13 + $0x124] sm:$0xf] %vm2199_vm2, %v2669_v16  ;;  %v1443_v24 = vmul.f32 0.2, %v841_v15  ;;  %vm1379_vm13 = vcmp.gt.f32.partialorder %v1097_v18, 0.0  ;;  %vm1318_vm14 = vcmp.gt.f32.partialorder %v852_v19, 0.0  ;;  %v1100_v35 = vadd.f32 %v3174_v8, %v1099_v2 }
 0x112   : > { %v1507_v25 = vmul.f32 0.2, %v1097_v18  ;;  %2214 = vst.msk [vmem:[%s3185_s13 + $0x38] sm:$0xf] %vm2199_vm2, %v2610_v22  ;;  %v1637_v28 = vsel %vm1381_vm11, %v1105_v14, %v1509_v23  ;;  %v1446_v29 = vmul.f32 0.2, %v852_v19  ;;  %v3267_v36 = vpop.f32.mrf.mxu0  ;;  %v3269_v37 = vpop.f32.mrf.mxu1  ;;  %v865_v47 = vadd.f32 %v2830_v10, %v3174_v8 }
 0x113   : > { %v2674_v32 = vpack.c.bf16 %v1637_v28, %v1637_v28  ;;  %v1571_v33 = vsel %vm1315_vm12, %v841_v15, %v1443_v24  ;;  %vm1382_vm15 = vcmp.gt.f32.partialorder %v1108_v30, 0.0  ;;  %v1510_v42 = vmul.f32 0.2, %v1108_v30 }
 0x114   : > { %v1635_v34 = vsel %vm1379_vm13, %v1097_v18, %v1507_v25  ;;  %v2608_v38 = vpack.c.bf16 %v1571_v33, %v1571_v33  ;;  %v1574_v40 = vsel %vm1318_vm14, %v852_v19, %v1446_v29  ;;  %vm1316_vm0 = vcmp.gt.f32.partialorder %v844_v31, 0.0  ;;  %v2834_v44 = vpop.f32.mrf.mxu0  ;;  %v2898_v45 = vpop.f32.mrf.mxu1 }
 0x115   : > { %v2672_v39 = vpack.c.bf16 %v1635_v34, %v1635_v34  ;;  %2278 = vst.msk [vmem:[%s3185_s13 + $0x138] sm:$0xf] %vm2199_vm2, %v2674_v32  ;;  %v2611_v41 = vpack.c.bf16 %v1574_v40, %v1574_v40  ;;  %v1444_v43 = vmul.f32 0.2, %v844_v31  ;;  %vm1380_vm1 = vcmp.gt.f32.partialorder %v1100_v35, 0.0 }
 0x116   : > { %2212 = vst.msk [vmem:[%s3185_s13 + $0x30] sm:$0xf] %vm2199_vm2, %v2608_v38  ;;  %v1508_v46 = vmul.f32 0.2, %v1100_v35  ;;  %v1121_v48 = vadd.f32 %v2894_v11, %v3174_v8  ;;  %v1638_v49 = vsel %vm1382_vm15, %v1108_v30, %v1510_v42  ;;  %v857_v51 = vadd.f32 %v3174_v8, %v856_v20  ;;  %v872_v53 = vpop.f32.mrf.mxu0  ;;  %v3284_v54 = vpop.f32.mrf.mxu1 }
 0x117   : > { %2276 = vst.msk [vmem:[%s3185_s13 + $0x130] sm:$0xf] %vm2199_vm2, %v2672_v39  ;;  %2215 = vst.msk [vmem:[%s3185_s13 + $0x3c] sm:$0xf] %vm2199_vm2, %v2611_v41  ;;  %v1572_v50 = vsel %vm1316_vm0, %v844_v31, %v1444_v43  ;;  %v1113_v52 = vadd.f32 %v3174_v8, %v1112_v21  ;;  %v2675_v55 = vpack.c.bf16 %v1638_v49, %v1638_v49  ;;  %vm1321_vm3 = vcmp.gt.f32.partialorder %v865_v47, 0.0 }
 0x118   : > { %v2609_v56 = vpack.c.bf16 %v1572_v50, %v1572_v50  ;;  %v1636_v57 = vsel %vm1380_vm1, %v1100_v35, %v1508_v46  ;;  %v1449_v59 = vmul.f32 0.2, %v865_v47  ;;  %vm1385_vm4 = vcmp.gt.f32.partialorder %v1121_v48, 0.0  ;;  %v3286_v61 = vpop.f32.mrf.mxu0  ;;  %v3288_v62 = vpop.f32.mrf.mxu1 }
 0x119   : > { %v2673_v58 = vpack.c.bf16 %v1636_v57, %v1636_v57  ;;  %v1513_v60 = vmul.f32 0.2, %v1121_v48  ;;  %2279 = vst.msk [vmem:[%s3185_s13 + $0x13c] sm:$0xf] %vm2199_vm2, %v2675_v55  ;;  %vm1319_vm5 = vcmp.gt.f32.partialorder %v857_v51, 0.0  ;;  %vm1383_vm6 = vcmp.gt.f32.partialorder %v1113_v52, 0.0 }
 0x11a   : > { %2213 = vst.msk [vmem:[%s3185_s13 + $0x34] sm:$0xf] %vm2199_vm2, %v2609_v56  ;;  %v1447_v63 = vmul.f32 0.2, %v857_v51  ;;  %v1511_v0 = vmul.f32 0.2, %v1113_v52  ;;  %v1577_v1 = vsel %vm1321_vm3, %v865_v47, %v1449_v59  ;;  %v868_v3 = vadd.f32 %v2831_v26, %v3174_v8  ;;  %v3298_v5 = vpop.f32.mrf.mxu0  ;;  %v3300_v6 = vpop.f32.mrf.mxu1 }
 0x11b   : > { %2277 = vst.msk [vmem:[%s3185_s13 + $0x134] sm:$0xf] %vm2199_vm2, %v2673_v58  ;;  %v1641_v2 = vsel %vm1385_vm4, %v1121_v48, %v1513_v60  ;;  %v1124_v4 = vadd.f32 %v2895_v27, %v3174_v8  ;;  %v2614_v7 = vpack.c.bf16 %v1577_v1, %v1577_v1  ;;  %v860_v18 = vadd.f32 %v3174_v8, %v3267_v36 }
 0x11c   : > { %v2678_v9 = vpack.c.bf16 %v1641_v2, %v1641_v2  ;;  %v1575_v10 = vsel %vm1319_vm5, %v857_v51, %v1447_v63  ;;  %v1639_v11 = vsel %vm1383_vm6, %v1113_v52, %v1511_v0  ;;  %vm1322_vm7 = vcmp.gt.f32.partialorder %v868_v3, 0.0  ;;  %v3302_v15 = vpop.f32.mrf.mxu0  ;;  %v3304_v16 = vpop.f32.mrf.mxu1 }
 0x11d   : > { %v2612_v12 = vpack.c.bf16 %v1575_v10, %v1575_v10  ;;  %v2676_v13 = vpack.c.bf16 %v1639_v11, %v1639_v11  ;;  %v1450_v14 = vmul.f32 0.2, %v868_v3  ;;  %2218 = vst.msk [vmem:[%s3185_s13 + $0x48] sm:$0xf] %vm2199_vm2, %v2614_v7  ;;  %vm1386_vm8 = vcmp.gt.f32.partialorder %v1124_v4, 0.0 }
 0x11e   : > { %2282 = vst.msk [vmem:[%s3185_s13 + $0x148] sm:$0xf] %vm2199_vm2, %v2678_v9  ;;  %v1514_v17 = vmul.f32 0.2, %v1124_v4  ;;  %v1116_v19 = vadd.f32 %v3174_v8, %v3269_v37  ;;  %v881_v21 = vadd.f32 %v2834_v44, %v3174_v8  ;;  %v1137_v22 = vadd.f32 %v2898_v45, %v3174_v8  ;;  %v3321_v24 = vpop.f32.mrf.mxu0  ;;  %v3323_v25 = vpop.f32.mrf.mxu1 }
 0x11f   : > { %2216 = vst.msk [vmem:[%s3185_s13 + $0x40] sm:$0xf] %vm2199_vm2, %v2612_v12  ;;  %2280 = vst.msk [vmem:[%s3185_s13 + $0x140] sm:$0xf] %vm2199_vm2, %v2676_v13  ;;  %v1578_v20 = vsel %vm1322_vm7, %v868_v3, %v1450_v14  ;;  %v873_v23 = vadd.f32 %v3174_v8, %v872_v53  ;;  %vm1320_vm9 = vcmp.gt.f32.partialorder %v860_v18, 0.0  ;;  %v1129_v44 = vadd.f32 %v3174_v8, %v3284_v54 }
 0x120   : > { %v2615_v26 = vpack.c.bf16 %v1578_v20, %v1578_v20  ;;  %v1642_v27 = vsel %vm1386_vm8, %v1124_v4, %v1514_v17  ;;  %v1448_v28 = vmul.f32 0.2, %v860_v18  ;;  %vm1384_vm10 = vcmp.gt.f32.partialorder %v1116_v19, 0.0  ;;  %v3325_v31 = vpop.f32.mrf.mxu0  ;;  %v3327_v32 = vpop.f32.mrf.mxu1 }
 0x121   : > { %v2679_v29 = vpack.c.bf16 %v1642_v27, %v1642_v27  ;;  %v1512_v30 = vmul.f32 0.2, %v1116_v19  ;;  %vm1325_vm11 = vcmp.gt.f32.partialorder %v881_v21, 0.0  ;;  %v1453_v34 = vmul.f32 0.2, %v881_v21 }
 0x122   : > { %2219 = vst.msk [vmem:[%s3185_s13 + $0x4c] sm:$0xf] %vm2199_vm2, %v2615_v26  ;;  %v1576_v33 = vsel %vm1320_vm9, %v860_v18, %v1448_v28  ;;  %vm1389_vm12 = vcmp.gt.f32.partialorder %v1137_v22, 0.0  ;;  %v1517_v35 = vmul.f32 0.2, %v1137_v22  ;;  %vm1323_vm13 = vcmp.gt.f32.partialorder %v873_v23, 0.0  ;;  %v3333_v39 = vpop.f32.mrf.mxu0  ;;  %v3335_v40 = vpop.f32.mrf.mxu1 }
 0x123   : > { %2283 = vst.msk [vmem:[%s3185_s13 + $0x14c] sm:$0xf] %vm2199_vm2, %v2679_v29  ;;  %v2613_v36 = vpack.c.bf16 %v1576_v33, %v1576_v33  ;;  %v1640_v37 = vsel %vm1384_vm10, %v1116_v19, %v1512_v30  ;;  %v1451_v38 = vmul.f32 0.2, %v873_v23  ;;  %v1581_v42 = vsel %vm1325_vm11, %v881_v21, %v1453_v34 }
 0x124   : > { %v2677_v41 = vpack.c.bf16 %v1640_v37, %v1640_v37  ;;  %v1645_v43 = vsel %vm1389_vm12, %v1137_v22, %v1517_v35  ;;  %v2618_v45 = vpack.c.bf16 %v1581_v42, %v1581_v42  ;;  %v884_v48 = vadd.f32 %v3286_v61, %v3174_v8  ;;  %v3344_v49 = vpop.f32.mrf.mxu0  ;;  %v3346_v50 = vpop.f32.mrf.mxu1 }
 0x125   : > { %2217 = vst.msk [vmem:[%s3185_s13 + $0x44] sm:$0xf] %vm2199_vm2, %v2613_v36  ;;  %v2682_v46 = vpack.c.bf16 %v1645_v43, %v1645_v43  ;;  %v1579_v47 = vsel %vm1323_vm13, %v873_v23, %v1451_v38  ;;  %vm1387_vm14 = vcmp.gt.f32.partialorder %v1129_v44, 0.0  ;;  %v1515_v52 = vmul.f32 0.2, %v1129_v44 }
 0x126   : > { %2281 = vst.msk [vmem:[%s3185_s13 + $0x144] sm:$0xf] %vm2199_vm2, %v2677_v41  ;;  %v2616_v51 = vpack.c.bf16 %v1579_v47, %v1579_v47  ;;  %v1140_v53 = vadd.f32 %v3288_v62, %v3174_v8  ;;  %2222 = vst.msk [vmem:[%s3185_s13 + $0x58] sm:$0xf] %vm2199_vm2, %v2618_v45  ;;  %vm1326_vm15 = vcmp.gt.f32.partialorder %v884_v48, 0.0  ;;  %v876_v55 = vadd.f32 %v3174_v8, %v3298_v5  ;;  %v3360_v57 = vpop.f32.mrf.mxu0  ;;  %v3362_v58 = vpop.f32.mrf.mxu1 }
 0x127   : > { %2286 = vst.msk [vmem:[%s3185_s13 + $0x158] sm:$0xf] %vm2199_vm2, %v2682_v46  ;;  %v1454_v54 = vmul.f32 0.2, %v884_v48  ;;  %v1132_v56 = vadd.f32 %v3174_v8, %v3300_v6  ;;  %v1643_v59 = vsel %vm1387_vm14, %v1129_v44, %v1515_v52  ;;  %v897_v61 = vadd.f32 %v3302_v15, %v3174_v8 }
 0x128   : > { %2220 = vst.msk [vmem:[%s3185_s13 + $0x50] sm:$0xf] %vm2199_vm2, %v2616_v51  ;;  %vm1390_vm0 = vcmp.gt.f32.partialorder %v1140_v53, 0.0  ;;  %v1518_v60 = vmul.f32 0.2, %v1140_v53  ;;  %v2680_v62 = vpack.c.bf16 %v1643_v59, %v1643_v59  ;;  %vm1324_vm1 = vcmp.gt.f32.partialorder %v876_v55, 0.0  ;;  %v3368_v1 = vpop.f32.mrf.mxu0  ;;  %v3370_v2 = vpop.f32.mrf.mxu1 }
 0x129   : > { %v1582_v63 = vsel %vm1326_vm15, %v884_v48, %v1454_v54  ;;  %v1452_v0 = vmul.f32 0.2, %v876_v55  ;;  %vm1388_vm3 = vcmp.gt.f32.partialorder %v1132_v56, 0.0  ;;  %v1516_v5 = vmul.f32 0.2, %v1132_v56 }
 0x12a   : > { %v2619_v3 = vpack.c.bf16 %v1582_v63, %v1582_v63  ;;  %v1646_v4 = vsel %vm1390_vm0, %v1140_v53, %v1518_v60  ;;  %2284 = vst.msk [vmem:[%s3185_s13 + $0x150] sm:$0xf] %vm2199_vm2, %v2680_v62  ;;  %vm1329_vm4 = vcmp.gt.f32.partialorder %v897_v61, 0.0  ;;  %v1457_v9 = vmul.f32 0.2, %v897_v61  ;;  %v3374_v10 = vpop.f32.mrf.mxu0  ;;  %v3376_v11 = vpop.f32.mrf.mxu1 }
 0x12b   : > { %v2683_v6 = vpack.c.bf16 %v1646_v4, %v1646_v4  ;;  %v1580_v7 = vsel %vm1324_vm1, %v876_v55, %v1452_v0  ;;  %v1644_v13 = vsel %vm1388_vm3, %v1132_v56, %v1516_v5  ;;  %v1153_v14 = vadd.f32 %v3304_v16, %v3174_v8 }
 0x12c   : > { %2223 = vst.msk [vmem:[%s3185_s13 + $0x5c] sm:$0xf] %vm2199_vm2, %v2619_v3  ;;  %v2617_v12 = vpack.c.bf16 %v1580_v7, %v1580_v7  ;;  %v889_v15 = vadd.f32 %v3174_v8, %v3321_v24  ;;  %v2681_v17 = vpack.c.bf16 %v1644_v13, %v1644_v13  ;;  %v1585_v18 = vsel %vm1329_vm4, %v897_v61, %v1457_v9  ;;  %v3390_v21 = vpop.f32.mrf.mxu0  ;;  %v3392_v22 = vpop.f32.mrf.mxu1 }
 0x12d   : > { %2287 = vst.msk [vmem:[%s3185_s13 + $0x15c] sm:$0xf] %vm2199_vm2, %v2683_v6  ;;  %v1145_v19 = vadd.f32 %v3174_v8, %v3323_v25  ;;  %v900_v20 = vadd.f32 %v3325_v31, %v3174_v8  ;;  %v2622_v16 = vpack.c.bf16 %v1585_v18, %v1585_v18  ;;  %vm1393_vm5 = vcmp.gt.f32.partialorder %v1153_v14, 0.0 }
 0x12e   : > { %2221 = vst.msk [vmem:[%s3185_s13 + $0x54] sm:$0xf] %vm2199_vm2, %v2617_v12  ;;  %v1521_v23 = vmul.f32 0.2, %v1153_v14  ;;  %vm1327_vm6 = vcmp.gt.f32.partialorder %v889_v15, 0.0  ;;  %v3398_v25 = vpop.f32.mrf.mxu0  ;;  %v3400_v27 = vpop.f32.mrf.mxu1  ;;  %v1156_v30 = vadd.f32 %v3327_v32, %v3174_v8  ;;  %v892_v31 = vadd.f32 %v3174_v8, %v3333_v39 }
 0x12f   : > { %2285 = vst.msk [vmem:[%s3185_s13 + $0x154] sm:$0xf] %vm2199_vm2, %v2681_v17  ;;  %v1455_v24 = vmul.f32 0.2, %v889_v15  ;;  %vm1391_vm7 = vcmp.gt.f32.partialorder %v1145_v19, 0.0  ;;  %vm1330_vm8 = vcmp.gt.f32.partialorder %v900_v20, 0.0  ;;  %v1148_v36 = vadd.f32 %v3174_v8, %v3335_v40 }
 0x130   : > { %v1519_v26 = vmul.f32 0.2, %v1145_v19  ;;  %2226 = vst.msk [vmem:[%s3185_s13 + $0x68] sm:$0xf] %vm2199_vm2, %v2622_v16  ;;  %v1649_v28 = vsel %vm1393_vm5, %v1153_v14, %v1521_v23  ;;  %v1458_v29 = vmul.f32 0.2, %v900_v20  ;;  %v3410_v37 = vpop.f32.mrf.mxu0  ;;  %v3412_v38 = vpop.f32.mrf.mxu1  ;;  %v913_v47 = vadd.f32 %v3344_v49, %v3174_v8 }
 0x131   : > { %v2686_v33 = vpack.c.bf16 %v1649_v28, %v1649_v28  ;;  %v1583_v34 = vsel %vm1327_vm6, %v889_v15, %v1455_v24  ;;  %vm1394_vm9 = vcmp.gt.f32.partialorder %v1156_v30, 0.0  ;;  %v1522_v43 = vmul.f32 0.2, %v1156_v30 }
 0x132   : > { %v1647_v35 = vsel %vm1391_vm7, %v1145_v19, %v1519_v26  ;;  %v2620_v41 = vpack.c.bf16 %v1583_v34, %v1583_v34  ;;  %v1586_v32 = vsel %vm1330_vm8, %v900_v20, %v1458_v29  ;;  %vm1328_vm10 = vcmp.gt.f32.partialorder %v892_v31, 0.0  ;;  %v3417_v45 = vpop.f32.mrf.mxu0  ;;  %v3419_v46 = vpop.f32.mrf.mxu1 }
 0x133   : > { %v2684_v42 = vpack.c.bf16 %v1647_v35, %v1647_v35  ;;  %2290 = vst.msk [vmem:[%s3185_s13 + $0x168] sm:$0xf] %vm2199_vm2, %v2686_v33  ;;  %v2623_v39 = vpack.c.bf16 %v1586_v32, %v1586_v32  ;;  %v1456_v44 = vmul.f32 0.2, %v892_v31  ;;  %vm1392_vm11 = vcmp.gt.f32.partialorder %v1148_v36, 0.0 }
 0x134   : > { %2224 = vst.msk [vmem:[%s3185_s13 + $0x60] sm:$0xf] %vm2199_vm2, %v2620_v41  ;;  %v1520_v40 = vmul.f32 0.2, %v1148_v36  ;;  %v1169_v48 = vadd.f32 %v3346_v50, %v3174_v8  ;;  %v1650_v51 = vsel %vm1394_vm9, %v1156_v30, %v1522_v43  ;;  %v905_v53 = vadd.f32 %v3174_v8, %v3360_v57  ;;  %v3435_v55 = vpop.f32.mrf.mxu0  ;;  %v3437_v56 = vpop.f32.mrf.mxu1 }
 0x135   : > { %2288 = vst.msk [vmem:[%s3185_s13 + $0x160] sm:$0xf] %vm2199_vm2, %v2684_v42  ;;  %2227 = vst.msk [vmem:[%s3185_s13 + $0x6c] sm:$0xf] %vm2199_vm2, %v2623_v39  ;;  %v1584_v52 = vsel %vm1328_vm10, %v892_v31, %v1456_v44  ;;  %v1161_v54 = vadd.f32 %v3174_v8, %v3362_v58  ;;  %v2687_v49 = vpack.c.bf16 %v1650_v51, %v1650_v51  ;;  %vm1333_vm12 = vcmp.gt.f32.partialorder %v913_v47, 0.0 }
 0x136   : > { %v2621_v59 = vpack.c.bf16 %v1584_v52, %v1584_v52  ;;  %v1648_v50 = vsel %vm1392_vm11, %v1148_v36, %v1520_v40  ;;  %v1461_v61 = vmul.f32 0.2, %v913_v47  ;;  %vm1397_vm13 = vcmp.gt.f32.partialorder %v1169_v48, 0.0  ;;  %v3439_v63 = vpop.f32.mrf.mxu0  ;;  %v3441_v0 = vpop.f32.mrf.mxu1 }
 0x137   : > { %v2685_v60 = vpack.c.bf16 %v1648_v50, %v1648_v50  ;;  %v1525_v62 = vmul.f32 0.2, %v1169_v48  ;;  %2291 = vst.msk [vmem:[%s3185_s13 + $0x16c] sm:$0xf] %vm2199_vm2, %v2687_v49  ;;  %vm1331_vm14 = vcmp.gt.f32.partialorder %v905_v53, 0.0  ;;  %vm1395_vm15 = vcmp.gt.f32.partialorder %v1161_v54, 0.0 }
 0x138   : > { %2225 = vst.msk [vmem:[%s3185_s13 + $0x64] sm:$0xf] %vm2199_vm2, %v2621_v59  ;;  %v1459_v57 = vmul.f32 0.2, %v905_v53  ;;  %v1523_v58 = vmul.f32 0.2, %v1161_v54  ;;  %v1589_v3 = vsel %vm1333_vm12, %v913_v47, %v1461_v61  ;;  %v916_v5 = vadd.f32 %v3368_v1, %v3174_v8  ;;  %v3453_v7 = vpop.f32.mrf.mxu0  ;;  %v3455_v9 = vpop.f32.mrf.mxu1 }
 0x139   : > { %2289 = vst.msk [vmem:[%s3185_s13 + $0x164] sm:$0xf] %vm2199_vm2, %v2685_v60  ;;  %v1653_v4 = vsel %vm1397_vm13, %v1169_v48, %v1525_v62  ;;  %v1172_v6 = vadd.f32 %v3370_v2, %v3174_v8  ;;  %v2626_v12 = vpack.c.bf16 %v1589_v3, %v1589_v3  ;;  %v908_v16 = vadd.f32 %v3174_v8, %v3374_v10 }
 0x13a   : > { %v2690_v13 = vpack.c.bf16 %v1653_v4, %v1653_v4  ;;  %v1587_v14 = vsel %vm1331_vm14, %v905_v53, %v1459_v57  ;;  %v1651_v15 = vsel %vm1395_vm15, %v1161_v54, %v1523_v58  ;;  %vm1334_vm0 = vcmp.gt.f32.partialorder %v916_v5, 0.0  ;;  %v3457_v20 = vpop.f32.mrf.mxu0  ;;  %v3459_v1 = vpop.f32.mrf.mxu1 }
 0x13b   : > { %v2624_v17 = vpack.c.bf16 %v1587_v14, %v1587_v14  ;;  %v2688_v18 = vpack.c.bf16 %v1651_v15, %v1651_v15  ;;  %v1462_v19 = vmul.f32 0.2, %v916_v5  ;;  %2230 = vst.msk [vmem:[%s3185_s13 + $0x78] sm:$0xf] %vm2199_vm2, %v2626_v12  ;;  %vm1398_vm1 = vcmp.gt.f32.partialorder %v1172_v6, 0.0 }
 0x13c   : > { %2294 = vst.msk [vmem:[%s3185_s13 + $0x178] sm:$0xf] %vm2199_vm2, %v2690_v13  ;;  %v1526_v2 = vmul.f32 0.2, %v1172_v6  ;;  %v1164_v23 = vadd.f32 %v3174_v8, %v3376_v11  ;;  %v929_v26 = vadd.f32 %v3390_v21, %v3174_v8  ;;  %v1185_v28 = vadd.f32 %v3392_v22, %v3174_v8  ;;  %v3479_v30 = vpop.f32.mrf.mxu0  ;;  %v3481_v10 = vpop.f32.mrf.mxu1 }
 0x13d   : > { %2228 = vst.msk [vmem:[%s3185_s13 + $0x70] sm:$0xf] %vm2199_vm2, %v2624_v17  ;;  %2292 = vst.msk [vmem:[%s3185_s13 + $0x170] sm:$0xf] %vm2199_vm2, %v2688_v18  ;;  %v1590_v24 = vsel %vm1334_vm0, %v916_v5, %v1462_v19  ;;  %v921_v29 = vadd.f32 %v3174_v8, %v3398_v25  ;;  %vm1332_vm3 = vcmp.gt.f32.partialorder %v908_v16, 0.0  ;;  %v1177_v51 = vadd.f32 %v3174_v8, %v3400_v27 }
 0x13e   : > { %v2627_v11 = vpack.c.bf16 %v1590_v24, %v1590_v24  ;;  %v1654_v31 = vsel %vm1398_vm1, %v1172_v6, %v1526_v2  ;;  %v1460_v33 = vmul.f32 0.2, %v908_v16  ;;  %vm1396_vm4 = vcmp.gt.f32.partialorder %v1164_v23, 0.0  ;;  %v3483_v21 = vpop.f32.mrf.mxu0  ;;  %v3485_v36 = vpop.f32.mrf.mxu1  ;;  %v3541_v24 = vld [vmem:[%s3808_s2] ss:$0 sm:$0xff] }
 0x13f   : > { %v2691_v34 = vpack.c.bf16 %v1654_v31, %v1654_v31  ;;  %v1524_v35 = vmul.f32 0.2, %v1164_v23  ;;  %vm1337_vm5 = vcmp.gt.f32.partialorder %v929_v26, 0.0  ;;  %v1465_v25 = vmul.f32 0.2, %v929_v26 }
 0x140   : > { %2231 = vst.msk [vmem:[%s3185_s13 + $0x7c] sm:$0xf] %vm2199_vm2, %v2627_v11  ;;  %v1588_v22 = vsel %vm1332_vm3, %v908_v16, %v1460_v33  ;;  %vm1401_vm6 = vcmp.gt.f32.partialorder %v1185_v28, 0.0  ;;  %v1529_v41 = vmul.f32 0.2, %v1185_v28  ;;  %vm1335_vm7 = vcmp.gt.f32.partialorder %v921_v29, 0.0  ;;  %v3491_v43 = vpop.f32.mrf.mxu0  ;;  %v3493_v44 = vpop.f32.mrf.mxu1 }
 0x141   : > { %2295 = vst.msk [vmem:[%s3185_s13 + $0x17c] sm:$0xf] %vm2199_vm2, %v2691_v34  ;;  %v2625_v42 = vpack.c.bf16 %v1588_v22, %v1588_v22  ;;  %v1652_v32 = vsel %vm1396_vm4, %v1164_v23, %v1524_v35  ;;  %v1463_v39 = vmul.f32 0.2, %v921_v29  ;;  %v1593_v47 = vsel %vm1337_vm5, %v929_v26, %v1465_v25 }
 0x142   : > { %v2689_v40 = vpack.c.bf16 %v1652_v32, %v1652_v32  ;;  %v1657_v48 = vsel %vm1401_vm6, %v1185_v28, %v1529_v41  ;;  %v2630_v52 = vpack.c.bf16 %v1593_v47, %v1593_v47  ;;  %v932_v49 = vadd.f32 %v3410_v37, %v3174_v8  ;;  %v3502_v59 = vpop.f32.mrf.mxu0  ;;  %v3504_v50 = vpop.f32.mrf.mxu1 }
 0x143   : > { %2229 = vst.msk [vmem:[%s3185_s13 + $0x74] sm:$0xf] %vm2199_vm2, %v2625_v42  ;;  %v2694_v53 = vpack.c.bf16 %v1657_v48, %v1657_v48  ;;  %v1591_v54 = vsel %vm1335_vm7, %v921_v29, %v1463_v39  ;;  %vm1399_vm8 = vcmp.gt.f32.partialorder %v1177_v51, 0.0  ;;  %v1527_v61 = vmul.f32 0.2, %v1177_v51 }
 0x144   : > { %2293 = vst.msk [vmem:[%s3185_s13 + $0x174] sm:$0xf] %vm2199_vm2, %v2689_v40  ;;  %v2628_v60 = vpack.c.bf16 %v1591_v54, %v1591_v54  ;;  %v1188_v27 = vadd.f32 %v3412_v38, %v3174_v8  ;;  %2234 = vst.msk [vmem:[%s3185_s13 + $0x88] sm:$0xf] %vm2199_vm2, %v2630_v52  ;;  %vm1338_vm9 = vcmp.gt.f32.partialorder %v932_v49, 0.0  ;;  %v924_v37 = vadd.f32 %v3174_v8, %v3417_v45  ;;  %v3518_v58 = vpop.f32.mrf.mxu0  ;;  %v3520_v3 = vpop.f32.mrf.mxu1 }
 0x145   : > { %2298 = vst.msk [vmem:[%s3185_s13 + $0x188] sm:$0xf] %vm2199_vm2, %v2694_v53  ;;  %v1466_v62 = vmul.f32 0.2, %v932_v49  ;;  %v1180_v57 = vadd.f32 %v3174_v8, %v3419_v46  ;;  %v1655_v38 = vsel %vm1399_vm8, %v1177_v51, %v1527_v61  ;;  %v945_v5 = vadd.f32 %v3435_v55, %v3174_v8 }
 0x146   : > { %2232 = vst.msk [vmem:[%s3185_s13 + $0x80] sm:$0xf] %vm2199_vm2, %v2628_v60  ;;  %vm1402_vm10 = vcmp.gt.f32.partialorder %v1188_v27, 0.0  ;;  %v1530_v4 = vmul.f32 0.2, %v1188_v27  ;;  %v2692_v6 = vpack.c.bf16 %v1655_v38, %v1655_v38  ;;  %vm1336_vm11 = vcmp.gt.f32.partialorder %v924_v37, 0.0  ;;  %v3526_v13 = vpop.f32.mrf.mxu0  ;;  %v3528_v46 = vpop.f32.mrf.mxu1 }
 0x147   : > { %v1594_v12 = vsel %vm1338_vm9, %v932_v49, %v1466_v62  ;;  %v1464_v45 = vmul.f32 0.2, %v924_v37  ;;  %vm1400_vm12 = vcmp.gt.f32.partialorder %v1180_v57, 0.0  ;;  %v1528_v17 = vmul.f32 0.2, %v1180_v57 }
 0x148   : > { %v2631_v14 = vpack.c.bf16 %v1594_v12, %v1594_v12  ;;  %v1658_v15 = vsel %vm1402_vm10, %v1188_v27, %v1530_v4  ;;  %2296 = vst.msk [vmem:[%s3185_s13 + $0x180] sm:$0xf] %vm2199_vm2, %v2692_v6  ;;  %vm1341_vm13 = vcmp.gt.f32.partialorder %v945_v5, 0.0  ;;  %v1469_v8 = vmul.f32 0.2, %v945_v5  ;;  %v3532_v55 = vpop.f32.mrf.mxu0  ;;  %v3534_v2 = vpop.f32.mrf.mxu1 }
 0x149   : > { %v2695_v18 = vpack.c.bf16 %v1658_v15, %v1658_v15  ;;  %v1592_v19 = vsel %vm1336_vm11, %v924_v37, %v1464_v45  ;;  %v1656_v23 = vsel %vm1400_vm12, %v1180_v57, %v1528_v17  ;;  %v1201_v26 = vadd.f32 %v3541_v24, %v3437_v56 }
 0x14a   : > { %2235 = vst.msk [vmem:[%s3185_s13 + $0x8c] sm:$0xf] %vm2199_vm2, %v2631_v14  ;;  %v2629_v16 = vpack.c.bf16 %v1592_v19, %v1592_v19  ;;  %v937_v28 = vadd.f32 %v3541_v24, %v3439_v63  ;;  %v2693_v29 = vpack.c.bf16 %v1656_v23, %v1656_v23  ;;  %v1597_v11 = vsel %vm1341_vm13, %v945_v5, %v1469_v8  ;;  %v3553_v34 = vpop.f32.mrf.mxu0  ;;  %v3555_v35 = vpop.f32.mrf.mxu1 }
 0x14b   : > { %2299 = vst.msk [vmem:[%s3185_s13 + $0x18c] sm:$0xf] %vm2199_vm2, %v2695_v18  ;;  %v1193_v31 = vadd.f32 %v3541_v24, %v3441_v0  ;;  %v948_v33 = vadd.f32 %v3541_v24, %v3453_v7  ;;  %v2634_v56 = vpack.c.bf16 %v1597_v11, %v1597_v11  ;;  %vm1405_vm14 = vcmp.gt.f32.partialorder %v1201_v26, 0.0 }
 0x14c   : > { %2233 = vst.msk [vmem:[%s3185_s13 + $0x84] sm:$0xf] %vm2199_vm2, %v2629_v16  ;;  %v1533_v63 = vmul.f32 0.2, %v1201_v26  ;;  %vm1339_vm15 = vcmp.gt.f32.partialorder %v937_v28, 0.0  ;;  %v3561_v0 = vpop.f32.mrf.mxu0  ;;  %v3563_v41 = vpop.f32.mrf.mxu1  ;;  %v1204_v32 = vadd.f32 %v3541_v24, %v3455_v9  ;;  %v940_v39 = vadd.f32 %v3541_v24, %v3457_v20 }
 0x14d   : > { %2297 = vst.msk [vmem:[%s3185_s13 + $0x184] sm:$0xf] %vm2199_vm2, %v2693_v29  ;;  %v1467_v22 = vmul.f32 0.2, %v937_v28  ;;  %vm1403_vm0 = vcmp.gt.f32.partialorder %v1193_v31, 0.0  ;;  %vm1342_vm1 = vcmp.gt.f32.partialorder %v948_v33, 0.0  ;;  %v1196_v51 = vadd.f32 %v3541_v24, %v3459_v1 }
 0x14e   : > { %v1531_v25 = vmul.f32 0.2, %v1193_v31  ;;  %2238 = vst.msk [vmem:[%s3185_s13 + $0x98] sm:$0xf] %vm2199_vm2, %v2634_v56  ;;  %v1661_v7 = vsel %vm1405_vm14, %v1201_v26, %v1533_v63  ;;  %v1470_v42 = vmul.f32 0.2, %v948_v33  ;;  %v3573_v52 = vpop.f32.mrf.mxu0  ;;  %v3575_v60 = vpop.f32.mrf.mxu1  ;;  %v961_v27 = vadd.f32 %v3541_v24, %v3479_v30 }
 0x14f   : > { %v2698_v40 = vpack.c.bf16 %v1661_v7, %v1661_v7  ;;  %v1595_v47 = vsel %vm1339_vm15, %v937_v28, %v1467_v22  ;;  %vm1406_vm3 = vcmp.gt.f32.partialorder %v1204_v32, 0.0  ;;  %v1534_v20 = vmul.f32 0.2, %v1204_v32 }
 0x150   : > { %v1659_v48 = vsel %vm1403_vm0, %v1193_v31, %v1531_v25  ;;  %v2632_v53 = vpack.c.bf16 %v1595_v47, %v1595_v47  ;;  %v1598_v49 = vsel %vm1342_vm1, %v948_v33, %v1470_v42  ;;  %vm1340_vm4 = vcmp.gt.f32.partialorder %v940_v39, 0.0  ;;  %v3593_v5 = vpop.f32.mrf.mxu0 }
 0x151   : > { %v2696_v54 = vpack.c.bf16 %v1659_v48, %v1659_v48  ;;  %2302 = vst.msk [vmem:[%s3185_s13 + $0x198] sm:$0xf] %vm2199_vm2, %v2698_v40  ;;  %v2635_v9 = vpack.c.bf16 %v1598_v49, %v1598_v49  ;;  %v1468_v61 = vmul.f32 0.2, %v940_v39  ;;  %vm1404_vm5 = vcmp.gt.f32.partialorder %v1196_v51, 0.0 }
 0x152   : > { %2236 = vst.msk [vmem:[%s3185_s13 + $0x90] sm:$0xf] %vm2199_vm2, %v2632_v53  ;;  %v1532_v1 = vmul.f32 0.2, %v1196_v51  ;;  %v1217_v62 = vadd.f32 %v3541_v24, %v3481_v10  ;;  %v1662_v37 = vsel %vm1406_vm3, %v1204_v32, %v1534_v20  ;;  %v953_v38 = vadd.f32 %v3541_v24, %v3483_v21  ;;  %v3595_v10 = vpop.f32.mrf.mxu1  ;;  %v3607_v16 = vpop.f32.mrf.mxu0 }
 0x153   : > { %2300 = vst.msk [vmem:[%s3185_s13 + $0x190] sm:$0xf] %vm2199_vm2, %v2696_v54  ;;  %2239 = vst.msk [vmem:[%s3185_s13 + $0x9c] sm:$0xf] %vm2199_vm2, %v2635_v9  ;;  %v1596_v57 = vsel %vm1340_vm4, %v940_v39, %v1468_v61  ;;  %v1209_v4 = vadd.f32 %v3541_v24, %v3485_v36  ;;  %v2699_v6 = vpack.c.bf16 %v1662_v37, %v1662_v37  ;;  %vm1345_vm6 = vcmp.gt.f32.partialorder %v961_v27, 0.0 }
 0x154   : > { %v2633_v30 = vpack.c.bf16 %v1596_v57, %v1596_v57  ;;  %v1660_v12 = vsel %vm1404_vm5, %v1196_v51, %v1532_v1  ;;  %v1473_v14 = vmul.f32 0.2, %v961_v27  ;;  %vm1409_vm7 = vcmp.gt.f32.partialorder %v1217_v62, 0.0  ;;  %v3609_v11 = vpop.f32.mrf.mxu1 }
 0x155   : > { %v2697_v45 = vpack.c.bf16 %v1660_v12, %v1660_v12  ;;  %v1537_v15 = vmul.f32 0.2, %v1217_v62  ;;  %2303 = vst.msk [vmem:[%s3185_s13 + $0x19c] sm:$0xf] %vm2199_vm2, %v2699_v6  ;;  %vm1343_vm8 = vcmp.gt.f32.partialorder %v953_v38, 0.0  ;;  %vm1407_vm9 = vcmp.gt.f32.partialorder %v1209_v4, 0.0 }
 0x156   : > { %2237 = vst.msk [vmem:[%s3185_s13 + $0x94] sm:$0xf] %vm2199_vm2, %v2633_v30  ;;  %v1471_v21 = vmul.f32 0.2, %v953_v38  ;;  %v1535_v36 = vmul.f32 0.2, %v1209_v4  ;;  %v1601_v17 = vsel %vm1345_vm6, %v961_v27, %v1473_v14  ;;  %v964_v19 = vadd.f32 %v3541_v24, %v3491_v43  ;;  %v3631_v40 = vpop.f32.mrf.mxu1 }
 0x157   : > { %2301 = vst.msk [vmem:[%s3185_s13 + $0x194] sm:$0xf] %vm2199_vm2, %v2697_v45  ;;  %v1665_v18 = vsel %vm1409_vm7, %v1217_v62, %v1537_v15  ;;  %v1220_v8 = vadd.f32 %v3541_v24, %v3493_v44  ;;  %v2638_v23 = vpack.c.bf16 %v1601_v17, %v1601_v17  ;;  %v956_v44 = vadd.f32 %v3541_v24, %v3502_v59  ;;  %v3629_v59 = vpop.f32.mrf.mxu0 }
 0x158   : > { %v2702_v26 = vpack.c.bf16 %v1665_v18, %v1665_v18  ;;  %v1599_v28 = vsel %vm1343_vm8, %v953_v38, %v1471_v21  ;;  %v1663_v29 = vsel %vm1407_vm9, %v1209_v4, %v1535_v36  ;;  %vm1346_vm10 = vcmp.gt.f32.partialorder %v964_v19, 0.0  ;;  %v3641_v27 = vpop.f32.mrf.mxu1 }
 0x159   : > { %v2636_v31 = vpack.c.bf16 %v1599_v28, %v1599_v28  ;;  %v2700_v33 = vpack.c.bf16 %v1663_v29, %v1663_v29  ;;  %v1474_v56 = vmul.f32 0.2, %v964_v19  ;;  %2242 = vst.msk [vmem:[%s3185_s13 + $0xa8] sm:$0xf] %vm2199_vm2, %v2638_v23  ;;  %vm1410_vm11 = vcmp.gt.f32.partialorder %v1220_v8, 0.0  ;;  %v3637_v49 = vpop.f32.mrf.mxu0 }
 0x15a   : > { %2306 = vst.msk [vmem:[%s3185_s13 + $0x1a8] sm:$0xf] %vm2199_vm2, %v2702_v26  ;;  %v1538_v43 = vmul.f32 0.2, %v1220_v8  ;;  %v1212_v63 = vadd.f32 %v3541_v24, %v3504_v50  ;;  %v977_v25 = vadd.f32 %v3541_v24, %v3518_v58  ;;  %v1233_v7 = vadd.f32 %v3541_v24, %v3520_v3  ;;  %v3665_v21 = vpop.f32.mrf.mxu1 }
 0x15b   : > { %2240 = vst.msk [vmem:[%s3185_s13 + $0xa0] sm:$0xf] %vm2199_vm2, %v2636_v31  ;;  %2304 = vst.msk [vmem:[%s3185_s13 + $0x1a0] sm:$0xf] %vm2199_vm2, %v2700_v33  ;;  %v1602_v22 = vsel %vm1346_vm10, %v964_v19, %v1474_v56  ;;  %v969_v42 = vadd.f32 %v3541_v24, %v3526_v13  ;;  %vm1344_vm12 = vcmp.gt.f32.partialorder %v956_v44, 0.0  ;;  %v1225_v1 = vadd.f32 %v3541_v24, %v3528_v46  ;;  %v3659_v45 = vpop.f32.mrf.mxu0 }
 0x15c   : > { %v2639_v32 = vpack.c.bf16 %v1602_v22, %v1602_v22  ;;  %v1666_v50 = vsel %vm1410_vm11, %v1220_v8, %v1538_v43  ;;  %v1472_v39 = vmul.f32 0.2, %v956_v44  ;;  %vm1408_vm13 = vcmp.gt.f32.partialorder %v1212_v63, 0.0  ;;  %v3677_v56 = vpop.f32.mrf.mxu1 }
 0x15d   : > { %v2703_v47 = vpack.c.bf16 %v1666_v50, %v1666_v50  ;;  %v1536_v48 = vmul.f32 0.2, %v1212_v63  ;;  %vm1349_vm14 = vcmp.gt.f32.partialorder %v977_v25, 0.0  ;;  %v1477_v3 = vmul.f32 0.2, %v977_v25 }
 0x15e   : > { %2243 = vst.msk [vmem:[%s3185_s13 + $0xac] sm:$0xf] %vm2199_vm2, %v2639_v32  ;;  %v1600_v58 = vsel %vm1344_vm12, %v956_v44, %v1472_v39  ;;  %vm1413_vm15 = vcmp.gt.f32.partialorder %v1233_v7, 0.0  ;;  %v1541_v13 = vmul.f32 0.2, %v1233_v7  ;;  %vm1347_vm0 = vcmp.gt.f32.partialorder %v969_v42, 0.0  ;;  %v3697_v39 = vpop.f32.mrf.mxu1 }
 0x15f   : > { %2307 = vst.msk [vmem:[%s3185_s13 + $0x1ac] sm:$0xf] %vm2199_vm2, %v2703_v47  ;;  %v2637_v51 = vpack.c.bf16 %v1600_v58, %v1600_v58  ;;  %v1664_v53 = vsel %vm1408_vm13, %v1212_v63, %v1536_v48  ;;  %v1475_v54 = vmul.f32 0.2, %v969_v42  ;;  %v1605_v20 = vsel %vm1349_vm14, %v977_v25, %v1477_v3 }
 0x160   : > { %v2701_v9 = vpack.c.bf16 %v1664_v53, %v1664_v53  ;;  %v1669_v61 = vsel %vm1413_vm15, %v1233_v7, %v1541_v13  ;;  %v2642_v62 = vpack.c.bf16 %v1605_v20, %v1605_v20  ;;  %v980_v38 = vadd.f32 %v3541_v24, %v3532_v55 }
 0x161   : > { %2241 = vst.msk [vmem:[%s3185_s13 + $0xa4] sm:$0xf] %vm2199_vm2, %v2637_v51  ;;  %v2706_v37 = vpack.c.bf16 %v1669_v61, %v1669_v61  ;;  %v1603_v57 = vsel %vm1347_vm0, %v969_v42, %v1475_v54  ;;  %vm1411_vm1 = vcmp.gt.f32.partialorder %v1225_v1, 0.0  ;;  %v1539_v6 = vmul.f32 0.2, %v1225_v1 }
 0x162   : > { %2305 = vst.msk [vmem:[%s3185_s13 + $0x1a4] sm:$0xf] %vm2199_vm2, %v2701_v9  ;;  %v2640_v4 = vpack.c.bf16 %v1603_v57, %v1603_v57  ;;  %v1236_v30 = vadd.f32 %v3541_v24, %v3534_v2  ;;  %2246 = vst.msk [vmem:[%s3185_s13 + $0xb8] sm:$0xf] %vm2199_vm2, %v2642_v62  ;;  %vm1350_vm3 = vcmp.gt.f32.partialorder %v980_v38, 0.0  ;;  %v972_v12 = vadd.f32 %v3541_v24, %v3553_v34 }
 0x163   : > { %2310 = vst.msk [vmem:[%s3185_s13 + $0x1b8] sm:$0xf] %vm2199_vm2, %v2706_v37  ;;  %v1478_v46 = vmul.f32 0.2, %v980_v38  ;;  %v1228_v55 = vadd.f32 %v3541_v24, %v3555_v35  ;;  %v1667_v14 = vsel %vm1411_vm1, %v1225_v1, %v1539_v6  ;;  %v993_v15 = vadd.f32 %v3541_v24, %v3561_v0  ;;  %v3669_v0 = vpop.f32.mrf.mxu0  ;;  %v3711_v1 = vpop.f32.mrf.mxu1 }
 0x164   : > { %2244 = vst.msk [vmem:[%s3185_s13 + $0xb0] sm:$0xf] %vm2199_vm2, %v2640_v4  ;;  %vm1414_vm4 = vcmp.gt.f32.partialorder %v1236_v30, 0.0  ;;  %v1542_v2 = vmul.f32 0.2, %v1236_v30  ;;  %v2704_v36 = vpack.c.bf16 %v1667_v14, %v1667_v14  ;;  %vm1348_vm5 = vcmp.gt.f32.partialorder %v972_v12, 0.0 }
 0x165   : > { %v1606_v17 = vsel %vm1350_vm3, %v980_v38, %v1478_v46  ;;  %v1476_v34 = vmul.f32 0.2, %v972_v12  ;;  %vm1412_vm6 = vcmp.gt.f32.partialorder %v1228_v55, 0.0  ;;  %v1540_v19 = vmul.f32 0.2, %v1228_v55  ;;  %v3689_v42 = vpop.f32.mrf.mxu0 }
 0x166   : > { %v2643_v18 = vpack.c.bf16 %v1606_v17, %v1606_v17  ;;  %v1670_v35 = vsel %vm1414_vm4, %v1236_v30, %v1542_v2  ;;  %2308 = vst.msk [vmem:[%s3185_s13 + $0x1b0] sm:$0xf] %vm2199_vm2, %v2704_v36  ;;  %vm1353_vm7 = vcmp.gt.f32.partialorder %v993_v15, 0.0  ;;  %v1481_v26 = vmul.f32 0.2, %v993_v15 }
 0x167   : > { %v2707_v8 = vpack.c.bf16 %v1670_v35, %v1670_v35  ;;  %v1604_v23 = vsel %vm1348_vm5, %v972_v12, %v1476_v34  ;;  %v1668_v29 = vsel %vm1412_vm6, %v1228_v55, %v1540_v19  ;;  %v1249_v31 = vadd.f32 %v3541_v24, %v3563_v41  ;;  %v1016_v9 = vpop.f32.mrf.mxu0 }
 0x168   : > { %2247 = vst.msk [vmem:[%s3185_s13 + $0xbc] sm:$0xf] %vm2199_vm2, %v2643_v18  ;;  %v2641_v28 = vpack.c.bf16 %v1604_v23, %v1604_v23  ;;  %v985_v33 = vadd.f32 %v3541_v24, %v3573_v52  ;;  %v2705_v43 = vpack.c.bf16 %v1668_v29, %v1668_v29  ;;  %v1609_v44 = vsel %vm1353_vm7, %v993_v15, %v1481_v26 }
 0x169   : > { %2311 = vst.msk [vmem:[%s3185_s13 + $0x1bc] sm:$0xf] %vm2199_vm2, %v2707_v8  ;;  %v1241_v63 = vadd.f32 %v3541_v24, %v3575_v60  ;;  %v996_v22 = vadd.f32 %v3541_v24, %v3593_v5  ;;  %v2646_v25 = vpack.c.bf16 %v1609_v44, %v1609_v44  ;;  %vm1417_vm8 = vcmp.gt.f32.partialorder %v1249_v31, 0.0  ;;  %v3719_v12 = vpop.f32.mrf.mxu0 }
 0x16a   : > { %2245 = vst.msk [vmem:[%s3185_s13 + $0xb4] sm:$0xf] %vm2199_vm2, %v2641_v28  ;;  %v1545_v41 = vmul.f32 0.2, %v1249_v31  ;;  %vm1351_vm9 = vcmp.gt.f32.partialorder %v985_v33, 0.0  ;;  %v1252_v5 = vadd.f32 %v3541_v24, %v3595_v10  ;;  %v988_v50 = vadd.f32 %v3541_v24, %v3607_v16 }
 0x16b   : > { %2309 = vst.msk [vmem:[%s3185_s13 + $0x1b4] sm:$0xf] %vm2199_vm2, %v2705_v43  ;;  %v1479_v52 = vmul.f32 0.2, %v985_v33  ;;  %vm1415_vm10 = vcmp.gt.f32.partialorder %v1241_v63, 0.0  ;;  %vm1354_vm11 = vcmp.gt.f32.partialorder %v996_v22, 0.0  ;;  %v1244_v3 = vadd.f32 %v3541_v24, %v3609_v11  ;;  %v1019_v26 = vpop.f32.mrf.mxu0 }
 0x16c   : > { %v1543_v7 = vmul.f32 0.2, %v1241_v63  ;;  %2250 = vst.msk [vmem:[%s3185_s13 + $0xc8] sm:$0xf] %vm2199_vm2, %v2646_v25  ;;  %v1673_v60 = vsel %vm1417_vm8, %v1249_v31, %v1545_v41  ;;  %v1482_v32 = vmul.f32 0.2, %v996_v22  ;;  %v1009_v11 = vadd.f32 %v3541_v24, %v3629_v59 }
 0x16d   : > { %v2710_v47 = vpack.c.bf16 %v1673_v60, %v1673_v60  ;;  %v1607_v48 = vsel %vm1351_vm9, %v985_v33, %v1479_v52  ;;  %vm1418_vm12 = vcmp.gt.f32.partialorder %v1252_v5, 0.0  ;;  %v1546_v54 = vmul.f32 0.2, %v1252_v5  ;;  %v2874_v41 = vpop.f32.mrf.mxu0 }
 0x16e   : > { %v1671_v58 = vsel %vm1415_vm10, %v1241_v63, %v1543_v7  ;;  %v2644_v13 = vpack.c.bf16 %v1607_v48, %v1607_v48  ;;  %v1610_v53 = vsel %vm1354_vm11, %v996_v22, %v1482_v32  ;;  %vm1352_vm13 = vcmp.gt.f32.partialorder %v988_v50, 0.0 }
 0x16f   : > { %v2708_v51 = vpack.c.bf16 %v1671_v58, %v1671_v58  ;;  %2314 = vst.msk [vmem:[%s3185_s13 + $0x1c8] sm:$0xf] %vm2199_vm2, %v2710_v47  ;;  %v2647_v10 = vpack.c.bf16 %v1610_v53, %v1610_v53  ;;  %v1480_v16 = vmul.f32 0.2, %v988_v50  ;;  %vm1416_vm14 = vcmp.gt.f32.partialorder %v1244_v3, 0.0 }
 0x170   : > { %2248 = vst.msk [vmem:[%s3185_s13 + $0xc0] sm:$0xf] %vm2199_vm2, %v2644_v13  ;;  %v1544_v20 = vmul.f32 0.2, %v1244_v3  ;;  %v1265_v61 = vadd.f32 %v3541_v24, %v3631_v40  ;;  %v1674_v62 = vsel %vm1418_vm12, %v1252_v5, %v1546_v54  ;;  %v1001_v57 = vadd.f32 %v3541_v24, %v3637_v49 }
 0x171   : > { %2312 = vst.msk [vmem:[%s3185_s13 + $0x1c0] sm:$0xf] %vm2199_vm2, %v2708_v51  ;;  %2251 = vst.msk [vmem:[%s3185_s13 + $0xcc] sm:$0xf] %vm2199_vm2, %v2647_v10  ;;  %v1608_v37 = vsel %vm1352_vm13, %v988_v50, %v1480_v16  ;;  %v1257_v38 = vadd.f32 %v3541_v24, %v3641_v27  ;;  %v2711_v4 = vpack.c.bf16 %v1674_v62, %v1674_v62  ;;  %vm1357_vm15 = vcmp.gt.f32.partialorder %v1009_v11, 0.0  ;;  %v2935_v27 = vpop.f32.mrf.mxu1  ;;  %v1032_v10 = vpop.f32.mrf.mxu0 }
 0x172   : > { %v2645_v59 = vpack.c.bf16 %v1608_v37, %v1608_v37  ;;  %v1672_v6 = vsel %vm1416_vm14, %v1244_v3, %v1544_v20  ;;  %v1485_v30 = vmul.f32 0.2, %v1009_v11  ;;  %vm1421_vm0 = vcmp.gt.f32.partialorder %v1265_v61, 0.0 }
 0x173   : > { %v2709_v40 = vpack.c.bf16 %v1672_v6, %v1672_v6  ;;  %v1549_v46 = vmul.f32 0.2, %v1265_v61  ;;  %2315 = vst.msk [vmem:[%s3185_s13 + $0x1cc] sm:$0xf] %vm2199_vm2, %v2711_v4  ;;  %vm1355_vm1 = vcmp.gt.f32.partialorder %v1001_v57, 0.0  ;;  %vm1419_vm3 = vcmp.gt.f32.partialorder %v1257_v38, 0.0  ;;  %v1275_v29 = vpop.f32.mrf.mxu1  ;;  %v2875_v6 = vpop.f32.mrf.mxu0 }
 0x174   : > { %2249 = vst.msk [vmem:[%s3185_s13 + $0xc4] sm:$0xf] %vm2199_vm2, %v2645_v59  ;;  %v1483_v49 = vmul.f32 0.2, %v1001_v57  ;;  %v1547_v55 = vmul.f32 0.2, %v1257_v38  ;;  %v1613_v14 = vsel %vm1357_vm15, %v1009_v11, %v1485_v30  ;;  %v1012_v15 = vadd.f32 %v3541_v24, %v3659_v45 }
 0x175   : > { %2313 = vst.msk [vmem:[%s3185_s13 + $0x1c4] sm:$0xf] %vm2199_vm2, %v2709_v40  ;;  %v1677_v2 = vsel %vm1421_vm0, %v1265_v61, %v1549_v46  ;;  %v1268_v36 = vadd.f32 %v3541_v24, %v3665_v21  ;;  %v2650_v17 = vpack.c.bf16 %v1613_v14, %v1613_v14  ;;  %v1004_v21 = vadd.f32 %v3541_v24, %v3669_v0  ;;  %v2938_v60 = vpop.f32.mrf.mxu1 }
 0x176   : > { %v2714_v34 = vpack.c.bf16 %v1677_v2, %v1677_v2  ;;  %v1611_v18 = vsel %vm1355_vm1, %v1001_v57, %v1483_v49  ;;  %v1675_v35 = vsel %vm1419_vm3, %v1257_v38, %v1547_v55  ;;  %vm1358_vm4 = vcmp.gt.f32.partialorder %v1012_v15, 0.0 }
 0x177   : > { %v2648_v19 = vpack.c.bf16 %v1611_v18, %v1611_v18  ;;  %v2712_v8 = vpack.c.bf16 %v1675_v35, %v1675_v35  ;;  %v1486_v23 = vmul.f32 0.2, %v1012_v15  ;;  %2254 = vst.msk [vmem:[%s3185_s13 + $0xd8] sm:$0xf] %vm2199_vm2, %v2650_v17  ;;  %vm1422_vm5 = vcmp.gt.f32.partialorder %v1268_v36, 0.0  ;;  %v1288_v20 = vpop.f32.mrf.mxu1 }
 0x178   : > { %2318 = vst.msk [vmem:[%s3185_s13 + $0x1d8] sm:$0xf] %vm2199_vm2, %v2714_v34  ;;  %v1550_v45 = vmul.f32 0.2, %v1268_v36  ;;  %v1260_v28 = vadd.f32 %v3541_v24, %v3677_v56  ;;  %v1025_v33 = vadd.f32 %v3541_v24, %v3689_v42  ;;  %v1281_v43 = vadd.f32 %v3541_v24, %v3697_v39 }
 0x179   : > { %2252 = vst.msk [vmem:[%s3185_s13 + $0xd0] sm:$0xf] %vm2199_vm2, %v2648_v19  ;;  %2316 = vst.msk [vmem:[%s3185_s13 + $0x1d0] sm:$0xf] %vm2199_vm2, %v2712_v8  ;;  %v1614_v31 = vsel %vm1358_vm4, %v1012_v15, %v1486_v23  ;;  %v1017_v44 = vadd.f32 %v3541_v24, %v1016_v9  ;;  %vm1356_vm6 = vcmp.gt.f32.partialorder %v1004_v21, 0.0  ;;  %v1273_v58 = vadd.f32 %v3541_v24, %v3711_v1  ;;  %v1035_v19 = vpop.f32.mrf.mxu0 }
 0x17a   : > { %v2651_v0 = vpack.c.bf16 %v1614_v31, %v1614_v31  ;;  %v1678_v63 = vsel %vm1422_vm5, %v1268_v36, %v1550_v45  ;;  %v1484_v56 = vmul.f32 0.2, %v1004_v21  ;;  %vm1420_vm7 = vcmp.gt.f32.partialorder %v1260_v28, 0.0 }
 0x17b   : > { %v2715_v22 = vpack.c.bf16 %v1678_v63, %v1678_v63  ;;  %v1548_v25 = vmul.f32 0.2, %v1260_v28  ;;  %vm1361_vm8 = vcmp.gt.f32.partialorder %v1025_v33, 0.0  ;;  %v1489_v7 = vmul.f32 0.2, %v1025_v33 }
 0x17c   : > { %2255 = vst.msk [vmem:[%s3185_s13 + $0xdc] sm:$0xf] %vm2199_vm2, %v2651_v0  ;;  %v1612_v52 = vsel %vm1356_vm6, %v1004_v21, %v1484_v56  ;;  %vm1425_vm9 = vcmp.gt.f32.partialorder %v1281_v43, 0.0  ;;  %v1553_v42 = vmul.f32 0.2, %v1281_v43  ;;  %vm1359_vm10 = vcmp.gt.f32.partialorder %v1017_v44, 0.0 }
 0x17d   : > { %2319 = vst.msk [vmem:[%s3185_s13 + $0x1dc] sm:$0xf] %vm2199_vm2, %v2715_v22  ;;  %v2649_v32 = vpack.c.bf16 %v1612_v52, %v1612_v52  ;;  %v1676_v5 = vsel %vm1420_vm7, %v1260_v28, %v1548_v25  ;;  %v1487_v50 = vmul.f32 0.2, %v1017_v44  ;;  %v1617_v47 = vsel %vm1361_vm8, %v1025_v33, %v1489_v7 }
 0x17e   : > { %v2713_v39 = vpack.c.bf16 %v1676_v5, %v1676_v5  ;;  %v1681_v48 = vsel %vm1425_vm9, %v1281_v43, %v1553_v42  ;;  %v2654_v3 = vpack.c.bf16 %v1617_v47, %v1617_v47  ;;  %v1028_v53 = vadd.f32 %v3541_v24, %v3719_v12  ;;  %v2939_v12 = vpop.f32.mrf.mxu1 }
 0x17f   : > { %2253 = vst.msk [vmem:[%s3185_s13 + $0xd4] sm:$0xf] %vm2199_vm2, %v2649_v32  ;;  %v2718_v13 = vpack.c.bf16 %v1681_v48, %v1681_v48  ;;  %v1615_v51 = vsel %vm1359_vm10, %v1017_v44, %v1487_v50  ;;  %vm1423_vm11 = vcmp.gt.f32.partialorder %v1273_v58, 0.0  ;;  %v1551_v16 = vmul.f32 0.2, %v1273_v58 }
 0x180   : > { %2317 = vst.msk [vmem:[%s3185_s13 + $0x1d4] sm:$0xf] %vm2199_vm2, %v2713_v39  ;;  %v2652_v54 = vpack.c.bf16 %v1615_v51, %v1615_v51  ;;  %v1284_v9 = vadd.f32 %v3541_v24, %v2935_v27  ;;  %2258 = vst.msk [vmem:[%s3185_s13 + $0xe8] sm:$0xf] %vm2199_vm2, %v2654_v3  ;;  %vm1362_vm12 = vcmp.gt.f32.partialorder %v1028_v53, 0.0  ;;  %v1020_v61 = vadd.f32 %v3541_v24, %v1019_v26  ;;  %v1291_v26 = vpop.f32.mrf.mxu1 }
 0x181   : > { %2322 = vst.msk [vmem:[%s3185_s13 + $0x1e8] sm:$0xf] %vm2199_vm2, %v2718_v13  ;;  %v1490_v11 = vmul.f32 0.2, %v1028_v53  ;;  %v1276_v1 = vadd.f32 %v3541_v24, %v1275_v29  ;;  %v1679_v62 = vsel %vm1423_vm11, %v1273_v58, %v1551_v16  ;;  %v1041_v57 = vadd.f32 %v3541_v24, %v2874_v41 }
 0x182   : > { %2256 = vst.msk [vmem:[%s3185_s13 + $0xe0] sm:$0xf] %vm2199_vm2, %v2652_v54  ;;  %vm1426_vm13 = vcmp.gt.f32.partialorder %v1284_v9, 0.0  ;;  %v1554_v37 = vmul.f32 0.2, %v1284_v9  ;;  %v2716_v38 = vpack.c.bf16 %v1679_v62, %v1679_v62  ;;  %vm1360_vm14 = vcmp.gt.f32.partialorder %v1020_v61, 0.0 }
 0x183   : > { %v1618_v4 = vsel %vm1362_vm12, %v1028_v53, %v1490_v11  ;;  %v1488_v59 = vmul.f32 0.2, %v1020_v61  ;;  %vm1424_vm15 = vcmp.gt.f32.partialorder %v1276_v1, 0.0  ;;  %v1552_v46 = vmul.f32 0.2, %v1276_v1 }
 0x184   : > { %v2655_v40 = vpack.c.bf16 %v1618_v4, %v1618_v4  ;;  %v1682_v30 = vsel %vm1426_vm13, %v1284_v9, %v1554_v37  ;;  %2320 = vst.msk [vmem:[%s3185_s13 + $0x1e0] sm:$0xf] %vm2199_vm2, %v2716_v38  ;;  %vm1365_vm0 = vcmp.gt.f32.partialorder %v1041_v57, 0.0  ;;  %v1493_v27 = vmul.f32 0.2, %v1041_v57 }
 0x185   : > { %v2719_v49 = vpack.c.bf16 %v1682_v30, %v1682_v30  ;;  %v1616_v55 = vsel %vm1360_vm14, %v1020_v61, %v1488_v59  ;;  %v1680_v2 = vsel %vm1424_vm15, %v1276_v1, %v1552_v46  ;;  %v1297_v15 = vadd.f32 %v3541_v24, %v2938_v60 }
 0x186   : > { %2259 = vst.msk [vmem:[%s3185_s13 + $0xec] sm:$0xf] %vm2199_vm2, %v2655_v40  ;;  %v2653_v14 = vpack.c.bf16 %v1616_v55, %v1616_v55  ;;  %v1033_v36 = vadd.f32 %v3541_v24, %v1032_v10  ;;  %v2717_v17 = vpack.c.bf16 %v1680_v2, %v1680_v2  ;;  %v1621_v34 = vsel %vm1365_vm0, %v1041_v57, %v1493_v27 }
 0x187   : > { %2323 = vst.msk [vmem:[%s3185_s13 + $0x1ec] sm:$0xf] %vm2199_vm2, %v2719_v49  ;;  %v1289_v18 = vadd.f32 %v3541_v24, %v1288_v20  ;;  %v1044_v35 = vadd.f32 %v3541_v24, %v2875_v6  ;;  %v2658_v8 = vpack.c.bf16 %v1621_v34, %v1621_v34  ;;  %vm1429_vm1 = vcmp.gt.f32.partialorder %v1297_v15, 0.0 }
 0x188   : > { %2257 = vst.msk [vmem:[%s3185_s13 + $0xe4] sm:$0xf] %vm2199_vm2, %v2653_v14  ;;  %v1557_v23 = vmul.f32 0.2, %v1297_v15  ;;  %vm1363_vm3 = vcmp.gt.f32.partialorder %v1033_v36, 0.0  ;;  %v1300_v31 = vadd.f32 %v3541_v24, %v2939_v12  ;;  %v1036_v33 = vadd.f32 %v3541_v24, %v1035_v19 }
 0x189   : > { %2321 = vst.msk [vmem:[%s3185_s13 + $0x1e4] sm:$0xf] %vm2199_vm2, %v2717_v17  ;;  %v1491_v45 = vmul.f32 0.2, %v1033_v36  ;;  %vm1427_vm4 = vcmp.gt.f32.partialorder %v1289_v18, 0.0  ;;  %vm1366_vm5 = vcmp.gt.f32.partialorder %v1044_v35, 0.0  ;;  %v1292_v63 = vadd.f32 %v3541_v24, %v1291_v26 }
 0x18a   : > { %v1555_v21 = vmul.f32 0.2, %v1289_v18  ;;  %2262 = vst.msk [vmem:[%s3185_s13 + $0xf8] sm:$0xf] %vm2199_vm2, %v2658_v8  ;;  %v1685_v28 = vsel %vm1429_vm1, %v1297_v15, %v1557_v23  ;;  %v1494_v29 = vmul.f32 0.2, %v1044_v35 }
 0x18b   : > { %v2722_v43 = vpack.c.bf16 %v1685_v28, %v1685_v28  ;;  %v1619_v44 = vsel %vm1363_vm3, %v1033_v36, %v1491_v45  ;;  %vm1430_vm6 = vcmp.gt.f32.partialorder %v1300_v31, 0.0  ;;  %v1558_v52 = vmul.f32 0.2, %v1300_v31 }
 0x18c   : > { %v1683_v0 = vsel %vm1427_vm4, %v1289_v18, %v1555_v21  ;;  %v2656_v56 = vpack.c.bf16 %v1619_v44, %v1619_v44  ;;  %v1622_v25 = vsel %vm1366_vm5, %v1044_v35, %v1494_v29  ;;  %vm1364_vm7 = vcmp.gt.f32.partialorder %v1036_v33, 0.0 }
 0x18d   : > { %v2720_v22 = vpack.c.bf16 %v1683_v0, %v1683_v0  ;;  %2326 = vst.msk [vmem:[%s3185_s13 + $0x1f8] sm:$0xf] %vm2199_vm2, %v2722_v43  ;;  %v2659_v41 = vpack.c.bf16 %v1622_v25, %v1622_v25  ;;  %v1492_v7 = vmul.f32 0.2, %v1036_v33  ;;  %vm1428_vm8 = vcmp.gt.f32.partialorder %v1292_v63, 0.0 }
 0x18e   : > { %2260 = vst.msk [vmem:[%s3185_s13 + $0xf0] sm:$0xf] %vm2199_vm2, %v2656_v56  ;;  %v1556_v42 = vmul.f32 0.2, %v1292_v63  ;;  %v1686_v24 = vsel %vm1430_vm6, %v1300_v31, %v1558_v52 }
 0x18f   : > { %2324 = vst.msk [vmem:[%s3185_s13 + $0x1f0] sm:$0xf] %vm2199_vm2, %v2720_v22  ;;  %2263 = vst.msk [vmem:[%s3185_s13 + $0xfc] sm:$0xf] %vm2199_vm2, %v2659_v41  ;;  %v1620_v60 = vsel %vm1364_vm7, %v1036_v33, %v1492_v7  ;;  %v2723_v32 = vpack.c.bf16 %v1686_v24, %v1686_v24 }
 0x190   : > { %v2657_v5 = vpack.c.bf16 %v1620_v60, %v1620_v60  ;;  %v1684_v50 = vsel %vm1428_vm8, %v1292_v63, %v1556_v42 }
 0x191   : > { %v2721_v39 = vpack.c.bf16 %v1684_v50, %v1684_v50  ;;  %2327 = vst.msk [vmem:[%s3185_s13 + $0x1fc] sm:$0xf] %vm2199_vm2, %v2723_v32 }
 0x192   : > { %2261 = vst.msk [vmem:[%s3185_s13 + $0xf4] sm:$0xf] %vm2199_vm2, %v2657_v5 }
 0x193   : > { %2325 = vst.msk [vmem:[%s3185_s13 + $0x1f4] sm:$0xf] %vm2199_vm2, %v2721_v39 }
 0x194 PF: > { %s13_s12 = sadd.s32 1, %s3043_s12  }
 0x195   : > { %p10_p4 = scmp.ge.s32.totalorder %s13_s12, 4  }
 0x197   :  { %12 = sbr.rel (!%p10_p4) target bundleno = 1 (0x1), region = 62 }

// kernel: _lambda_.7
= control target key start
LH: loop header
LB: loop body
LE: loop exit
PB: predicated region body
PF: predicated region fallthrough
CT: control target
= control target key end

     0   :  { %v1694_v0 = vmov 0   ;;  %vm1271_vm2 = vcmask 257024   ;;  %s2312_s1 = inlined_call_operand.vmem [shape: bf16[256,32], index: 1, kind: input, shape index: {}]   ;;  %s2313_s0 = inlined_call_operand.vmem [shape: bf16[512,256], index: 0, kind: input, shape index: {}]   ;;  %s2314_s2 = inlined_call_operand.vmem [shape: f32[1,32], index: 2, kind: input, shape index: {}]   ;;  %s2315_s3 = inlined_call_operand.vmem [shape: bf16[512,32], index: 3, kind: output, shape index: {}]  }
   0x1   :  { %534 = vmatprep.subr.bf16.mxu0 %v1694_v0  ;;  %1549 = vmatprep.subr.bf16.mxu1 %v1694_v0  ;;  %v1582_v1 = vld [vmem:[%s2312_s1 + $0x38] sm:$0xff]   ;;  %v1583_v2 = vld [vmem:[%s2312_s1 + $0x30] sm:$0xff]   ;;  %v1584_v3 = vld [vmem:[%s2312_s1 + $0x28] sm:$0xff]  }
   0x2   :  { %535 = vmatpush1.bf16.msra.mxu0 %v1582_v1  ;;  %1565 = vmatpush1.bf16.msra.mxu1 %v1582_v1  ;;  %v1585_v4 = vld [vmem:[%s2312_s1 + $0x20] sm:$0xff]   ;;  %v1586_v5 = vld [vmem:[%s2312_s1 + $0x18] sm:$0xff]   ;;  %v1587_v7 = vld [vmem:[%s2312_s1 + $0x10] sm:$0xff]  }
   0x3   :  { %536 = vmatprep.subr.bf16.mxu0 %v1694_v0  ;;  %1550 = vmatprep.subr.bf16.mxu1 %v1694_v0  ;;  %v1600_v6 = vld [vmem:[%s2313_s0 + $0x4] ss:$8 sps:$4 sm:$0xff]   ;;  %v1590_v11 = vld [vmem:[%s2312_s1 + $0x78] sm:$0xff]   ;;  %v1591_v12 = vld [vmem:[%s2312_s1 + $0x70] sm:$0xff]  }
   0x4   :  { %v1603_v8 = vld [vmem:[%s2313_s0 + $0x104] ss:$8 sps:$4 sm:$0xff]   ;;  %566 = vmatprep.mubr.bf16.mxu0 %v1600_v6  ;;  %v1594_v15 = vld [vmem:[%s2312_s1 + $0x58] sm:$0xff]   ;;  %v1595_v16 = vld [vmem:[%s2312_s1 + $0x50] sm:$0xff]  }
   0x5   :  { %694 = vmatprep.mubr.bf16.mxu1 %v1603_v8  ;;  %v1588_v9 = vld [vmem:[%s2312_s1 + $0x8] sm:$0xff]   ;;  %v1589_v10 = vld [vmem:[%s2312_s1] sm:$0xff]   ;;  %v1604_v21 = vld [vmem:[%s2313_s0 + $0x14] ss:$8 sps:$4 sm:$0xff]  }
   0x6   :  { %537 = vmatpush1.bf16.msra.mxu0 %v1583_v2  ;;  %1566 = vmatpush1.bf16.msra.mxu1 %v1583_v2  ;;  %v1592_v13 = vld [vmem:[%s2312_s1 + $0x68] sm:$0xff]   ;;  %v1593_v14 = vld [vmem:[%s2312_s1 + $0x60] sm:$0xff]   ;;  %v1606_v22 = vld [vmem:[%s2313_s0 + $0x114] ss:$8 sps:$4 sm:$0xff]  }
   0x7   :  { %538 = vmatprep.subr.bf16.mxu0 %v1694_v0  ;;  %1551 = vmatprep.subr.bf16.mxu1 %v1694_v0  ;;  %v1596_v17 = vld [vmem:[%s2312_s1 + $0x48] sm:$0xff]   ;;  %v1597_v18 = vld [vmem:[%s2312_s1 + $0x40] sm:$0xff]   ;;  %v1608_v23 = vld [vmem:[%s2313_s0 + $0x10] ss:$8 sps:$4 sm:$0xff]  }
   0x8   :  { %v1598_v19 = vld [vmem:[%s2313_s0] ss:$8 sps:$4 sm:$0xff]   ;;  %v1609_v24 = vld [vmem:[%s2313_s0 + $0x110] ss:$8 sps:$4 sm:$0xff]   ;;  %v1610_v25 = vld [vmem:[%s2313_s0 + $0x24] ss:$8 sps:$4 sm:$0xff]  }
   0x9   :  { %v1601_v20 = vld [vmem:[%s2313_s0 + $0x100] ss:$8 sps:$4 sm:$0xff]   ;;  %v1612_v26 = vld [vmem:[%s2313_s0 + $0x124] ss:$8 sps:$4 sm:$0xff]   ;;  %v1616_v29 = vld [vmem:[%s2313_s0 + $0x34] ss:$8 sps:$4 sm:$0xff]  }
   0xa   :  { %539 = vmatpush1.bf16.msra.mxu0 %v1584_v3  ;;  %1567 = vmatpush1.bf16.msra.mxu1 %v1584_v3  ;;  %v1614_v27 = vld [vmem:[%s2313_s0 + $0x20] ss:$8 sps:$4 sm:$0xff]   ;;  %v1618_v30 = vld [vmem:[%s2313_s0 + $0x134] ss:$8 sps:$4 sm:$0xff]   ;;  %v1620_v31 = vld [vmem:[%s2313_s0 + $0x30] ss:$8 sps:$4 sm:$0xff]  }
   0xb   :  { %540 = vmatprep.subr.bf16.mxu0 %v1694_v0  ;;  %1552 = vmatprep.subr.bf16.mxu1 %v1694_v0  ;;  %v1615_v28 = vld [vmem:[%s2313_s0 + $0x120] ss:$8 sps:$4 sm:$0xff]   ;;  %v1621_v32 = vld [vmem:[%s2313_s0 + $0x130] ss:$8 sps:$4 sm:$0xff]   ;;  %v1622_v33 = vld [vmem:[%s2313_s0 + $0x44] ss:$8 sps:$4 sm:$0xff]  }
   0xc   :  { %v1624_v34 = vld [vmem:[%s2313_s0 + $0x144] ss:$8 sps:$4 sm:$0xff]   ;;  %v1626_v35 = vld [vmem:[%s2313_s0 + $0x40] ss:$8 sps:$4 sm:$0xff]   ;;  %v1628_v37 = vld [vmem:[%s2313_s0 + $0x54] ss:$8 sps:$4 sm:$0xff]  }
   0xd   :  { %v1627_v36 = vld [vmem:[%s2313_s0 + $0x140] ss:$8 sps:$4 sm:$0xff]   ;;  %v1630_v38 = vld [vmem:[%s2313_s0 + $0x154] ss:$8 sps:$4 sm:$0xff]   ;;  %v1632_v39 = vld [vmem:[%s2313_s0 + $0x50] ss:$8 sps:$4 sm:$0xff]  }
   0xe   :  { %541 = vmatpush1.bf16.msra.mxu0 %v1585_v4  ;;  %1568 = vmatpush1.bf16.msra.mxu1 %v1585_v4  ;;  %v1633_v40 = vld [vmem:[%s2313_s0 + $0x150] ss:$8 sps:$4 sm:$0xff]   ;;  %v1634_v41 = vld [vmem:[%s2313_s0 + $0x64] ss:$8 sps:$4 sm:$0xff]   ;;  %v1638_v43 = vld [vmem:[%s2313_s0 + $0x60] ss:$8 sps:$4 sm:$0xff]  }
   0xf   :  { %542 = vmatprep.subr.bf16.mxu0 %v1694_v0  ;;  %1553 = vmatprep.subr.bf16.mxu1 %v1694_v0  ;;  %v1636_v42 = vld [vmem:[%s2313_s0 + $0x164] ss:$8 sps:$4 sm:$0xff]   ;;  %v1639_v44 = vld [vmem:[%s2313_s0 + $0x160] ss:$8 sps:$4 sm:$0xff]   ;;  %v1640_v45 = vld [vmem:[%s2313_s0 + $0x74] ss:$8 sps:$4 sm:$0xff]  }
  0x10   :  { %v1642_v46 = vld [vmem:[%s2313_s0 + $0x174] ss:$8 sps:$4 sm:$0xff]   ;;  %v1644_v47 = vld [vmem:[%s2313_s0 + $0x70] ss:$8 sps:$4 sm:$0xff]   ;;  %v1646_v49 = vld [vmem:[%s2313_s0 + $0x84] ss:$8 sps:$4 sm:$0xff]  }
  0x11   :  { %v1645_v48 = vld [vmem:[%s2313_s0 + $0x170] ss:$8 sps:$4 sm:$0xff]   ;;  %v1648_v50 = vld [vmem:[%s2313_s0 + $0x184] ss:$8 sps:$4 sm:$0xff]   ;;  %v1650_v51 = vld [vmem:[%s2313_s0 + $0x80] ss:$8 sps:$4 sm:$0xff]  }
  0x12   :  { %543 = vmatpush1.bf16.msra.mxu0 %v1586_v5  ;;  %1569 = vmatpush1.bf16.msra.mxu1 %v1586_v5  ;;  %v1651_v52 = vld [vmem:[%s2313_s0 + $0x180] ss:$8 sps:$4 sm:$0xff]   ;;  %v1652_v53 = vld [vmem:[%s2313_s0 + $0x94] ss:$8 sps:$4 sm:$0xff]   ;;  %v1656_v55 = vld [vmem:[%s2313_s0 + $0x90] ss:$8 sps:$4 sm:$0xff]  }
  0x13   :  { %544 = vmatprep.subr.bf16.mxu0 %v1694_v0  ;;  %1554 = vmatprep.subr.bf16.mxu1 %v1694_v0  ;;  %v1654_v54 = vld [vmem:[%s2313_s0 + $0x194] ss:$8 sps:$4 sm:$0xff]   ;;  %v1657_v56 = vld [vmem:[%s2313_s0 + $0x190] ss:$8 sps:$4 sm:$0xff]   ;;  %v1658_v57 = vld [vmem:[%s2313_s0 + $0xa4] ss:$8 sps:$4 sm:$0xff]  }
  0x14   :  { %v1660_v58 = vld [vmem:[%s2313_s0 + $0x1a4] ss:$8 sps:$4 sm:$0xff]   ;;  %v1662_v59 = vld [vmem:[%s2313_s0 + $0xa0] ss:$8 sps:$4 sm:$0xff]   ;;  %v1664_v61 = vld [vmem:[%s2313_s0 + $0xb4] ss:$8 sps:$4 sm:$0xff]  }
  0x15   :  { %v1663_v60 = vld [vmem:[%s2313_s0 + $0x1a0] ss:$8 sps:$4 sm:$0xff]   ;;  %v1666_v62 = vld [vmem:[%s2313_s0 + $0x1b4] ss:$8 sps:$4 sm:$0xff]   ;;  %v1668_v63 = vld [vmem:[%s2313_s0 + $0xb0] ss:$8 sps:$4 sm:$0xff]  }
  0x16   :  { %545 = vmatpush1.bf16.msra.mxu0 %v1587_v7  ;;  %1570 = vmatpush1.bf16.msra.mxu1 %v1587_v7  ;;  %v1670_v1 = vld [vmem:[%s2313_s0 + $0xc4] ss:$8 sps:$4 sm:$0xff]   ;;  %v1674_v3 = vld [vmem:[%s2313_s0 + $0xc0] ss:$8 sps:$4 sm:$0xff]   ;;  %v1676_v5 = vld [vmem:[%s2313_s0 + $0xd4] ss:$8 sps:$4 sm:$0xff]  }
  0x17   :  { %546 = vmatprep.subr.bf16.mxu0 %v1694_v0  ;;  %1555 = vmatprep.subr.bf16.mxu1 %v1694_v0  ;;  %v1672_v2 = vld [vmem:[%s2313_s0 + $0x1c4] ss:$8 sps:$4 sm:$0xff]   ;;  %v1675_v4 = vld [vmem:[%s2313_s0 + $0x1c0] ss:$8 sps:$4 sm:$0xff]   ;;  %v1678_v6 = vld [vmem:[%s2313_s0 + $0x1d4] ss:$8 sps:$4 sm:$0xff]  }
  0x18   :  { %v1680_v7 = vld [vmem:[%s2313_s0 + $0xd0] ss:$8 sps:$4 sm:$0xff]  }
  0x19   :  { %v1681_v8 = vld [vmem:[%s2313_s0 + $0x1d0] ss:$8 sps:$4 sm:$0xff]  }
  0x1a   :  { %547 = vmatpush1.bf16.msra.mxu0 %v1588_v9  ;;  %1571 = vmatpush1.bf16.msra.mxu1 %v1588_v9  ;;  %v1682_v9 = vld [vmem:[%s2313_s0 + $0xe4] ss:$8 sps:$4 sm:$0xff]  }
  0x1b   :  { %548 = vmatprep.subr.bf16.mxu0 %v1694_v0  ;;  %1556 = vmatprep.subr.bf16.mxu1 %v1694_v0 }
  0x1e   :  { %549 = vmatpush1.bf16.msra.mxu0 %v1589_v10  ;;  %1572 = vmatpush1.bf16.msra.mxu1 %v1589_v10  ;;  %v1684_v10 = vld [vmem:[%s2313_s0 + $0x1e4] ss:$8 sps:$4 sm:$0xff]  }
  0x1f   :  { %550 = vmatprep.subr.bf16.mxu0 %v1694_v0  ;;  %1557 = vmatprep.subr.bf16.mxu1 %v1694_v0 }
  0x22   :  { %551 = vmatpush2.bf16.msra.mxu0 %v1590_v11  ;;  %1573 = vmatpush2.bf16.msra.mxu1 %v1590_v11  ;;  %v1686_v11 = vld [vmem:[%s2313_s0 + $0xe0] ss:$8 sps:$4 sm:$0xff]  }
  0x23   :  { %552 = vmatprep.subr.bf16.mxu0 %v1694_v0  ;;  %1558 = vmatprep.subr.bf16.mxu1 %v1694_v0 }
  0x26   :  { %553 = vmatpush2.bf16.msra.mxu0 %v1591_v12  ;;  %1574 = vmatpush2.bf16.msra.mxu1 %v1591_v12  ;;  %v1687_v12 = vld [vmem:[%s2313_s0 + $0x1e0] ss:$8 sps:$4 sm:$0xff]  }
  0x27   :  { %554 = vmatprep.subr.bf16.mxu0 %v1694_v0  ;;  %1559 = vmatprep.subr.bf16.mxu1 %v1694_v0 }
  0x2a   :  { %555 = vmatpush2.bf16.msra.mxu0 %v1592_v13  ;;  %1575 = vmatpush2.bf16.msra.mxu1 %v1592_v13  ;;  %v1688_v13 = vld [vmem:[%s2313_s0 + $0xf4] ss:$8 sps:$4 sm:$0xff]  }
  0x2b   :  { %556 = vmatprep.subr.bf16.mxu0 %v1694_v0  ;;  %1560 = vmatprep.subr.bf16.mxu1 %v1694_v0 }
  0x2e   :  { %557 = vmatpush2.bf16.msra.mxu0 %v1593_v14  ;;  %1576 = vmatpush2.bf16.msra.mxu1 %v1593_v14  ;;  %v1690_v14 = vld [vmem:[%s2313_s0 + $0x1f4] ss:$8 sps:$4 sm:$0xff]  }
  0x2f   :  { %558 = vmatprep.subr.bf16.mxu0 %v1694_v0  ;;  %1561 = vmatprep.subr.bf16.mxu1 %v1694_v0 }
  0x32   :  { %559 = vmatpush2.bf16.msra.mxu0 %v1594_v15  ;;  %1577 = vmatpush2.bf16.msra.mxu1 %v1594_v15  ;;  %v1692_v15 = vld [vmem:[%s2313_s0 + $0xf0] ss:$8 sps:$4 sm:$0xff]  }
  0x33   :  { %560 = vmatprep.subr.bf16.mxu0 %v1694_v0  ;;  %1562 = vmatprep.subr.bf16.mxu1 %v1694_v0 }
  0x36   :  { %561 = vmatpush2.bf16.msra.mxu0 %v1595_v16  ;;  %1578 = vmatpush2.bf16.msra.mxu1 %v1595_v16  ;;  %v1693_v16 = vld [vmem:[%s2313_s0 + $0x1f0] ss:$8 sps:$4 sm:$0xff]  }
  0x37   :  { %562 = vmatprep.subr.bf16.mxu0 %v1694_v0  ;;  %1563 = vmatprep.subr.bf16.mxu1 %v1694_v0 }
  0x3a   :  { %563 = vmatpush2.bf16.msra.mxu0 %v1596_v17  ;;  %1579 = vmatpush2.bf16.msra.mxu1 %v1596_v17  ;;  %v1990_v17 = vld [vmem:[%s2314_s2] ss:$0 sm:$0xff] }
  0x3b   :  { %564 = vmatprep.subr.bf16.mxu0 %v1694_v0  ;;  %1564 = vmatprep.subr.bf16.mxu1 %v1694_v0  ;;  %v1669_v0 = vld [vmem:[%s2313_s0 + $0x1b0] ss:$8 sps:$4 sm:$0xff]  }
  0x3e   :  { %565 = vmatpush2.bf16.msra.mxu0 %v1597_v18  ;;  %1580 = vmatpush2.bf16.msra.mxu1 %v1597_v18 }
  0x41   :  { %567 = vmatmul.mubr.bf16.vlgmr.msra.gmra.mxu0 %v1598_v19  ;;  %695 = vmatmul.mubr.bf16.vlgmr.msra.gmra.mxu1 %v1601_v20 }
  0x42   :  { %574 = vmatprep.mubr.bf16.mxu0 %v1604_v21  ;;  %702 = vmatprep.mubr.bf16.mxu1 %v1606_v22 }
  0x49   :  { %575 = vmatmul.mubr.bf16.gmra.mxu0 %v1608_v23  ;;  %703 = vmatmul.mubr.bf16.gmra.mxu1 %v1609_v24 }
  0x4a   :  { %582 = vmatprep.mubr.bf16.mxu0 %v1610_v25  ;;  %710 = vmatprep.mubr.bf16.mxu1 %v1612_v26 }
  0x51   :  { %583 = vmatmul.mubr.bf16.gmra.mxu0 %v1614_v27  ;;  %711 = vmatmul.mubr.bf16.gmra.mxu1 %v1615_v28 }
  0x52   :  { %590 = vmatprep.mubr.bf16.mxu0 %v1616_v29  ;;  %718 = vmatprep.mubr.bf16.mxu1 %v1618_v30 }
  0x59   :  { %591 = vmatmul.mubr.bf16.gmra.mxu0 %v1620_v31  ;;  %719 = vmatmul.mubr.bf16.gmra.mxu1 %v1621_v32 }
  0x5a   :  { %598 = vmatprep.mubr.bf16.mxu0 %v1622_v33  ;;  %726 = vmatprep.mubr.bf16.mxu1 %v1624_v34 }
  0x61   :  { %599 = vmatmul.mubr.bf16.gmra.mxu0 %v1626_v35  ;;  %727 = vmatmul.mubr.bf16.gmra.mxu1 %v1627_v36 }
  0x62   :  { %606 = vmatprep.mubr.bf16.mxu0 %v1628_v37  ;;  %734 = vmatprep.mubr.bf16.mxu1 %v1630_v38 }
  0x69   :  { %607 = vmatmul.mubr.bf16.gmra.mxu0 %v1632_v39  ;;  %735 = vmatmul.mubr.bf16.gmra.mxu1 %v1633_v40 }
  0x6a   :  { %614 = vmatprep.mubr.bf16.mxu0 %v1634_v41  ;;  %742 = vmatprep.mubr.bf16.mxu1 %v1636_v42 }
  0x71   :  { %615 = vmatmul.mubr.bf16.gmra.mxu0 %v1638_v43  ;;  %743 = vmatmul.mubr.bf16.gmra.mxu1 %v1639_v44 }
  0x72   :  { %622 = vmatprep.mubr.bf16.mxu0 %v1640_v45  ;;  %750 = vmatprep.mubr.bf16.mxu1 %v1642_v46 }
  0x79   :  { %623 = vmatmul.mubr.bf16.gmra.mxu0 %v1644_v47  ;;  %751 = vmatmul.mubr.bf16.gmra.mxu1 %v1645_v48 }
  0x7a   :  { %630 = vmatprep.mubr.bf16.mxu0 %v1646_v49  ;;  %758 = vmatprep.mubr.bf16.mxu1 %v1648_v50 }
  0x81   :  { %631 = vmatmul.mubr.bf16.gmra.mxu0 %v1650_v51  ;;  %759 = vmatmul.mubr.bf16.gmra.mxu1 %v1651_v52 }
  0x82   :  { %638 = vmatprep.mubr.bf16.mxu0 %v1652_v53  ;;  %766 = vmatprep.mubr.bf16.mxu1 %v1654_v54 }
  0x89   :  { %639 = vmatmul.mubr.bf16.gmra.mxu0 %v1656_v55  ;;  %767 = vmatmul.mubr.bf16.gmra.mxu1 %v1657_v56 }
  0x8a   :  { %646 = vmatprep.mubr.bf16.mxu0 %v1658_v57  ;;  %774 = vmatprep.mubr.bf16.mxu1 %v1660_v58 }
  0x91   :  { %647 = vmatmul.mubr.bf16.gmra.mxu0 %v1662_v59  ;;  %775 = vmatmul.mubr.bf16.gmra.mxu1 %v1663_v60 }
  0x92   :  { %654 = vmatprep.mubr.bf16.mxu0 %v1664_v61  ;;  %782 = vmatprep.mubr.bf16.mxu1 %v1666_v62 }
  0x99   :  { %655 = vmatmul.mubr.bf16.gmra.mxu0 %v1668_v63  ;;  %783 = vmatmul.mubr.bf16.gmra.mxu1 %v1669_v0 }
  0x9a   :  { %662 = vmatprep.mubr.bf16.mxu0 %v1670_v1  ;;  %790 = vmatprep.mubr.bf16.mxu1 %v1672_v2 }
  0xa1   :  { %663 = vmatmul.mubr.bf16.gmra.mxu0 %v1674_v3  ;;  %791 = vmatmul.mubr.bf16.gmra.mxu1 %v1675_v4 }
  0xa2   :  { %670 = vmatprep.mubr.bf16.mxu0 %v1676_v5  ;;  %798 = vmatprep.mubr.bf16.mxu1 %v1678_v6 }
  0xa9   :  { %671 = vmatmul.mubr.bf16.gmra.mxu0 %v1680_v7  ;;  %799 = vmatmul.mubr.bf16.gmra.mxu1 %v1681_v8 }
  0xaa   :  { %678 = vmatprep.mubr.bf16.mxu0 %v1682_v9  ;;  %806 = vmatprep.mubr.bf16.mxu1 %v1684_v10 }
  0xb1   :  { %679 = vmatmul.mubr.bf16.gmra.mxu0 %v1686_v11  ;;  %807 = vmatmul.mubr.bf16.gmra.mxu1 %v1687_v12 }
  0xb2   :  { %686 = vmatprep.mubr.bf16.mxu0 %v1688_v13  ;;  %814 = vmatprep.mubr.bf16.mxu1 %v1690_v14 }
  0xb9   :  { %687 = vmatmul.mubr.bf16.gmra.mxu0 %v1692_v15  ;;  %815 = vmatmul.mubr.bf16.gmra.mxu1 %v1693_v16 }
 0x101   :  { %v568_v18 = vpop.f32.mrf.mxu0  ;;  %v696_v19 = vpop.f32.mrf.mxu1 }
 0x102   :  { %v569_v20 = vadd.f32 %v1990_v17, %v568_v18  ;;  %v697_v21 = vadd.f32 %v1990_v17, %v696_v19 }
 0x103   :  { %v570_v22 = vpop.f32.mrf.mxu0  ;;  %v698_v23 = vpop.f32.mrf.mxu1 }
 0x104   :  { %vm823_vm0 = vcmp.gt.f32.partialorder %v569_v20, 0.0  ;;  %v887_v24 = vmul.f32 0.2, %v569_v20  ;;  %vm855_vm1 = vcmp.gt.f32.partialorder %v697_v21, 0.0  ;;  %v919_v25 = vmul.f32 0.2, %v697_v21 }
 0x105   :  { %v571_v26 = vpop.f32.mrf.mxu0  ;;  %v699_v27 = vpop.f32.mrf.mxu1 }
 0x106   :  { %v951_v28 = vsel %vm823_vm0, %v569_v20, %v887_v24  ;;  %v983_v29 = vsel %vm855_vm1, %v697_v21, %v919_v25  ;;  %v572_v30 = vadd.f32 %v1990_v17, %v571_v26  ;;  %v700_v31 = vadd.f32 %v1990_v17, %v699_v27 }
 0x107   :  { %v1485_v32 = vpack.c.bf16 %v951_v28, %v951_v28  ;;  %v1517_v33 = vpack.c.bf16 %v983_v29, %v983_v29  ;;  %v573_v34 = vpop.f32.mrf.mxu0  ;;  %v701_v35 = vpop.f32.mrf.mxu1 }
 0x108   :  { %vm824_vm3 = vcmp.gt.f32.partialorder %v572_v30, 0.0  ;;  %v888_v36 = vmul.f32 0.2, %v572_v30  ;;  %vm856_vm4 = vcmp.gt.f32.partialorder %v700_v31, 0.0  ;;  %v920_v37 = vmul.f32 0.2, %v700_v31 }
 0x109   :  { %1272 = vst.msk [vmem:[%s2315_s3] sm:$0xf] %vm1271_vm2, %v1485_v32  ;;  %1304 = vst.msk [vmem:[%s2315_s3 + $0x80] sm:$0xf] %vm1271_vm2, %v1517_v33  ;;  %v576_v38 = vpop.f32.mrf.mxu0  ;;  %v704_v39 = vpop.f32.mrf.mxu1 }
 0x10a   :  { %v952_v40 = vsel %vm824_vm3, %v572_v30, %v888_v36  ;;  %v984_v41 = vsel %vm856_vm4, %v700_v31, %v920_v37  ;;  %v577_v42 = vadd.f32 %v1990_v17, %v576_v38  ;;  %v705_v43 = vadd.f32 %v1990_v17, %v704_v39 }
 0x10b   :  { %v1486_v44 = vpack.c.bf16 %v952_v40, %v952_v40  ;;  %v1518_v45 = vpack.c.bf16 %v984_v41, %v984_v41  ;;  %v578_v46 = vpop.f32.mrf.mxu0  ;;  %v706_v47 = vpop.f32.mrf.mxu1 }
 0x10c   :  { %vm825_vm5 = vcmp.gt.f32.partialorder %v577_v42, 0.0  ;;  %v889_v48 = vmul.f32 0.2, %v577_v42  ;;  %vm857_vm6 = vcmp.gt.f32.partialorder %v705_v43, 0.0  ;;  %v921_v49 = vmul.f32 0.2, %v705_v43 }
 0x10d   :  { %1273 = vst.msk [vmem:[%s2315_s3 + $0x4] sm:$0xf] %vm1271_vm2, %v1486_v44  ;;  %1305 = vst.msk [vmem:[%s2315_s3 + $0x84] sm:$0xf] %vm1271_vm2, %v1518_v45  ;;  %v579_v50 = vpop.f32.mrf.mxu0  ;;  %v707_v51 = vpop.f32.mrf.mxu1 }
 0x10e   :  { %v953_v52 = vsel %vm825_vm5, %v577_v42, %v889_v48  ;;  %v985_v53 = vsel %vm857_vm6, %v705_v43, %v921_v49  ;;  %v580_v54 = vadd.f32 %v1990_v17, %v579_v50  ;;  %v708_v55 = vadd.f32 %v1990_v17, %v707_v51 }
 0x10f   :  { %v1487_v56 = vpack.c.bf16 %v953_v52, %v953_v52  ;;  %v1519_v57 = vpack.c.bf16 %v985_v53, %v985_v53  ;;  %v581_v58 = vpop.f32.mrf.mxu0  ;;  %v709_v59 = vpop.f32.mrf.mxu1 }
 0x110   :  { %vm826_vm7 = vcmp.gt.f32.partialorder %v580_v54, 0.0  ;;  %v890_v60 = vmul.f32 0.2, %v580_v54  ;;  %vm858_vm8 = vcmp.gt.f32.partialorder %v708_v55, 0.0  ;;  %v922_v61 = vmul.f32 0.2, %v708_v55 }
 0x111   :  { %1274 = vst.msk [vmem:[%s2315_s3 + $0x8] sm:$0xf] %vm1271_vm2, %v1487_v56  ;;  %1306 = vst.msk [vmem:[%s2315_s3 + $0x88] sm:$0xf] %vm1271_vm2, %v1519_v57  ;;  %v584_v62 = vpop.f32.mrf.mxu0  ;;  %v712_v63 = vpop.f32.mrf.mxu1 }
 0x112   :  { %v954_v0 = vsel %vm826_vm7, %v580_v54, %v890_v60  ;;  %v986_v1 = vsel %vm858_vm8, %v708_v55, %v922_v61  ;;  %v585_v2 = vadd.f32 %v1990_v17, %v584_v62  ;;  %v713_v3 = vadd.f32 %v1990_v17, %v712_v63 }
 0x113   :  { %v1488_v4 = vpack.c.bf16 %v954_v0, %v954_v0  ;;  %v1520_v5 = vpack.c.bf16 %v986_v1, %v986_v1  ;;  %v586_v6 = vpop.f32.mrf.mxu0  ;;  %v714_v7 = vpop.f32.mrf.mxu1 }
 0x114   :  { %vm827_vm9 = vcmp.gt.f32.partialorder %v585_v2, 0.0  ;;  %v891_v8 = vmul.f32 0.2, %v585_v2  ;;  %vm859_vm10 = vcmp.gt.f32.partialorder %v713_v3, 0.0  ;;  %v923_v9 = vmul.f32 0.2, %v713_v3 }
 0x115   :  { %1275 = vst.msk [vmem:[%s2315_s3 + $0xc] sm:$0xf] %vm1271_vm2, %v1488_v4  ;;  %1307 = vst.msk [vmem:[%s2315_s3 + $0x8c] sm:$0xf] %vm1271_vm2, %v1520_v5  ;;  %v587_v10 = vpop.f32.mrf.mxu0  ;;  %v715_v11 = vpop.f32.mrf.mxu1 }
 0x116   :  { %v955_v12 = vsel %vm827_vm9, %v585_v2, %v891_v8  ;;  %v987_v13 = vsel %vm859_vm10, %v713_v3, %v923_v9  ;;  %v588_v14 = vadd.f32 %v1990_v17, %v587_v10  ;;  %v716_v15 = vadd.f32 %v1990_v17, %v715_v11 }
 0x117   :  { %v1489_v16 = vpack.c.bf16 %v955_v12, %v955_v12  ;;  %v1521_v18 = vpack.c.bf16 %v987_v13, %v987_v13  ;;  %v589_v19 = vpop.f32.mrf.mxu0  ;;  %v717_v20 = vpop.f32.mrf.mxu1 }
 0x118   :  { %vm828_vm11 = vcmp.gt.f32.partialorder %v588_v14, 0.0  ;;  %v892_v21 = vmul.f32 0.2, %v588_v14  ;;  %vm860_vm12 = vcmp.gt.f32.partialorder %v716_v15, 0.0  ;;  %v924_v22 = vmul.f32 0.2, %v716_v15 }
 0x119   :  { %1276 = vst.msk [vmem:[%s2315_s3 + $0x10] sm:$0xf] %vm1271_vm2, %v1489_v16  ;;  %1308 = vst.msk [vmem:[%s2315_s3 + $0x90] sm:$0xf] %vm1271_vm2, %v1521_v18  ;;  %v592_v23 = vpop.f32.mrf.mxu0  ;;  %v720_v24 = vpop.f32.mrf.mxu1 }
 0x11a   :  { %v956_v25 = vsel %vm828_vm11, %v588_v14, %v892_v21  ;;  %v988_v26 = vsel %vm860_vm12, %v716_v15, %v924_v22  ;;  %v593_v27 = vadd.f32 %v1990_v17, %v592_v23  ;;  %v721_v28 = vadd.f32 %v1990_v17, %v720_v24 }
 0x11b   :  { %v1490_v29 = vpack.c.bf16 %v956_v25, %v956_v25  ;;  %v1522_v30 = vpack.c.bf16 %v988_v26, %v988_v26  ;;  %v594_v31 = vpop.f32.mrf.mxu0  ;;  %v722_v32 = vpop.f32.mrf.mxu1 }
 0x11c   :  { %vm829_vm13 = vcmp.gt.f32.partialorder %v593_v27, 0.0  ;;  %v893_v33 = vmul.f32 0.2, %v593_v27  ;;  %vm861_vm14 = vcmp.gt.f32.partialorder %v721_v28, 0.0  ;;  %v925_v34 = vmul.f32 0.2, %v721_v28 }
 0x11d   :  { %1277 = vst.msk [vmem:[%s2315_s3 + $0x14] sm:$0xf] %vm1271_vm2, %v1490_v29  ;;  %1309 = vst.msk [vmem:[%s2315_s3 + $0x94] sm:$0xf] %vm1271_vm2, %v1522_v30  ;;  %v595_v35 = vpop.f32.mrf.mxu0  ;;  %v723_v36 = vpop.f32.mrf.mxu1 }
 0x11e   :  { %v957_v37 = vsel %vm829_vm13, %v593_v27, %v893_v33  ;;  %v989_v38 = vsel %vm861_vm14, %v721_v28, %v925_v34  ;;  %v596_v39 = vadd.f32 %v1990_v17, %v595_v35  ;;  %v724_v40 = vadd.f32 %v1990_v17, %v723_v36 }
 0x11f   :  { %v1491_v41 = vpack.c.bf16 %v957_v37, %v957_v37  ;;  %v1523_v42 = vpack.c.bf16 %v989_v38, %v989_v38  ;;  %v597_v43 = vpop.f32.mrf.mxu0  ;;  %v725_v44 = vpop.f32.mrf.mxu1 }
 0x120   :  { %vm830_vm15 = vcmp.gt.f32.partialorder %v596_v39, 0.0  ;;  %v894_v45 = vmul.f32 0.2, %v596_v39  ;;  %vm862_vm0 = vcmp.gt.f32.partialorder %v724_v40, 0.0  ;;  %v926_v46 = vmul.f32 0.2, %v724_v40 }
 0x121   :  { %1278 = vst.msk [vmem:[%s2315_s3 + $0x18] sm:$0xf] %vm1271_vm2, %v1491_v41  ;;  %1310 = vst.msk [vmem:[%s2315_s3 + $0x98] sm:$0xf] %vm1271_vm2, %v1523_v42  ;;  %v600_v47 = vpop.f32.mrf.mxu0  ;;  %v728_v48 = vpop.f32.mrf.mxu1 }
 0x122   :  { %v958_v49 = vsel %vm830_vm15, %v596_v39, %v894_v45  ;;  %v990_v50 = vsel %vm862_vm0, %v724_v40, %v926_v46  ;;  %v601_v51 = vadd.f32 %v1990_v17, %v600_v47  ;;  %v729_v52 = vadd.f32 %v1990_v17, %v728_v48 }
 0x123   :  { %v1492_v53 = vpack.c.bf16 %v958_v49, %v958_v49  ;;  %v1524_v54 = vpack.c.bf16 %v990_v50, %v990_v50  ;;  %v602_v55 = vpop.f32.mrf.mxu0  ;;  %v730_v56 = vpop.f32.mrf.mxu1 }
 0x124   :  { %vm831_vm1 = vcmp.gt.f32.partialorder %v601_v51, 0.0  ;;  %v895_v57 = vmul.f32 0.2, %v601_v51  ;;  %vm863_vm3 = vcmp.gt.f32.partialorder %v729_v52, 0.0  ;;  %v927_v58 = vmul.f32 0.2, %v729_v52 }
 0x125   :  { %1279 = vst.msk [vmem:[%s2315_s3 + $0x1c] sm:$0xf] %vm1271_vm2, %v1492_v53  ;;  %1311 = vst.msk [vmem:[%s2315_s3 + $0x9c] sm:$0xf] %vm1271_vm2, %v1524_v54  ;;  %v603_v59 = vpop.f32.mrf.mxu0  ;;  %v731_v60 = vpop.f32.mrf.mxu1 }
 0x126   :  { %v959_v61 = vsel %vm831_vm1, %v601_v51, %v895_v57  ;;  %v991_v62 = vsel %vm863_vm3, %v729_v52, %v927_v58  ;;  %v604_v63 = vadd.f32 %v1990_v17, %v603_v59  ;;  %v732_v0 = vadd.f32 %v1990_v17, %v731_v60 }
 0x127   :  { %v1493_v1 = vpack.c.bf16 %v959_v61, %v959_v61  ;;  %v1525_v2 = vpack.c.bf16 %v991_v62, %v991_v62  ;;  %v605_v3 = vpop.f32.mrf.mxu0  ;;  %v733_v4 = vpop.f32.mrf.mxu1 }
 0x128   :  { %vm832_vm4 = vcmp.gt.f32.partialorder %v604_v63, 0.0  ;;  %v896_v5 = vmul.f32 0.2, %v604_v63  ;;  %vm864_vm5 = vcmp.gt.f32.partialorder %v732_v0, 0.0  ;;  %v928_v6 = vmul.f32 0.2, %v732_v0 }
 0x129   :  { %1280 = vst.msk [vmem:[%s2315_s3 + $0x20] sm:$0xf] %vm1271_vm2, %v1493_v1  ;;  %1312 = vst.msk [vmem:[%s2315_s3 + $0xa0] sm:$0xf] %vm1271_vm2, %v1525_v2  ;;  %v608_v7 = vpop.f32.mrf.mxu0  ;;  %v736_v8 = vpop.f32.mrf.mxu1 }
 0x12a   :  { %v960_v9 = vsel %vm832_vm4, %v604_v63, %v896_v5  ;;  %v992_v10 = vsel %vm864_vm5, %v732_v0, %v928_v6  ;;  %v609_v11 = vadd.f32 %v1990_v17, %v608_v7  ;;  %v737_v12 = vadd.f32 %v1990_v17, %v736_v8 }
 0x12b   :  { %v1494_v13 = vpack.c.bf16 %v960_v9, %v960_v9  ;;  %v1526_v14 = vpack.c.bf16 %v992_v10, %v992_v10  ;;  %v610_v15 = vpop.f32.mrf.mxu0  ;;  %v738_v16 = vpop.f32.mrf.mxu1 }
 0x12c   :  { %vm833_vm6 = vcmp.gt.f32.partialorder %v609_v11, 0.0  ;;  %v897_v18 = vmul.f32 0.2, %v609_v11  ;;  %vm865_vm7 = vcmp.gt.f32.partialorder %v737_v12, 0.0  ;;  %v929_v19 = vmul.f32 0.2, %v737_v12 }
 0x12d   :  { %1281 = vst.msk [vmem:[%s2315_s3 + $0x24] sm:$0xf] %vm1271_vm2, %v1494_v13  ;;  %1313 = vst.msk [vmem:[%s2315_s3 + $0xa4] sm:$0xf] %vm1271_vm2, %v1526_v14  ;;  %v611_v20 = vpop.f32.mrf.mxu0  ;;  %v739_v21 = vpop.f32.mrf.mxu1 }
 0x12e   :  { %v961_v22 = vsel %vm833_vm6, %v609_v11, %v897_v18  ;;  %v993_v23 = vsel %vm865_vm7, %v737_v12, %v929_v19  ;;  %v612_v24 = vadd.f32 %v1990_v17, %v611_v20  ;;  %v740_v25 = vadd.f32 %v1990_v17, %v739_v21 }
 0x12f   :  { %v1495_v26 = vpack.c.bf16 %v961_v22, %v961_v22  ;;  %v1527_v27 = vpack.c.bf16 %v993_v23, %v993_v23  ;;  %v613_v28 = vpop.f32.mrf.mxu0  ;;  %v741_v29 = vpop.f32.mrf.mxu1 }
 0x130   :  { %vm834_vm8 = vcmp.gt.f32.partialorder %v612_v24, 0.0  ;;  %v898_v30 = vmul.f32 0.2, %v612_v24  ;;  %vm866_vm9 = vcmp.gt.f32.partialorder %v740_v25, 0.0  ;;  %v930_v31 = vmul.f32 0.2, %v740_v25 }
 0x131   :  { %1282 = vst.msk [vmem:[%s2315_s3 + $0x28] sm:$0xf] %vm1271_vm2, %v1495_v26  ;;  %1314 = vst.msk [vmem:[%s2315_s3 + $0xa8] sm:$0xf] %vm1271_vm2, %v1527_v27  ;;  %v616_v32 = vpop.f32.mrf.mxu0  ;;  %v744_v33 = vpop.f32.mrf.mxu1 }
 0x132   :  { %v962_v34 = vsel %vm834_vm8, %v612_v24, %v898_v30  ;;  %v994_v35 = vsel %vm866_vm9, %v740_v25, %v930_v31  ;;  %v617_v36 = vadd.f32 %v1990_v17, %v616_v32  ;;  %v745_v37 = vadd.f32 %v1990_v17, %v744_v33 }
 0x133   :  { %v1496_v38 = vpack.c.bf16 %v962_v34, %v962_v34  ;;  %v1528_v39 = vpack.c.bf16 %v994_v35, %v994_v35  ;;  %v618_v40 = vpop.f32.mrf.mxu0  ;;  %v746_v41 = vpop.f32.mrf.mxu1 }
 0x134   :  { %vm835_vm10 = vcmp.gt.f32.partialorder %v617_v36, 0.0  ;;  %v899_v42 = vmul.f32 0.2, %v617_v36  ;;  %vm867_vm11 = vcmp.gt.f32.partialorder %v745_v37, 0.0  ;;  %v931_v43 = vmul.f32 0.2, %v745_v37 }
 0x135   :  { %1283 = vst.msk [vmem:[%s2315_s3 + $0x2c] sm:$0xf] %vm1271_vm2, %v1496_v38  ;;  %1315 = vst.msk [vmem:[%s2315_s3 + $0xac] sm:$0xf] %vm1271_vm2, %v1528_v39  ;;  %v619_v44 = vpop.f32.mrf.mxu0  ;;  %v747_v45 = vpop.f32.mrf.mxu1 }
 0x136   :  { %v963_v46 = vsel %vm835_vm10, %v617_v36, %v899_v42  ;;  %v995_v47 = vsel %vm867_vm11, %v745_v37, %v931_v43  ;;  %v620_v48 = vadd.f32 %v1990_v17, %v619_v44  ;;  %v748_v49 = vadd.f32 %v1990_v17, %v747_v45 }
 0x137   :  { %v1497_v50 = vpack.c.bf16 %v963_v46, %v963_v46  ;;  %v1529_v51 = vpack.c.bf16 %v995_v47, %v995_v47  ;;  %v621_v52 = vpop.f32.mrf.mxu0  ;;  %v749_v53 = vpop.f32.mrf.mxu1 }
 0x138   :  { %vm836_vm12 = vcmp.gt.f32.partialorder %v620_v48, 0.0  ;;  %v900_v54 = vmul.f32 0.2, %v620_v48  ;;  %vm868_vm13 = vcmp.gt.f32.partialorder %v748_v49, 0.0  ;;  %v932_v55 = vmul.f32 0.2, %v748_v49 }
 0x139   :  { %1284 = vst.msk [vmem:[%s2315_s3 + $0x30] sm:$0xf] %vm1271_vm2, %v1497_v50  ;;  %1316 = vst.msk [vmem:[%s2315_s3 + $0xb0] sm:$0xf] %vm1271_vm2, %v1529_v51  ;;  %v624_v56 = vpop.f32.mrf.mxu0  ;;  %v752_v57 = vpop.f32.mrf.mxu1 }
 0x13a   :  { %v964_v58 = vsel %vm836_vm12, %v620_v48, %v900_v54  ;;  %v996_v59 = vsel %vm868_vm13, %v748_v49, %v932_v55  ;;  %v625_v60 = vadd.f32 %v1990_v17, %v624_v56  ;;  %v753_v61 = vadd.f32 %v1990_v17, %v752_v57 }
 0x13b   :  { %v1498_v62 = vpack.c.bf16 %v964_v58, %v964_v58  ;;  %v1530_v63 = vpack.c.bf16 %v996_v59, %v996_v59  ;;  %v626_v0 = vpop.f32.mrf.mxu0  ;;  %v754_v1 = vpop.f32.mrf.mxu1 }
 0x13c   :  { %vm837_vm14 = vcmp.gt.f32.partialorder %v625_v60, 0.0  ;;  %v901_v2 = vmul.f32 0.2, %v625_v60  ;;  %vm869_vm15 = vcmp.gt.f32.partialorder %v753_v61, 0.0  ;;  %v933_v3 = vmul.f32 0.2, %v753_v61 }
 0x13d   :  { %1285 = vst.msk [vmem:[%s2315_s3 + $0x34] sm:$0xf] %vm1271_vm2, %v1498_v62  ;;  %1317 = vst.msk [vmem:[%s2315_s3 + $0xb4] sm:$0xf] %vm1271_vm2, %v1530_v63  ;;  %v627_v4 = vpop.f32.mrf.mxu0  ;;  %v755_v5 = vpop.f32.mrf.mxu1 }
 0x13e   :  { %v965_v6 = vsel %vm837_vm14, %v625_v60, %v901_v2  ;;  %v997_v7 = vsel %vm869_vm15, %v753_v61, %v933_v3  ;;  %v628_v8 = vadd.f32 %v1990_v17, %v627_v4  ;;  %v756_v9 = vadd.f32 %v1990_v17, %v755_v5 }
 0x13f   :  { %v1499_v10 = vpack.c.bf16 %v965_v6, %v965_v6  ;;  %v1531_v11 = vpack.c.bf16 %v997_v7, %v997_v7  ;;  %v629_v12 = vpop.f32.mrf.mxu0  ;;  %v757_v13 = vpop.f32.mrf.mxu1 }
 0x140   :  { %vm838_vm0 = vcmp.gt.f32.partialorder %v628_v8, 0.0  ;;  %v902_v14 = vmul.f32 0.2, %v628_v8  ;;  %vm870_vm1 = vcmp.gt.f32.partialorder %v756_v9, 0.0  ;;  %v934_v15 = vmul.f32 0.2, %v756_v9 }
 0x141   :  { %1286 = vst.msk [vmem:[%s2315_s3 + $0x38] sm:$0xf] %vm1271_vm2, %v1499_v10  ;;  %1318 = vst.msk [vmem:[%s2315_s3 + $0xb8] sm:$0xf] %vm1271_vm2, %v1531_v11  ;;  %v632_v16 = vpop.f32.mrf.mxu0  ;;  %v760_v18 = vpop.f32.mrf.mxu1 }
 0x142   :  { %v966_v19 = vsel %vm838_vm0, %v628_v8, %v902_v14  ;;  %v998_v20 = vsel %vm870_vm1, %v756_v9, %v934_v15  ;;  %v633_v21 = vadd.f32 %v1990_v17, %v632_v16  ;;  %v761_v22 = vadd.f32 %v1990_v17, %v760_v18 }
 0x143   :  { %v1500_v23 = vpack.c.bf16 %v966_v19, %v966_v19  ;;  %v1532_v24 = vpack.c.bf16 %v998_v20, %v998_v20  ;;  %v634_v25 = vpop.f32.mrf.mxu0  ;;  %v762_v26 = vpop.f32.mrf.mxu1 }
 0x144   :  { %vm839_vm3 = vcmp.gt.f32.partialorder %v633_v21, 0.0  ;;  %v903_v27 = vmul.f32 0.2, %v633_v21  ;;  %vm871_vm4 = vcmp.gt.f32.partialorder %v761_v22, 0.0  ;;  %v935_v28 = vmul.f32 0.2, %v761_v22 }
 0x145   :  { %1287 = vst.msk [vmem:[%s2315_s3 + $0x3c] sm:$0xf] %vm1271_vm2, %v1500_v23  ;;  %1319 = vst.msk [vmem:[%s2315_s3 + $0xbc] sm:$0xf] %vm1271_vm2, %v1532_v24  ;;  %v635_v29 = vpop.f32.mrf.mxu0  ;;  %v763_v30 = vpop.f32.mrf.mxu1 }
 0x146   :  { %v967_v31 = vsel %vm839_vm3, %v633_v21, %v903_v27  ;;  %v999_v32 = vsel %vm871_vm4, %v761_v22, %v935_v28  ;;  %v636_v33 = vadd.f32 %v1990_v17, %v635_v29  ;;  %v764_v34 = vadd.f32 %v1990_v17, %v763_v30 }
 0x147   :  { %v1501_v35 = vpack.c.bf16 %v967_v31, %v967_v31  ;;  %v1533_v36 = vpack.c.bf16 %v999_v32, %v999_v32  ;;  %v637_v37 = vpop.f32.mrf.mxu0  ;;  %v765_v38 = vpop.f32.mrf.mxu1 }
 0x148   :  { %vm840_vm5 = vcmp.gt.f32.partialorder %v636_v33, 0.0  ;;  %v904_v39 = vmul.f32 0.2, %v636_v33  ;;  %vm872_vm6 = vcmp.gt.f32.partialorder %v764_v34, 0.0  ;;  %v936_v40 = vmul.f32 0.2, %v764_v34 }
 0x149   :  { %1288 = vst.msk [vmem:[%s2315_s3 + $0x40] sm:$0xf] %vm1271_vm2, %v1501_v35  ;;  %1320 = vst.msk [vmem:[%s2315_s3 + $0xc0] sm:$0xf] %vm1271_vm2, %v1533_v36  ;;  %v640_v41 = vpop.f32.mrf.mxu0  ;;  %v768_v42 = vpop.f32.mrf.mxu1 }
 0x14a   :  { %v968_v43 = vsel %vm840_vm5, %v636_v33, %v904_v39  ;;  %v1000_v44 = vsel %vm872_vm6, %v764_v34, %v936_v40  ;;  %v641_v45 = vadd.f32 %v1990_v17, %v640_v41  ;;  %v769_v46 = vadd.f32 %v1990_v17, %v768_v42 }
 0x14b   :  { %v1502_v47 = vpack.c.bf16 %v968_v43, %v968_v43  ;;  %v1534_v48 = vpack.c.bf16 %v1000_v44, %v1000_v44  ;;  %v642_v49 = vpop.f32.mrf.mxu0  ;;  %v770_v50 = vpop.f32.mrf.mxu1 }
 0x14c   :  { %vm841_vm7 = vcmp.gt.f32.partialorder %v641_v45, 0.0  ;;  %v905_v51 = vmul.f32 0.2, %v641_v45  ;;  %vm873_vm8 = vcmp.gt.f32.partialorder %v769_v46, 0.0  ;;  %v937_v52 = vmul.f32 0.2, %v769_v46 }
 0x14d   :  { %1289 = vst.msk [vmem:[%s2315_s3 + $0x44] sm:$0xf] %vm1271_vm2, %v1502_v47  ;;  %1321 = vst.msk [vmem:[%s2315_s3 + $0xc4] sm:$0xf] %vm1271_vm2, %v1534_v48  ;;  %v643_v53 = vpop.f32.mrf.mxu0  ;;  %v771_v54 = vpop.f32.mrf.mxu1 }
 0x14e   :  { %v969_v55 = vsel %vm841_vm7, %v641_v45, %v905_v51  ;;  %v1001_v56 = vsel %vm873_vm8, %v769_v46, %v937_v52  ;;  %v644_v57 = vadd.f32 %v1990_v17, %v643_v53  ;;  %v772_v58 = vadd.f32 %v1990_v17, %v771_v54 }
 0x14f   :  { %v1503_v59 = vpack.c.bf16 %v969_v55, %v969_v55  ;;  %v1535_v60 = vpack.c.bf16 %v1001_v56, %v1001_v56  ;;  %v645_v61 = vpop.f32.mrf.mxu0  ;;  %v773_v62 = vpop.f32.mrf.mxu1 }
 0x150   :  { %vm842_vm9 = vcmp.gt.f32.partialorder %v644_v57, 0.0  ;;  %v906_v63 = vmul.f32 0.2, %v644_v57  ;;  %vm874_vm10 = vcmp.gt.f32.partialorder %v772_v58, 0.0  ;;  %v938_v0 = vmul.f32 0.2, %v772_v58 }
 0x151   :  { %1290 = vst.msk [vmem:[%s2315_s3 + $0x48] sm:$0xf] %vm1271_vm2, %v1503_v59  ;;  %1322 = vst.msk [vmem:[%s2315_s3 + $0xc8] sm:$0xf] %vm1271_vm2, %v1535_v60  ;;  %v648_v1 = vpop.f32.mrf.mxu0  ;;  %v776_v2 = vpop.f32.mrf.mxu1 }
 0x152   :  { %v970_v3 = vsel %vm842_vm9, %v644_v57, %v906_v63  ;;  %v1002_v4 = vsel %vm874_vm10, %v772_v58, %v938_v0  ;;  %v649_v5 = vadd.f32 %v1990_v17, %v648_v1  ;;  %v777_v6 = vadd.f32 %v1990_v17, %v776_v2 }
 0x153   :  { %v1504_v7 = vpack.c.bf16 %v970_v3, %v970_v3  ;;  %v1536_v8 = vpack.c.bf16 %v1002_v4, %v1002_v4  ;;  %v650_v9 = vpop.f32.mrf.mxu0  ;;  %v778_v10 = vpop.f32.mrf.mxu1 }
 0x154   :  { %vm843_vm11 = vcmp.gt.f32.partialorder %v649_v5, 0.0  ;;  %v907_v11 = vmul.f32 0.2, %v649_v5  ;;  %vm875_vm12 = vcmp.gt.f32.partialorder %v777_v6, 0.0  ;;  %v939_v12 = vmul.f32 0.2, %v777_v6 }
 0x155   :  { %1291 = vst.msk [vmem:[%s2315_s3 + $0x4c] sm:$0xf] %vm1271_vm2, %v1504_v7  ;;  %1323 = vst.msk [vmem:[%s2315_s3 + $0xcc] sm:$0xf] %vm1271_vm2, %v1536_v8  ;;  %v651_v13 = vpop.f32.mrf.mxu0  ;;  %v779_v14 = vpop.f32.mrf.mxu1 }
 0x156   :  { %v971_v15 = vsel %vm843_vm11, %v649_v5, %v907_v11  ;;  %v1003_v16 = vsel %vm875_vm12, %v777_v6, %v939_v12  ;;  %v652_v18 = vadd.f32 %v1990_v17, %v651_v13  ;;  %v780_v19 = vadd.f32 %v1990_v17, %v779_v14 }
 0x157   :  { %v1505_v20 = vpack.c.bf16 %v971_v15, %v971_v15  ;;  %v1537_v21 = vpack.c.bf16 %v1003_v16, %v1003_v16  ;;  %v653_v22 = vpop.f32.mrf.mxu0  ;;  %v781_v23 = vpop.f32.mrf.mxu1 }
 0x158   :  { %vm844_vm13 = vcmp.gt.f32.partialorder %v652_v18, 0.0  ;;  %v908_v24 = vmul.f32 0.2, %v652_v18  ;;  %vm876_vm14 = vcmp.gt.f32.partialorder %v780_v19, 0.0  ;;  %v940_v25 = vmul.f32 0.2, %v780_v19 }
 0x159   :  { %1292 = vst.msk [vmem:[%s2315_s3 + $0x50] sm:$0xf] %vm1271_vm2, %v1505_v20  ;;  %1324 = vst.msk [vmem:[%s2315_s3 + $0xd0] sm:$0xf] %vm1271_vm2, %v1537_v21  ;;  %v656_v26 = vpop.f32.mrf.mxu0  ;;  %v784_v27 = vpop.f32.mrf.mxu1 }
 0x15a   :  { %v972_v28 = vsel %vm844_vm13, %v652_v18, %v908_v24  ;;  %v1004_v29 = vsel %vm876_vm14, %v780_v19, %v940_v25  ;;  %v657_v30 = vadd.f32 %v1990_v17, %v656_v26  ;;  %v785_v31 = vadd.f32 %v1990_v17, %v784_v27 }
 0x15b   :  { %v1506_v32 = vpack.c.bf16 %v972_v28, %v972_v28  ;;  %v1538_v33 = vpack.c.bf16 %v1004_v29, %v1004_v29  ;;  %v658_v34 = vpop.f32.mrf.mxu0  ;;  %v786_v35 = vpop.f32.mrf.mxu1 }
 0x15c   :  { %vm845_vm15 = vcmp.gt.f32.partialorder %v657_v30, 0.0  ;;  %v909_v36 = vmul.f32 0.2, %v657_v30  ;;  %vm877_vm0 = vcmp.gt.f32.partialorder %v785_v31, 0.0  ;;  %v941_v37 = vmul.f32 0.2, %v785_v31 }
 0x15d   :  { %1293 = vst.msk [vmem:[%s2315_s3 + $0x54] sm:$0xf] %vm1271_vm2, %v1506_v32  ;;  %1325 = vst.msk [vmem:[%s2315_s3 + $0xd4] sm:$0xf] %vm1271_vm2, %v1538_v33  ;;  %v659_v38 = vpop.f32.mrf.mxu0  ;;  %v787_v39 = vpop.f32.mrf.mxu1 }
 0x15e   :  { %v973_v40 = vsel %vm845_vm15, %v657_v30, %v909_v36  ;;  %v1005_v41 = vsel %vm877_vm0, %v785_v31, %v941_v37  ;;  %v660_v42 = vadd.f32 %v1990_v17, %v659_v38  ;;  %v788_v43 = vadd.f32 %v1990_v17, %v787_v39 }
 0x15f   :  { %v1507_v44 = vpack.c.bf16 %v973_v40, %v973_v40  ;;  %v1539_v45 = vpack.c.bf16 %v1005_v41, %v1005_v41  ;;  %v661_v46 = vpop.f32.mrf.mxu0  ;;  %v789_v47 = vpop.f32.mrf.mxu1 }
 0x160   :  { %vm846_vm1 = vcmp.gt.f32.partialorder %v660_v42, 0.0  ;;  %v910_v48 = vmul.f32 0.2, %v660_v42  ;;  %vm878_vm3 = vcmp.gt.f32.partialorder %v788_v43, 0.0  ;;  %v942_v49 = vmul.f32 0.2, %v788_v43 }
 0x161   :  { %1294 = vst.msk [vmem:[%s2315_s3 + $0x58] sm:$0xf] %vm1271_vm2, %v1507_v44  ;;  %1326 = vst.msk [vmem:[%s2315_s3 + $0xd8] sm:$0xf] %vm1271_vm2, %v1539_v45  ;;  %v664_v50 = vpop.f32.mrf.mxu0  ;;  %v792_v51 = vpop.f32.mrf.mxu1 }
 0x162   :  { %v974_v52 = vsel %vm846_vm1, %v660_v42, %v910_v48  ;;  %v1006_v53 = vsel %vm878_vm3, %v788_v43, %v942_v49  ;;  %v665_v54 = vadd.f32 %v1990_v17, %v664_v50  ;;  %v793_v55 = vadd.f32 %v1990_v17, %v792_v51 }
 0x163   :  { %v1508_v56 = vpack.c.bf16 %v974_v52, %v974_v52  ;;  %v1540_v57 = vpack.c.bf16 %v1006_v53, %v1006_v53  ;;  %v666_v58 = vpop.f32.mrf.mxu0  ;;  %v794_v59 = vpop.f32.mrf.mxu1 }
 0x164   :  { %vm847_vm4 = vcmp.gt.f32.partialorder %v665_v54, 0.0  ;;  %v911_v60 = vmul.f32 0.2, %v665_v54  ;;  %vm879_vm5 = vcmp.gt.f32.partialorder %v793_v55, 0.0  ;;  %v943_v61 = vmul.f32 0.2, %v793_v55 }
 0x165   :  { %1295 = vst.msk [vmem:[%s2315_s3 + $0x5c] sm:$0xf] %vm1271_vm2, %v1508_v56  ;;  %1327 = vst.msk [vmem:[%s2315_s3 + $0xdc] sm:$0xf] %vm1271_vm2, %v1540_v57  ;;  %v667_v62 = vpop.f32.mrf.mxu0  ;;  %v795_v63 = vpop.f32.mrf.mxu1 }
 0x166   :  { %v975_v0 = vsel %vm847_vm4, %v665_v54, %v911_v60  ;;  %v1007_v1 = vsel %vm879_vm5, %v793_v55, %v943_v61  ;;  %v668_v2 = vadd.f32 %v1990_v17, %v667_v62  ;;  %v796_v3 = vadd.f32 %v1990_v17, %v795_v63 }
 0x167   :  { %v1509_v4 = vpack.c.bf16 %v975_v0, %v975_v0  ;;  %v1541_v5 = vpack.c.bf16 %v1007_v1, %v1007_v1  ;;  %v669_v6 = vpop.f32.mrf.mxu0  ;;  %v797_v7 = vpop.f32.mrf.mxu1 }
 0x168   :  { %vm848_vm6 = vcmp.gt.f32.partialorder %v668_v2, 0.0  ;;  %v912_v8 = vmul.f32 0.2, %v668_v2  ;;  %vm880_vm7 = vcmp.gt.f32.partialorder %v796_v3, 0.0  ;;  %v944_v9 = vmul.f32 0.2, %v796_v3 }
 0x169   :  { %1296 = vst.msk [vmem:[%s2315_s3 + $0x60] sm:$0xf] %vm1271_vm2, %v1509_v4  ;;  %1328 = vst.msk [vmem:[%s2315_s3 + $0xe0] sm:$0xf] %vm1271_vm2, %v1541_v5  ;;  %v672_v10 = vpop.f32.mrf.mxu0  ;;  %v800_v11 = vpop.f32.mrf.mxu1 }
 0x16a   :  { %v976_v12 = vsel %vm848_vm6, %v668_v2, %v912_v8  ;;  %v1008_v13 = vsel %vm880_vm7, %v796_v3, %v944_v9  ;;  %v673_v14 = vadd.f32 %v1990_v17, %v672_v10  ;;  %v801_v15 = vadd.f32 %v1990_v17, %v800_v11 }
 0x16b   :  { %v1510_v16 = vpack.c.bf16 %v976_v12, %v976_v12  ;;  %v1542_v18 = vpack.c.bf16 %v1008_v13, %v1008_v13  ;;  %v674_v19 = vpop.f32.mrf.mxu0  ;;  %v802_v20 = vpop.f32.mrf.mxu1 }
 0x16c   :  { %vm849_vm8 = vcmp.gt.f32.partialorder %v673_v14, 0.0  ;;  %v913_v21 = vmul.f32 0.2, %v673_v14  ;;  %vm881_vm9 = vcmp.gt.f32.partialorder %v801_v15, 0.0  ;;  %v945_v22 = vmul.f32 0.2, %v801_v15 }
 0x16d   :  { %1297 = vst.msk [vmem:[%s2315_s3 + $0x64] sm:$0xf] %vm1271_vm2, %v1510_v16  ;;  %1329 = vst.msk [vmem:[%s2315_s3 + $0xe4] sm:$0xf] %vm1271_vm2, %v1542_v18  ;;  %v675_v23 = vpop.f32.mrf.mxu0  ;;  %v803_v24 = vpop.f32.mrf.mxu1 }
 0x16e   :  { %v977_v25 = vsel %vm849_vm8, %v673_v14, %v913_v21  ;;  %v1009_v26 = vsel %vm881_vm9, %v801_v15, %v945_v22  ;;  %v676_v27 = vadd.f32 %v1990_v17, %v675_v23  ;;  %v804_v28 = vadd.f32 %v1990_v17, %v803_v24 }
 0x16f   :  { %v1511_v29 = vpack.c.bf16 %v977_v25, %v977_v25  ;;  %v1543_v30 = vpack.c.bf16 %v1009_v26, %v1009_v26  ;;  %v677_v31 = vpop.f32.mrf.mxu0  ;;  %v805_v32 = vpop.f32.mrf.mxu1 }
 0x170   :  { %vm850_vm10 = vcmp.gt.f32.partialorder %v676_v27, 0.0  ;;  %v914_v33 = vmul.f32 0.2, %v676_v27  ;;  %vm882_vm11 = vcmp.gt.f32.partialorder %v804_v28, 0.0  ;;  %v946_v34 = vmul.f32 0.2, %v804_v28 }
 0x171   :  { %1298 = vst.msk [vmem:[%s2315_s3 + $0x68] sm:$0xf] %vm1271_vm2, %v1511_v29  ;;  %1330 = vst.msk [vmem:[%s2315_s3 + $0xe8] sm:$0xf] %vm1271_vm2, %v1543_v30  ;;  %v680_v35 = vpop.f32.mrf.mxu0  ;;  %v808_v36 = vpop.f32.mrf.mxu1 }
 0x172   :  { %v978_v37 = vsel %vm850_vm10, %v676_v27, %v914_v33  ;;  %v1010_v38 = vsel %vm882_vm11, %v804_v28, %v946_v34  ;;  %v681_v39 = vadd.f32 %v1990_v17, %v680_v35  ;;  %v809_v40 = vadd.f32 %v1990_v17, %v808_v36 }
 0x173   :  { %v1512_v41 = vpack.c.bf16 %v978_v37, %v978_v37  ;;  %v1544_v42 = vpack.c.bf16 %v1010_v38, %v1010_v38  ;;  %v682_v43 = vpop.f32.mrf.mxu0  ;;  %v810_v44 = vpop.f32.mrf.mxu1 }
 0x174   :  { %vm851_vm12 = vcmp.gt.f32.partialorder %v681_v39, 0.0  ;;  %v915_v45 = vmul.f32 0.2, %v681_v39  ;;  %vm883_vm13 = vcmp.gt.f32.partialorder %v809_v40, 0.0  ;;  %v947_v46 = vmul.f32 0.2, %v809_v40 }
 0x175   :  { %1299 = vst.msk [vmem:[%s2315_s3 + $0x6c] sm:$0xf] %vm1271_vm2, %v1512_v41  ;;  %1331 = vst.msk [vmem:[%s2315_s3 + $0xec] sm:$0xf] %vm1271_vm2, %v1544_v42  ;;  %v683_v47 = vpop.f32.mrf.mxu0  ;;  %v811_v48 = vpop.f32.mrf.mxu1 }
 0x176   :  { %v979_v49 = vsel %vm851_vm12, %v681_v39, %v915_v45  ;;  %v1011_v50 = vsel %vm883_vm13, %v809_v40, %v947_v46  ;;  %v684_v51 = vadd.f32 %v1990_v17, %v683_v47  ;;  %v812_v52 = vadd.f32 %v1990_v17, %v811_v48 }
 0x177   :  { %v1513_v53 = vpack.c.bf16 %v979_v49, %v979_v49  ;;  %v1545_v54 = vpack.c.bf16 %v1011_v50, %v1011_v50  ;;  %v685_v55 = vpop.f32.mrf.mxu0  ;;  %v813_v56 = vpop.f32.mrf.mxu1 }
 0x178   :  { %vm852_vm14 = vcmp.gt.f32.partialorder %v684_v51, 0.0  ;;  %v916_v57 = vmul.f32 0.2, %v684_v51  ;;  %vm884_vm15 = vcmp.gt.f32.partialorder %v812_v52, 0.0  ;;  %v948_v58 = vmul.f32 0.2, %v812_v52 }
 0x179   :  { %1300 = vst.msk [vmem:[%s2315_s3 + $0x70] sm:$0xf] %vm1271_vm2, %v1513_v53  ;;  %1332 = vst.msk [vmem:[%s2315_s3 + $0xf0] sm:$0xf] %vm1271_vm2, %v1545_v54  ;;  %v688_v59 = vpop.f32.mrf.mxu0  ;;  %v816_v60 = vpop.f32.mrf.mxu1 }
 0x17a   :  { %v980_v61 = vsel %vm852_vm14, %v684_v51, %v916_v57  ;;  %v1012_v62 = vsel %vm884_vm15, %v812_v52, %v948_v58  ;;  %v689_v63 = vadd.f32 %v1990_v17, %v688_v59  ;;  %v817_v0 = vadd.f32 %v1990_v17, %v816_v60 }
 0x17b   :  { %v1514_v1 = vpack.c.bf16 %v980_v61, %v980_v61  ;;  %v1546_v2 = vpack.c.bf16 %v1012_v62, %v1012_v62  ;;  %v690_v3 = vpop.f32.mrf.mxu0  ;;  %v818_v4 = vpop.f32.mrf.mxu1 }
 0x17c   :  { %vm853_vm0 = vcmp.gt.f32.partialorder %v689_v63, 0.0  ;;  %v917_v5 = vmul.f32 0.2, %v689_v63  ;;  %vm885_vm1 = vcmp.gt.f32.partialorder %v817_v0, 0.0  ;;  %v949_v6 = vmul.f32 0.2, %v817_v0 }
 0x17d   :  { %1301 = vst.msk [vmem:[%s2315_s3 + $0x74] sm:$0xf] %vm1271_vm2, %v1514_v1  ;;  %1333 = vst.msk [vmem:[%s2315_s3 + $0xf4] sm:$0xf] %vm1271_vm2, %v1546_v2  ;;  %v691_v7 = vpop.f32.mrf.mxu0  ;;  %v819_v8 = vpop.f32.mrf.mxu1 }
 0x17e   :  { %v981_v9 = vsel %vm853_vm0, %v689_v63, %v917_v5  ;;  %v1013_v10 = vsel %vm885_vm1, %v817_v0, %v949_v6  ;;  %v692_v11 = vadd.f32 %v1990_v17, %v691_v7  ;;  %v820_v12 = vadd.f32 %v1990_v17, %v819_v8 }
 0x17f   :  { %v1515_v13 = vpack.c.bf16 %v981_v9, %v981_v9  ;;  %v1547_v14 = vpack.c.bf16 %v1013_v10, %v1013_v10  ;;  %v693_v15 = vpop.f32.mrf.mxu0  ;;  %v821_v16 = vpop.f32.mrf.mxu1 }
 0x180   :  { %vm854_vm3 = vcmp.gt.f32.partialorder %v692_v11, 0.0  ;;  %v918_v18 = vmul.f32 0.2, %v692_v11  ;;  %vm886_vm4 = vcmp.gt.f32.partialorder %v820_v12, 0.0  ;;  %v950_v19 = vmul.f32 0.2, %v820_v12 }
 0x181   :  { %1302 = vst.msk [vmem:[%s2315_s3 + $0x78] sm:$0xf] %vm1271_vm2, %v1515_v13  ;;  %1334 = vst.msk [vmem:[%s2315_s3 + $0xf8] sm:$0xf] %vm1271_vm2, %v1547_v14 }
 0x182   :  { %v982_v20 = vsel %vm854_vm3, %v692_v11, %v918_v18  ;;  %v1014_v17 = vsel %vm886_vm4, %v820_v12, %v950_v19 }
 0x183   :  { %v1516_v21 = vpack.c.bf16 %v982_v20, %v982_v20  ;;  %v1548_v22 = vpack.c.bf16 %v1014_v17, %v1014_v17 }
 0x185   :  { %1303 = vst.msk [vmem:[%s2315_s3 + $0x7c] sm:$0xf] %vm1271_vm2, %v1516_v21  ;;  %1335 = vst.msk [vmem:[%s2315_s3 + $0xfc] sm:$0xf] %vm1271_vm2, %v1548_v22 }

// kernel: _lambda_.8
= control target key start
LH: loop header
LB: loop body
LE: loop exit
PB: predicated region body
PF: predicated region fallthrough
CT: control target
= control target key end

     0   :  { %vm776_vm1 = vcmask 519168   ;;  %s1399_s1 = inlined_call_operand.vmem [shape: bf16[512,64], index: 1, kind: input, shape index: {}]   ;;  %s1400_s0 = inlined_call_operand.vmem [shape: bf16[128,512], index: 0, kind: input, shape index: {}]   ;;  %s1401_s2 = inlined_call_operand.vmem [shape: f32[1,64], index: 2, kind: input, shape index: {}]   ;;  %s1402_s3 = inlined_call_operand.vmem [shape: bf16[128,64], index: 3, kind: output, shape index: {}]  }
   0x1   :  { %v1022_v0 = vld [vmem:[%s1399_s1 + $0x78] sm:$0xff]   ;;  %v1026_v4 = vld [vmem:[%s1399_s1 + $0x70] sm:$0xff]   ;;  %v1030_v8 = vld [vmem:[%s1399_s1 + $0x68] sm:$0xff]  }
   0x2   :  { %v1023_v1 = vld [vmem:[%s1399_s1 + $0xf8] sm:$0xff]   ;;  %894 = vmatprep.subr.bf16.mxu0 %v1022_v0  ;;  %v1027_v5 = vld [vmem:[%s1399_s1 + $0xf0] sm:$0xff]   ;;  %v1031_v9 = vld [vmem:[%s1399_s1 + $0xe8] sm:$0xff]  }
   0x3   :  { %v1024_v2 = vld [vmem:[%s1399_s1 + $0x38] sm:$0xff]   ;;  %958 = vmatprep.subr.bf16.mxu1 %v1023_v1  ;;  %v1028_v6 = vld [vmem:[%s1399_s1 + $0x30] sm:$0xff]   ;;  %v1032_v10 = vld [vmem:[%s1399_s1 + $0x28] sm:$0xff]  }
   0x4   :  { %v1025_v3 = vld [vmem:[%s1399_s1 + $0xb8] sm:$0xff]   ;;  %895 = vmatpush3.bf16.msra.mxu0 %v1024_v2  ;;  %v1029_v7 = vld [vmem:[%s1399_s1 + $0xb0] sm:$0xff]   ;;  %v1033_v11 = vld [vmem:[%s1399_s1 + $0xa8] sm:$0xff]  }
   0x5   :  { %959 = vmatpush3.bf16.msra.mxu1 %v1025_v3  ;;  %896 = vmatprep.subr.bf16.mxu0 %v1026_v4  ;;  %v1034_v12 = vld [vmem:[%s1399_s1 + $0x60] sm:$0xff]   ;;  %v1038_v16 = vld [vmem:[%s1399_s1 + $0x58] sm:$0xff]   ;;  %v1042_v20 = vld [vmem:[%s1399_s1 + $0x50] sm:$0xff]  }
   0x6   :  { %960 = vmatprep.subr.bf16.mxu1 %v1027_v5  ;;  %v1035_v13 = vld [vmem:[%s1399_s1 + $0xe0] sm:$0xff]   ;;  %v1039_v17 = vld [vmem:[%s1399_s1 + $0xd8] sm:$0xff]   ;;  %v1043_v21 = vld [vmem:[%s1399_s1 + $0xd0] sm:$0xff]  }
   0x7   :  { %v1036_v14 = vld [vmem:[%s1399_s1 + $0x20] sm:$0xff]   ;;  %v1040_v18 = vld [vmem:[%s1399_s1 + $0x18] sm:$0xff]   ;;  %v1044_v22 = vld [vmem:[%s1399_s1 + $0x10] sm:$0xff]  }
   0x8   :  { %897 = vmatpush3.bf16.msra.mxu0 %v1028_v6  ;;  %v1037_v15 = vld [vmem:[%s1399_s1 + $0xa0] sm:$0xff]   ;;  %v1041_v19 = vld [vmem:[%s1399_s1 + $0x98] sm:$0xff]   ;;  %v1045_v23 = vld [vmem:[%s1399_s1 + $0x90] sm:$0xff]  }
   0x9   :  { %961 = vmatpush3.bf16.msra.mxu1 %v1029_v7  ;;  %898 = vmatprep.subr.bf16.mxu0 %v1030_v8  ;;  %v1046_v24 = vld [vmem:[%s1399_s1 + $0x48] sm:$0xff]   ;;  %v1050_v28 = vld [vmem:[%s1399_s1 + $0x40] sm:$0xff]  }
   0xa   :  { %962 = vmatprep.subr.bf16.mxu1 %v1031_v9  ;;  %v1047_v25 = vld [vmem:[%s1399_s1 + $0xc8] sm:$0xff]   ;;  %v1051_v29 = vld [vmem:[%s1399_s1 + $0xc0] sm:$0xff]  }
   0xb   :  { %v1048_v26 = vld [vmem:[%s1399_s1 + $0x8] sm:$0xff]   ;;  %v1052_v30 = vld [vmem:[%s1399_s1] sm:$0xff]  }
   0xc   :  { %899 = vmatpush3.bf16.msra.mxu0 %v1032_v10  ;;  %v1049_v27 = vld [vmem:[%s1399_s1 + $0x88] sm:$0xff]   ;;  %v1053_v31 = vld [vmem:[%s1399_s1 + $0x80] sm:$0xff]  }
   0xd   :  { %963 = vmatpush3.bf16.msra.mxu1 %v1033_v11  ;;  %900 = vmatprep.subr.bf16.mxu0 %v1034_v12  ;;  %v1054_v32 = vld [vmem:[%s1400_s0] ss:$16 sps:$4 sm:$0xff]   ;;  %v1056_v33 = vld [vmem:[%s1400_s0 + $0x4] ss:$16 sps:$4 sm:$0xff]   ;;  %v1057_v34 = vld [vmem:[%s1400_s0 + $0x8] ss:$16 sps:$4 sm:$0xff]  }
   0xe   :  { %964 = vmatprep.subr.bf16.mxu1 %v1035_v13  ;;  %v1059_v35 = vld [vmem:[%s1400_s0 + $0xc] ss:$16 sps:$4 sm:$0xff]   ;;  %502 = vmatprep.mubr.bf16.mxu0 %v1056_v33  ;;  %v1060_v36 = vld [vmem:[%s1400_s0 + $0x24] ss:$16 sps:$4 sm:$0xff]   ;;  %v1064_v38 = vld [vmem:[%s1400_s0 + $0x20] ss:$16 sps:$4 sm:$0xff]  }
   0xf   :  { %599 = vmatprep.mubr.bf16.mxu1 %v1059_v35  ;;  %v1062_v37 = vld [vmem:[%s1400_s0 + $0x2c] ss:$16 sps:$4 sm:$0xff]   ;;  %v1065_v39 = vld [vmem:[%s1400_s0 + $0x28] ss:$16 sps:$4 sm:$0xff]   ;;  %v1066_v40 = vld [vmem:[%s1400_s0 + $0x44] ss:$16 sps:$4 sm:$0xff]  }
  0x10   :  { %901 = vmatpush3.bf16.msra.mxu0 %v1036_v14  ;;  %v1068_v41 = vld [vmem:[%s1400_s0 + $0x4c] ss:$16 sps:$4 sm:$0xff]   ;;  %v1070_v42 = vld [vmem:[%s1400_s0 + $0x40] ss:$16 sps:$4 sm:$0xff]   ;;  %v1071_v43 = vld [vmem:[%s1400_s0 + $0x48] ss:$16 sps:$4 sm:$0xff]  }
  0x11   :  { %965 = vmatpush3.bf16.msra.mxu1 %v1037_v15  ;;  %902 = vmatprep.subr.bf16.mxu0 %v1038_v16  ;;  %v1072_v44 = vld [vmem:[%s1400_s0 + $0x64] ss:$16 sps:$4 sm:$0xff]   ;;  %v1074_v45 = vld [vmem:[%s1400_s0 + $0x6c] ss:$16 sps:$4 sm:$0xff]   ;;  %v1076_v46 = vld [vmem:[%s1400_s0 + $0x60] ss:$16 sps:$4 sm:$0xff]  }
  0x12   :  { %966 = vmatprep.subr.bf16.mxu1 %v1039_v17  ;;  %v1077_v47 = vld [vmem:[%s1400_s0 + $0x68] ss:$16 sps:$4 sm:$0xff]   ;;  %v1078_v48 = vld [vmem:[%s1400_s0 + $0x84] ss:$16 sps:$4 sm:$0xff]   ;;  %v1080_v49 = vld [vmem:[%s1400_s0 + $0x8c] ss:$16 sps:$4 sm:$0xff]  }
  0x13   :  { %v1082_v50 = vld [vmem:[%s1400_s0 + $0x80] ss:$16 sps:$4 sm:$0xff]   ;;  %v1083_v51 = vld [vmem:[%s1400_s0 + $0x88] ss:$16 sps:$4 sm:$0xff]   ;;  %v1084_v52 = vld [vmem:[%s1400_s0 + $0xa4] ss:$16 sps:$4 sm:$0xff]  }
  0x14   :  { %903 = vmatpush3.bf16.msra.mxu0 %v1040_v18  ;;  %v1086_v53 = vld [vmem:[%s1400_s0 + $0xac] ss:$16 sps:$4 sm:$0xff]   ;;  %v1088_v54 = vld [vmem:[%s1400_s0 + $0xa0] ss:$16 sps:$4 sm:$0xff]   ;;  %v1089_v55 = vld [vmem:[%s1400_s0 + $0xa8] ss:$16 sps:$4 sm:$0xff]  }
  0x15   :  { %967 = vmatpush3.bf16.msra.mxu1 %v1041_v19  ;;  %904 = vmatprep.subr.bf16.mxu0 %v1042_v20  ;;  %v1090_v56 = vld [vmem:[%s1400_s0 + $0xc4] ss:$16 sps:$4 sm:$0xff]   ;;  %v1092_v57 = vld [vmem:[%s1400_s0 + $0xcc] ss:$16 sps:$4 sm:$0xff]   ;;  %v1094_v58 = vld [vmem:[%s1400_s0 + $0xc0] ss:$16 sps:$4 sm:$0xff]  }
  0x16   :  { %968 = vmatprep.subr.bf16.mxu1 %v1043_v21  ;;  %v1095_v59 = vld [vmem:[%s1400_s0 + $0xc8] ss:$16 sps:$4 sm:$0xff]   ;;  %v1096_v60 = vld [vmem:[%s1400_s0 + $0xe4] ss:$16 sps:$4 sm:$0xff]   ;;  %v1098_v61 = vld [vmem:[%s1400_s0 + $0xec] ss:$16 sps:$4 sm:$0xff]  }
  0x17   :  { %v1100_v62 = vld [vmem:[%s1400_s0 + $0xe0] ss:$16 sps:$4 sm:$0xff]   ;;  %v1101_v63 = vld [vmem:[%s1400_s0 + $0xe8] ss:$16 sps:$4 sm:$0xff]  }
  0x18   :  { %905 = vmatpush3.bf16.msra.mxu0 %v1044_v22  ;;  %v1317_v2 = vld [vmem:[%s1401_s2] ss:$0 sm:$0xff] }
  0x19   :  { %969 = vmatpush3.bf16.msra.mxu1 %v1045_v23  ;;  %906 = vmatprep.subr.bf16.mxu0 %v1046_v24 }
  0x1a   :  { %970 = vmatprep.subr.bf16.mxu1 %v1047_v25 }
  0x1c   :  { %907 = vmatpush3.bf16.msra.mxu0 %v1048_v26 }
  0x1d   :  { %971 = vmatpush3.bf16.msra.mxu1 %v1049_v27  ;;  %908 = vmatprep.subr.bf16.mxu0 %v1050_v28 }
  0x1e   :  { %972 = vmatprep.subr.bf16.mxu1 %v1051_v29 }
  0x20   :  { %909 = vmatpush3.bf16.msra.mxu0 %v1052_v30 }
  0x21   :  { %973 = vmatpush3.bf16.msra.mxu1 %v1053_v31 }
  0x23   :  { %503 = vmatmul.mubr.bf16.vlgmr.msra.gmra.mxu0 %v1054_v32 }
  0x24   :  { %600 = vmatmul.mubr.bf16.vlgmr.msra.gmra.mxu1 %v1057_v34  ;;  %510 = vmatprep.mubr.bf16.mxu0 %v1060_v36 }
  0x25   :  { %607 = vmatprep.mubr.bf16.mxu1 %v1062_v37 }
  0x2b   :  { %511 = vmatmul.mubr.bf16.gmra.mxu0 %v1064_v38 }
  0x2c   :  { %608 = vmatmul.mubr.bf16.gmra.mxu1 %v1065_v39  ;;  %518 = vmatprep.mubr.bf16.mxu0 %v1066_v40 }
  0x2d   :  { %615 = vmatprep.mubr.bf16.mxu1 %v1068_v41 }
  0x33   :  { %519 = vmatmul.mubr.bf16.gmra.mxu0 %v1070_v42 }
  0x34   :  { %616 = vmatmul.mubr.bf16.gmra.mxu1 %v1071_v43  ;;  %526 = vmatprep.mubr.bf16.mxu0 %v1072_v44 }
  0x35   :  { %623 = vmatprep.mubr.bf16.mxu1 %v1074_v45 }
  0x3b   :  { %527 = vmatmul.mubr.bf16.gmra.mxu0 %v1076_v46 }
  0x3c   :  { %624 = vmatmul.mubr.bf16.gmra.mxu1 %v1077_v47  ;;  %534 = vmatprep.mubr.bf16.mxu0 %v1078_v48 }
  0x3d   :  { %631 = vmatprep.mubr.bf16.mxu1 %v1080_v49 }
  0x43   :  { %535 = vmatmul.mubr.bf16.gmra.mxu0 %v1082_v50 }
  0x44   :  { %632 = vmatmul.mubr.bf16.gmra.mxu1 %v1083_v51  ;;  %542 = vmatprep.mubr.bf16.mxu0 %v1084_v52 }
  0x45   :  { %639 = vmatprep.mubr.bf16.mxu1 %v1086_v53 }
  0x4b   :  { %543 = vmatmul.mubr.bf16.gmra.mxu0 %v1088_v54 }
  0x4c   :  { %640 = vmatmul.mubr.bf16.gmra.mxu1 %v1089_v55  ;;  %550 = vmatprep.mubr.bf16.mxu0 %v1090_v56 }
  0x4d   :  { %647 = vmatprep.mubr.bf16.mxu1 %v1092_v57 }
  0x53   :  { %551 = vmatmul.mubr.bf16.gmra.mxu0 %v1094_v58 }
  0x54   :  { %648 = vmatmul.mubr.bf16.gmra.mxu1 %v1095_v59  ;;  %558 = vmatprep.mubr.bf16.mxu0 %v1096_v60 }
  0x55   :  { %655 = vmatprep.mubr.bf16.mxu1 %v1098_v61 }
  0x5b   :  { %559 = vmatmul.mubr.bf16.gmra.mxu0 %v1100_v62 }
  0x5c   :  { %656 = vmatmul.mubr.bf16.gmra.mxu1 %v1101_v63 }
  0xe3   :  { %v910_v0 = vpop.f32.mrf.mxu0 }
  0xe4   :  { %v974_v1 = vpop.f32.mrf.mxu1 }
  0xe5   :  { %v911_v3 = vpop.f32.mrf.mxu0 }
  0xe6   :  { %v912_v4 = vadd.f32 %v911_v3, %v910_v0  ;;  %v975_v5 = vpop.f32.mrf.mxu1 }
  0xe7   :  { %v913_v6 = vpop.f32.mrf.mxu0  ;;  %v976_v8 = vadd.f32 %v975_v5, %v974_v1 }
  0xe8   :  { %v505_v7 = vadd.f32 %v912_v4, %v1317_v2  ;;  %v977_v9 = vpop.f32.mrf.mxu1 }
  0xe9   :  { %v914_v10 = vpop.f32.mrf.mxu0 }
  0xea   :  { %v602_v11 = vadd.f32 %v976_v8, %v505_v7  ;;  %v915_v12 = vadd.f32 %v914_v10, %v913_v6  ;;  %v978_v13 = vpop.f32.mrf.mxu1 }
  0xeb   :  { %v916_v14 = vpop.f32.mrf.mxu0  ;;  %v979_v17 = vadd.f32 %v978_v13, %v977_v9 }
  0xec   :  { %vm664_vm0 = vcmp.gt.f32.partialorder %v602_v11, 0.0  ;;  %v680_v15 = vmul.f32 0.2, %v602_v11  ;;  %v508_v16 = vadd.f32 %v915_v12, %v1317_v2  ;;  %v980_v18 = vpop.f32.mrf.mxu1 }
  0xed   :  { %v917_v19 = vpop.f32.mrf.mxu0 }
  0xee   :  { %v696_v20 = vsel %vm664_vm0, %v602_v11, %v680_v15  ;;  %v605_v21 = vadd.f32 %v979_v17, %v508_v16  ;;  %v918_v22 = vadd.f32 %v917_v19, %v916_v14  ;;  %v981_v23 = vpop.f32.mrf.mxu1 }
  0xef   :  { %v878_v24 = vpack.c.bf16 %v696_v20, %v696_v20  ;;  %v919_v25 = vpop.f32.mrf.mxu0  ;;  %v982_v28 = vadd.f32 %v981_v23, %v980_v18 }
  0xf0   :  { %vm665_vm2 = vcmp.gt.f32.partialorder %v605_v21, 0.0  ;;  %v681_v26 = vmul.f32 0.2, %v605_v21  ;;  %v513_v27 = vadd.f32 %v918_v22, %v1317_v2  ;;  %v983_v29 = vpop.f32.mrf.mxu1 }
  0xf1   :  { %777 = vst.msk [vmem:[%s1402_s3] sm:$0xf] %vm776_vm1, %v878_v24  ;;  %v920_v30 = vpop.f32.mrf.mxu0 }
  0xf2   :  { %v697_v31 = vsel %vm665_vm2, %v605_v21, %v681_v26  ;;  %v610_v32 = vadd.f32 %v982_v28, %v513_v27  ;;  %v921_v33 = vadd.f32 %v920_v30, %v919_v25  ;;  %v984_v34 = vpop.f32.mrf.mxu1 }
  0xf3   :  { %v879_v35 = vpack.c.bf16 %v697_v31, %v697_v31  ;;  %v922_v36 = vpop.f32.mrf.mxu0  ;;  %v985_v39 = vadd.f32 %v984_v34, %v983_v29 }
  0xf4   :  { %vm666_vm3 = vcmp.gt.f32.partialorder %v610_v32, 0.0  ;;  %v682_v37 = vmul.f32 0.2, %v610_v32  ;;  %v516_v38 = vadd.f32 %v921_v33, %v1317_v2  ;;  %v986_v40 = vpop.f32.mrf.mxu1 }
  0xf5   :  { %778 = vst.msk [vmem:[%s1402_s3 + $0x4] sm:$0xf] %vm776_vm1, %v879_v35  ;;  %v923_v41 = vpop.f32.mrf.mxu0 }
  0xf6   :  { %v698_v42 = vsel %vm666_vm3, %v610_v32, %v682_v37  ;;  %v613_v43 = vadd.f32 %v985_v39, %v516_v38  ;;  %v924_v44 = vadd.f32 %v923_v41, %v922_v36  ;;  %v987_v45 = vpop.f32.mrf.mxu1 }
  0xf7   :  { %v880_v46 = vpack.c.bf16 %v698_v42, %v698_v42  ;;  %v925_v47 = vpop.f32.mrf.mxu0  ;;  %v988_v50 = vadd.f32 %v987_v45, %v986_v40 }
  0xf8   :  { %vm667_vm4 = vcmp.gt.f32.partialorder %v613_v43, 0.0  ;;  %v683_v48 = vmul.f32 0.2, %v613_v43  ;;  %v521_v49 = vadd.f32 %v924_v44, %v1317_v2  ;;  %v989_v51 = vpop.f32.mrf.mxu1 }
  0xf9   :  { %779 = vst.msk [vmem:[%s1402_s3 + $0x8] sm:$0xf] %vm776_vm1, %v880_v46  ;;  %v926_v52 = vpop.f32.mrf.mxu0 }
  0xfa   :  { %v699_v53 = vsel %vm667_vm4, %v613_v43, %v683_v48  ;;  %v618_v54 = vadd.f32 %v988_v50, %v521_v49  ;;  %v927_v55 = vadd.f32 %v926_v52, %v925_v47  ;;  %v990_v56 = vpop.f32.mrf.mxu1 }
  0xfb   :  { %v881_v57 = vpack.c.bf16 %v699_v53, %v699_v53  ;;  %v928_v58 = vpop.f32.mrf.mxu0  ;;  %v991_v61 = vadd.f32 %v990_v56, %v989_v51 }
  0xfc   :  { %vm668_vm5 = vcmp.gt.f32.partialorder %v618_v54, 0.0  ;;  %v684_v59 = vmul.f32 0.2, %v618_v54  ;;  %v524_v60 = vadd.f32 %v927_v55, %v1317_v2  ;;  %v992_v62 = vpop.f32.mrf.mxu1 }
  0xfd   :  { %780 = vst.msk [vmem:[%s1402_s3 + $0xc] sm:$0xf] %vm776_vm1, %v881_v57  ;;  %v929_v63 = vpop.f32.mrf.mxu0 }
  0xfe   :  { %v700_v0 = vsel %vm668_vm5, %v618_v54, %v684_v59  ;;  %v621_v1 = vadd.f32 %v991_v61, %v524_v60  ;;  %v930_v3 = vadd.f32 %v929_v63, %v928_v58  ;;  %v993_v4 = vpop.f32.mrf.mxu1 }
  0xff   :  { %v882_v5 = vpack.c.bf16 %v700_v0, %v700_v0  ;;  %v931_v6 = vpop.f32.mrf.mxu0  ;;  %v994_v9 = vadd.f32 %v993_v4, %v992_v62 }
 0x100   :  { %vm669_vm6 = vcmp.gt.f32.partialorder %v621_v1, 0.0  ;;  %v685_v7 = vmul.f32 0.2, %v621_v1  ;;  %v529_v8 = vadd.f32 %v930_v3, %v1317_v2  ;;  %v995_v10 = vpop.f32.mrf.mxu1 }
 0x101   :  { %781 = vst.msk [vmem:[%s1402_s3 + $0x10] sm:$0xf] %vm776_vm1, %v882_v5  ;;  %v932_v11 = vpop.f32.mrf.mxu0 }
 0x102   :  { %v701_v12 = vsel %vm669_vm6, %v621_v1, %v685_v7  ;;  %v626_v13 = vadd.f32 %v994_v9, %v529_v8  ;;  %v933_v14 = vadd.f32 %v932_v11, %v931_v6  ;;  %v996_v15 = vpop.f32.mrf.mxu1 }
 0x103   :  { %v883_v16 = vpack.c.bf16 %v701_v12, %v701_v12  ;;  %v934_v17 = vpop.f32.mrf.mxu0  ;;  %v997_v20 = vadd.f32 %v996_v15, %v995_v10 }
 0x104   :  { %vm670_vm7 = vcmp.gt.f32.partialorder %v626_v13, 0.0  ;;  %v686_v18 = vmul.f32 0.2, %v626_v13  ;;  %v532_v19 = vadd.f32 %v933_v14, %v1317_v2  ;;  %v998_v21 = vpop.f32.mrf.mxu1 }
 0x105   :  { %782 = vst.msk [vmem:[%s1402_s3 + $0x14] sm:$0xf] %vm776_vm1, %v883_v16  ;;  %v935_v22 = vpop.f32.mrf.mxu0 }
 0x106   :  { %v702_v23 = vsel %vm670_vm7, %v626_v13, %v686_v18  ;;  %v629_v24 = vadd.f32 %v997_v20, %v532_v19  ;;  %v936_v25 = vadd.f32 %v935_v22, %v934_v17  ;;  %v999_v26 = vpop.f32.mrf.mxu1 }
 0x107   :  { %v884_v27 = vpack.c.bf16 %v702_v23, %v702_v23  ;;  %v937_v28 = vpop.f32.mrf.mxu0  ;;  %v1000_v31 = vadd.f32 %v999_v26, %v998_v21 }
 0x108   :  { %vm671_vm8 = vcmp.gt.f32.partialorder %v629_v24, 0.0  ;;  %v687_v29 = vmul.f32 0.2, %v629_v24  ;;  %v537_v30 = vadd.f32 %v936_v25, %v1317_v2  ;;  %v1001_v32 = vpop.f32.mrf.mxu1 }
 0x109   :  { %783 = vst.msk [vmem:[%s1402_s3 + $0x18] sm:$0xf] %vm776_vm1, %v884_v27  ;;  %v938_v33 = vpop.f32.mrf.mxu0 }
 0x10a   :  { %v703_v34 = vsel %vm671_vm8, %v629_v24, %v687_v29  ;;  %v634_v35 = vadd.f32 %v1000_v31, %v537_v30  ;;  %v939_v36 = vadd.f32 %v938_v33, %v937_v28  ;;  %v1002_v37 = vpop.f32.mrf.mxu1 }
 0x10b   :  { %v885_v38 = vpack.c.bf16 %v703_v34, %v703_v34  ;;  %v940_v39 = vpop.f32.mrf.mxu0  ;;  %v1003_v42 = vadd.f32 %v1002_v37, %v1001_v32 }
 0x10c   :  { %vm672_vm9 = vcmp.gt.f32.partialorder %v634_v35, 0.0  ;;  %v688_v40 = vmul.f32 0.2, %v634_v35  ;;  %v540_v41 = vadd.f32 %v939_v36, %v1317_v2  ;;  %v1004_v43 = vpop.f32.mrf.mxu1 }
 0x10d   :  { %784 = vst.msk [vmem:[%s1402_s3 + $0x1c] sm:$0xf] %vm776_vm1, %v885_v38  ;;  %v941_v44 = vpop.f32.mrf.mxu0 }
 0x10e   :  { %v704_v45 = vsel %vm672_vm9, %v634_v35, %v688_v40  ;;  %v637_v46 = vadd.f32 %v1003_v42, %v540_v41  ;;  %v942_v47 = vadd.f32 %v941_v44, %v940_v39  ;;  %v1005_v48 = vpop.f32.mrf.mxu1 }
 0x10f   :  { %v886_v49 = vpack.c.bf16 %v704_v45, %v704_v45  ;;  %v943_v50 = vpop.f32.mrf.mxu0  ;;  %v1006_v53 = vadd.f32 %v1005_v48, %v1004_v43 }
 0x110   :  { %vm673_vm10 = vcmp.gt.f32.partialorder %v637_v46, 0.0  ;;  %v689_v51 = vmul.f32 0.2, %v637_v46  ;;  %v545_v52 = vadd.f32 %v942_v47, %v1317_v2  ;;  %v1007_v54 = vpop.f32.mrf.mxu1 }
 0x111   :  { %785 = vst.msk [vmem:[%s1402_s3 + $0x20] sm:$0xf] %vm776_vm1, %v886_v49  ;;  %v944_v55 = vpop.f32.mrf.mxu0 }
 0x112   :  { %v705_v56 = vsel %vm673_vm10, %v637_v46, %v689_v51  ;;  %v642_v57 = vadd.f32 %v1006_v53, %v545_v52  ;;  %v945_v58 = vadd.f32 %v944_v55, %v943_v50  ;;  %v1008_v59 = vpop.f32.mrf.mxu1 }
 0x113   :  { %v887_v60 = vpack.c.bf16 %v705_v56, %v705_v56  ;;  %v946_v61 = vpop.f32.mrf.mxu0  ;;  %v1009_v0 = vadd.f32 %v1008_v59, %v1007_v54 }
 0x114   :  { %vm674_vm11 = vcmp.gt.f32.partialorder %v642_v57, 0.0  ;;  %v690_v62 = vmul.f32 0.2, %v642_v57  ;;  %v548_v63 = vadd.f32 %v945_v58, %v1317_v2  ;;  %v1010_v1 = vpop.f32.mrf.mxu1 }
 0x115   :  { %786 = vst.msk [vmem:[%s1402_s3 + $0x24] sm:$0xf] %vm776_vm1, %v887_v60  ;;  %v947_v3 = vpop.f32.mrf.mxu0 }
 0x116   :  { %v706_v4 = vsel %vm674_vm11, %v642_v57, %v690_v62  ;;  %v645_v5 = vadd.f32 %v1009_v0, %v548_v63  ;;  %v948_v6 = vadd.f32 %v947_v3, %v946_v61  ;;  %v1011_v7 = vpop.f32.mrf.mxu1 }
 0x117   :  { %v888_v8 = vpack.c.bf16 %v706_v4, %v706_v4  ;;  %v949_v9 = vpop.f32.mrf.mxu0  ;;  %v1012_v12 = vadd.f32 %v1011_v7, %v1010_v1 }
 0x118   :  { %vm675_vm12 = vcmp.gt.f32.partialorder %v645_v5, 0.0  ;;  %v691_v10 = vmul.f32 0.2, %v645_v5  ;;  %v553_v11 = vadd.f32 %v948_v6, %v1317_v2  ;;  %v1013_v13 = vpop.f32.mrf.mxu1 }
 0x119   :  { %787 = vst.msk [vmem:[%s1402_s3 + $0x28] sm:$0xf] %vm776_vm1, %v888_v8  ;;  %v950_v14 = vpop.f32.mrf.mxu0 }
 0x11a   :  { %v707_v15 = vsel %vm675_vm12, %v645_v5, %v691_v10  ;;  %v650_v16 = vadd.f32 %v1012_v12, %v553_v11  ;;  %v951_v17 = vadd.f32 %v950_v14, %v949_v9  ;;  %v1014_v18 = vpop.f32.mrf.mxu1 }
 0x11b   :  { %v889_v19 = vpack.c.bf16 %v707_v15, %v707_v15  ;;  %v952_v20 = vpop.f32.mrf.mxu0  ;;  %v1015_v23 = vadd.f32 %v1014_v18, %v1013_v13 }
 0x11c   :  { %vm676_vm13 = vcmp.gt.f32.partialorder %v650_v16, 0.0  ;;  %v692_v21 = vmul.f32 0.2, %v650_v16  ;;  %v556_v22 = vadd.f32 %v951_v17, %v1317_v2  ;;  %v1016_v24 = vpop.f32.mrf.mxu1 }
 0x11d   :  { %788 = vst.msk [vmem:[%s1402_s3 + $0x2c] sm:$0xf] %vm776_vm1, %v889_v19  ;;  %v953_v25 = vpop.f32.mrf.mxu0 }
 0x11e   :  { %v708_v26 = vsel %vm676_vm13, %v650_v16, %v692_v21  ;;  %v653_v27 = vadd.f32 %v1015_v23, %v556_v22  ;;  %v954_v28 = vadd.f32 %v953_v25, %v952_v20  ;;  %v1017_v29 = vpop.f32.mrf.mxu1 }
 0x11f   :  { %v890_v30 = vpack.c.bf16 %v708_v26, %v708_v26  ;;  %v955_v31 = vpop.f32.mrf.mxu0  ;;  %v1018_v34 = vadd.f32 %v1017_v29, %v1016_v24 }
 0x120   :  { %vm677_vm14 = vcmp.gt.f32.partialorder %v653_v27, 0.0  ;;  %v693_v32 = vmul.f32 0.2, %v653_v27  ;;  %v561_v33 = vadd.f32 %v954_v28, %v1317_v2  ;;  %v1019_v35 = vpop.f32.mrf.mxu1 }
 0x121   :  { %789 = vst.msk [vmem:[%s1402_s3 + $0x30] sm:$0xf] %vm776_vm1, %v890_v30  ;;  %v956_v36 = vpop.f32.mrf.mxu0 }
 0x122   :  { %v709_v37 = vsel %vm677_vm14, %v653_v27, %v693_v32  ;;  %v658_v38 = vadd.f32 %v1018_v34, %v561_v33  ;;  %v957_v39 = vadd.f32 %v956_v36, %v955_v31  ;;  %v1020_v40 = vpop.f32.mrf.mxu1 }
 0x123   :  { %v891_v41 = vpack.c.bf16 %v709_v37, %v709_v37  ;;  %v1021_v44 = vadd.f32 %v1020_v40, %v1019_v35 }
 0x124   :  { %vm678_vm15 = vcmp.gt.f32.partialorder %v658_v38, 0.0  ;;  %v694_v42 = vmul.f32 0.2, %v658_v38  ;;  %v564_v43 = vadd.f32 %v957_v39, %v1317_v2 }
 0x125   :  { %790 = vst.msk [vmem:[%s1402_s3 + $0x34] sm:$0xf] %vm776_vm1, %v891_v41 }
 0x126   :  { %v710_v45 = vsel %vm678_vm15, %v658_v38, %v694_v42  ;;  %v661_v46 = vadd.f32 %v1021_v44, %v564_v43 }
 0x127   :  { %v892_v47 = vpack.c.bf16 %v710_v45, %v710_v45 }
 0x128   :  { %vm679_vm0 = vcmp.gt.f32.partialorder %v661_v46, 0.0  ;;  %v695_v48 = vmul.f32 0.2, %v661_v46 }
 0x129   :  { %791 = vst.msk [vmem:[%s1402_s3 + $0x38] sm:$0xf] %vm776_vm1, %v892_v47 }
 0x12a   :  { %v711_v49 = vsel %vm679_vm0, %v661_v46, %v695_v48 }
 0x12b   :  { %v893_v50 = vpack.c.bf16 %v711_v49, %v711_v49 }
 0x12d   :  { %792 = vst.msk [vmem:[%s1402_s3 + $0x3c] sm:$0xf] %vm776_vm1, %v893_v50 }

// kernel: _lambda_.9
= control target key start
LH: loop header
LB: loop body
LE: loop exit
PB: predicated region body
PF: predicated region fallthrough
CT: control target
= control target key end

     0   :  { %s1407_s1 = inlined_call_operand.vmem [shape: bf16[1024,128], index: 1, kind: input, shape index: {}]   ;;  %s1408_s0 = inlined_call_operand.vmem [shape: bf16[32,1024], index: 0, kind: input, shape index: {}]   ;;  %s1409_s2 = inlined_call_operand.vmem [shape: f32[1,128], index: 2, kind: input, shape index: {}]   ;;  %s1410_s3 = inlined_call_operand.vmem [shape: bf16[32,128], index: 3, kind: output, shape index: {}]  }
   0x1   :  { %v1074_v0 = vld [vmem:[%s1407_s1 + $0x78] sm:$0xff]   ;;  %v1078_v4 = vld [vmem:[%s1407_s1 + $0x70] sm:$0xff]   ;;  %v1082_v8 = vld [vmem:[%s1407_s1 + $0x68] sm:$0xff]  }
   0x2   :  { %v1075_v1 = vld [vmem:[%s1407_s1 + $0xf8] sm:$0xff]   ;;  %962 = vmatprep.subr.bf16.mxu0 %v1074_v0  ;;  %v1079_v5 = vld [vmem:[%s1407_s1 + $0xf0] sm:$0xff]   ;;  %v1083_v9 = vld [vmem:[%s1407_s1 + $0xe8] sm:$0xff]  }
   0x3   :  { %v1076_v2 = vld [vmem:[%s1407_s1 + $0x38] sm:$0xff]   ;;  %990 = vmatprep.subr.bf16.mxu1 %v1075_v1  ;;  %v1080_v6 = vld [vmem:[%s1407_s1 + $0x30] sm:$0xff]   ;;  %v1084_v10 = vld [vmem:[%s1407_s1 + $0x28] sm:$0xff]  }
   0x4   :  { %v1077_v3 = vld [vmem:[%s1407_s1 + $0xb8] sm:$0xff]   ;;  %963 = vmatpush3.bf16.msra.mxu0 %v1076_v2  ;;  %v1081_v7 = vld [vmem:[%s1407_s1 + $0xb0] sm:$0xff]   ;;  %v1085_v11 = vld [vmem:[%s1407_s1 + $0xa8] sm:$0xff]  }
   0x5   :  { %991 = vmatpush3.bf16.msra.mxu1 %v1077_v3  ;;  %964 = vmatprep.subr.bf16.mxu0 %v1078_v4  ;;  %v1086_v12 = vld [vmem:[%s1407_s1 + $0x60] sm:$0xff]   ;;  %v1090_v16 = vld [vmem:[%s1407_s1 + $0x58] sm:$0xff]   ;;  %v1094_v20 = vld [vmem:[%s1407_s1 + $0x50] sm:$0xff]  }
   0x6   :  { %992 = vmatprep.subr.bf16.mxu1 %v1079_v5  ;;  %v1087_v13 = vld [vmem:[%s1407_s1 + $0xe0] sm:$0xff]   ;;  %v1091_v17 = vld [vmem:[%s1407_s1 + $0xd8] sm:$0xff]   ;;  %v1095_v21 = vld [vmem:[%s1407_s1 + $0xd0] sm:$0xff]  }
   0x7   :  { %v1088_v14 = vld [vmem:[%s1407_s1 + $0x20] sm:$0xff]   ;;  %v1092_v18 = vld [vmem:[%s1407_s1 + $0x18] sm:$0xff]   ;;  %v1096_v22 = vld [vmem:[%s1407_s1 + $0x10] sm:$0xff]  }
   0x8   :  { %965 = vmatpush3.bf16.msra.mxu0 %v1080_v6  ;;  %v1089_v15 = vld [vmem:[%s1407_s1 + $0xa0] sm:$0xff]   ;;  %v1093_v19 = vld [vmem:[%s1407_s1 + $0x98] sm:$0xff]   ;;  %v1097_v23 = vld [vmem:[%s1407_s1 + $0x90] sm:$0xff]  }
   0x9   :  { %993 = vmatpush3.bf16.msra.mxu1 %v1081_v7  ;;  %966 = vmatprep.subr.bf16.mxu0 %v1082_v8  ;;  %v1098_v24 = vld [vmem:[%s1407_s1 + $0x48] sm:$0xff]   ;;  %v1102_v28 = vld [vmem:[%s1407_s1 + $0x40] sm:$0xff]   ;;  %v1106_v40 = vld [vmem:[%s1407_s1 + $0x178] sm:$0xff]  }
   0xa   :  { %994 = vmatprep.subr.bf16.mxu1 %v1083_v9  ;;  %v1099_v25 = vld [vmem:[%s1407_s1 + $0xc8] sm:$0xff]   ;;  %v1103_v29 = vld [vmem:[%s1407_s1 + $0xc0] sm:$0xff]   ;;  %v1107_v41 = vld [vmem:[%s1407_s1 + $0x1f8] sm:$0xff]  }
   0xb   :  { %v1100_v26 = vld [vmem:[%s1407_s1 + $0x8] sm:$0xff]   ;;  %v1104_v30 = vld [vmem:[%s1407_s1] sm:$0xff]   ;;  %v1108_v42 = vld [vmem:[%s1407_s1 + $0x138] sm:$0xff]  }
   0xc   :  { %967 = vmatpush3.bf16.msra.mxu0 %v1084_v10  ;;  %v1101_v27 = vld [vmem:[%s1407_s1 + $0x88] sm:$0xff]   ;;  %v1105_v31 = vld [vmem:[%s1407_s1 + $0x80] sm:$0xff]   ;;  %v1109_v43 = vld [vmem:[%s1407_s1 + $0x1b8] sm:$0xff]  }
   0xd   :  { %995 = vmatpush3.bf16.msra.mxu1 %v1085_v11  ;;  %968 = vmatprep.subr.bf16.mxu0 %v1086_v12  ;;  %v15_v32 = vld [vmem:[%s1408_s0] sm:$0xff]  ;;  %v16_v34 = vld [vmem:[%s1408_s0 + $0x8] sm:$0xff]  ;;  %v1110_v44 = vld [vmem:[%s1407_s1 + $0x170] sm:$0xff]  }
   0xe   :  { %996 = vmatprep.subr.bf16.mxu1 %v1087_v13  ;;  %v19_v33 = vld [vmem:[%s1408_s0 + $0x20] sm:$0xff]  ;;  %v20_v37 = vld [vmem:[%s1408_s0 + $0x28] sm:$0xff]  ;;  %v1111_v45 = vld [vmem:[%s1407_s1 + $0x1f0] sm:$0xff]  }
   0xf   :  { %v863_v35 = vcombine.low %v15_v32, %v19_v33  ;;  %v864_v36 = vcombine.high %v15_v32, %v19_v33  ;;  %v865_v38 = vcombine.low %v16_v34, %v20_v37  ;;  %v866_v39 = vcombine.high %v16_v34, %v20_v37  ;;  %v1112_v46 = vld [vmem:[%s1407_s1 + $0x130] sm:$0xff]   ;;  %v1114_v48 = vld [vmem:[%s1407_s1 + $0x168] sm:$0xff]   ;;  %v1118_v52 = vld [vmem:[%s1407_s1 + $0x160] sm:$0xff]  }
  0x10   :  { %969 = vmatpush3.bf16.msra.mxu0 %v1088_v14  ;;  %v1113_v47 = vld [vmem:[%s1407_s1 + $0x1b0] sm:$0xff]   ;;  %v1115_v49 = vld [vmem:[%s1407_s1 + $0x1e8] sm:$0xff]   ;;  %v1119_v53 = vld [vmem:[%s1407_s1 + $0x1e0] sm:$0xff]  }
  0x11   :  { %997 = vmatpush3.bf16.msra.mxu1 %v1089_v15  ;;  %970 = vmatprep.subr.bf16.mxu0 %v1090_v16  ;;  %v1116_v50 = vld [vmem:[%s1407_s1 + $0x128] sm:$0xff]   ;;  %v1120_v54 = vld [vmem:[%s1407_s1 + $0x120] sm:$0xff]   ;;  %v1122_v56 = vld [vmem:[%s1407_s1 + $0x158] sm:$0xff]  }
  0x12   :  { %998 = vmatprep.subr.bf16.mxu1 %v1091_v17  ;;  %662 = vmatprep.mubr.bf16.mxu0 %v864_v36  ;;  %v1117_v51 = vld [vmem:[%s1407_s1 + $0x1a8] sm:$0xff]   ;;  %v1121_v55 = vld [vmem:[%s1407_s1 + $0x1a0] sm:$0xff]   ;;  %v1123_v57 = vld [vmem:[%s1407_s1 + $0x1d8] sm:$0xff]  }
  0x13   :  { %711 = vmatprep.mubr.bf16.mxu1 %v866_v39  ;;  %v23_v58 = vld [vmem:[%s1408_s0 + $0x40] sm:$0xff]  ;;  %v1124_v61 = vld [vmem:[%s1407_s1 + $0x118] sm:$0xff]   ;;  %v24_v0 = vld [vmem:[%s1408_s0 + $0x48] sm:$0xff] }
  0x14   :  { %971 = vmatpush3.bf16.msra.mxu0 %v1092_v18  ;;  %v27_v59 = vld [vmem:[%s1408_s0 + $0x60] sm:$0xff]  ;;  %v1125_v63 = vld [vmem:[%s1407_s1 + $0x198] sm:$0xff]   ;;  %v28_v1 = vld [vmem:[%s1408_s0 + $0x68] sm:$0xff] }
  0x15   :  { %999 = vmatpush3.bf16.msra.mxu1 %v1093_v19  ;;  %972 = vmatprep.subr.bf16.mxu0 %v1094_v20  ;;  %v872_v60 = vcombine.high %v23_v58, %v27_v59  ;;  %v871_v62 = vcombine.low %v23_v58, %v27_v59  ;;  %v874_v2 = vcombine.high %v24_v0, %v28_v1  ;;  %v1126_v4 = vld [vmem:[%s1407_s1 + $0x150] sm:$0xff]   ;;  %v1130_v8 = vld [vmem:[%s1407_s1 + $0x148] sm:$0xff]   ;;  %v1134_v12 = vld [vmem:[%s1407_s1 + $0x140] sm:$0xff]  }
  0x16   :  { %1000 = vmatprep.subr.bf16.mxu1 %v1095_v21  ;;  %v873_v3 = vcombine.low %v24_v0, %v28_v1  ;;  %v1127_v5 = vld [vmem:[%s1407_s1 + $0x1d0] sm:$0xff]   ;;  %v1131_v9 = vld [vmem:[%s1407_s1 + $0x1c8] sm:$0xff]   ;;  %v1135_v13 = vld [vmem:[%s1407_s1 + $0x1c0] sm:$0xff]  }
  0x17   :  { %v1128_v6 = vld [vmem:[%s1407_s1 + $0x110] sm:$0xff]   ;;  %v1132_v10 = vld [vmem:[%s1407_s1 + $0x108] sm:$0xff]   ;;  %v1136_v14 = vld [vmem:[%s1407_s1 + $0x100] sm:$0xff]  }
  0x18   :  { %973 = vmatpush3.bf16.msra.mxu0 %v1096_v22  ;;  %v1129_v7 = vld [vmem:[%s1407_s1 + $0x190] sm:$0xff]   ;;  %v1133_v11 = vld [vmem:[%s1407_s1 + $0x188] sm:$0xff]   ;;  %v1137_v15 = vld [vmem:[%s1407_s1 + $0x180] sm:$0xff]  }
  0x19   :  { %1001 = vmatpush3.bf16.msra.mxu1 %v1097_v23  ;;  %974 = vmatprep.subr.bf16.mxu0 %v1098_v24  ;;  %v17_v16 = vld [vmem:[%s1408_s0 + $0x10] sm:$0xff]  ;;  %v18_v18 = vld [vmem:[%s1408_s0 + $0x18] sm:$0xff] }
  0x1a   :  { %1002 = vmatprep.subr.bf16.mxu1 %v1099_v25  ;;  %v21_v17 = vld [vmem:[%s1408_s0 + $0x30] sm:$0xff]  ;;  %v22_v19 = vld [vmem:[%s1408_s0 + $0x38] sm:$0xff] }
  0x1b   :  { %v867_v20 = vcombine.low %v17_v16, %v21_v17  ;;  %v868_v21 = vcombine.high %v17_v16, %v21_v17  ;;  %v869_v22 = vcombine.low %v18_v18, %v22_v19  ;;  %v870_v23 = vcombine.high %v18_v18, %v22_v19  ;;  %v25_v24 = vld [vmem:[%s1408_s0 + $0x50] sm:$0xff] }
  0x1c   :  { %975 = vmatpush3.bf16.msra.mxu0 %v1100_v26  ;;  %v29_v25 = vld [vmem:[%s1408_s0 + $0x70] sm:$0xff]  ;;  %v26_v26 = vld [vmem:[%s1408_s0 + $0x58] sm:$0xff] }
  0x1d   :  { %1003 = vmatpush3.bf16.msra.mxu1 %v1101_v27  ;;  %976 = vmatprep.subr.bf16.mxu0 %v1102_v28  ;;  %v876_v27 = vcombine.high %v25_v24, %v29_v25  ;;  %v30_v28 = vld [vmem:[%s1408_s0 + $0x78] sm:$0xff] }
  0x1e   :  { %1004 = vmatprep.subr.bf16.mxu1 %v1103_v29  ;;  %v878_v29 = vcombine.high %v26_v26, %v30_v28 }
  0x20   :  { %977 = vmatpush3.bf16.msra.mxu0 %v1104_v30  ;;  %v875_v30 = vcombine.low %v25_v24, %v29_v25 }
  0x21   :  { %1005 = vmatpush3.bf16.msra.mxu1 %v1105_v31  ;;  %1018 = vmatprep.subr.bf16.mxu0 %v1106_v40  ;;  %v877_v31 = vcombine.low %v26_v26, %v30_v28 }
  0x22   :  { %1046 = vmatprep.subr.bf16.mxu1 %v1107_v41 }
  0x23   :  { %663 = vmatmul.mubr.bf16.vlgmr.msra.gmra.mxu0 %v863_v35 }
  0x24   :  { %712 = vmatmul.mubr.bf16.vlgmr.msra.gmra.mxu1 %v865_v38  ;;  %1019 = vmatpush3.bf16.msra.mxu0 %v1108_v42 }
  0x25   :  { %1047 = vmatpush3.bf16.msra.mxu1 %v1109_v43  ;;  %1020 = vmatprep.subr.bf16.mxu0 %v1110_v44 }
  0x26   :  { %1048 = vmatprep.subr.bf16.mxu1 %v1111_v45  ;;  %670 = vmatprep.mubr.bf16.mxu0 %v872_v60 }
  0x27   :  { %719 = vmatprep.mubr.bf16.mxu1 %v874_v2 }
  0x28   :  { %1021 = vmatpush3.bf16.msra.mxu0 %v1112_v46 }
  0x29   :  { %1049 = vmatpush3.bf16.msra.mxu1 %v1113_v47  ;;  %1022 = vmatprep.subr.bf16.mxu0 %v1114_v48  ;;  %v862_v47 = vld [vmem:[%s1409_s2] ss:$0 sm:$0xff] }
  0x2a   :  { %1050 = vmatprep.subr.bf16.mxu1 %v1115_v49 }
  0x2b   :  { %671 = vmatmul.mubr.bf16.gmra.mxu0 %v871_v62 }
  0x2c   :  { %1023 = vmatpush3.bf16.msra.mxu0 %v1116_v50  ;;  %720 = vmatmul.mubr.bf16.gmra.mxu1 %v873_v3 }
  0x2d   :  { %1051 = vmatpush3.bf16.msra.mxu1 %v1117_v51  ;;  %1024 = vmatprep.subr.bf16.mxu0 %v1118_v52 }
  0x2e   :  { %1052 = vmatprep.subr.bf16.mxu1 %v1119_v53  ;;  %760 = vmatprep.mubr.bf16.mxu0 %v868_v21 }
  0x2f   :  { %809 = vmatprep.mubr.bf16.mxu1 %v870_v23 }
  0x30   :  { %1025 = vmatpush3.bf16.msra.mxu0 %v1120_v54 }
  0x31   :  { %1053 = vmatpush3.bf16.msra.mxu1 %v1121_v55  ;;  %1026 = vmatprep.subr.bf16.mxu0 %v1122_v56 }
  0x32   :  { %1054 = vmatprep.subr.bf16.mxu1 %v1123_v57 }
  0x34   :  { %1027 = vmatpush3.bf16.msra.mxu0 %v1124_v61 }
  0x35   :  { %1055 = vmatpush3.bf16.msra.mxu1 %v1125_v63  ;;  %1028 = vmatprep.subr.bf16.mxu0 %v1126_v4 }
  0x36   :  { %1056 = vmatprep.subr.bf16.mxu1 %v1127_v5 }
  0x38   :  { %1029 = vmatpush3.bf16.msra.mxu0 %v1128_v6 }
  0x39   :  { %1057 = vmatpush3.bf16.msra.mxu1 %v1129_v7  ;;  %1030 = vmatprep.subr.bf16.mxu0 %v1130_v8 }
  0x3a   :  { %1058 = vmatprep.subr.bf16.mxu1 %v1131_v9 }
  0x3c   :  { %1031 = vmatpush3.bf16.msra.mxu0 %v1132_v10 }
  0x3d   :  { %1059 = vmatpush3.bf16.msra.mxu1 %v1133_v11  ;;  %1032 = vmatprep.subr.bf16.mxu0 %v1134_v12 }
  0x3e   :  { %1060 = vmatprep.subr.bf16.mxu1 %v1135_v13 }
  0x40   :  { %1033 = vmatpush3.bf16.msra.mxu0 %v1136_v14 }
  0x41   :  { %1061 = vmatpush3.bf16.msra.mxu1 %v1137_v15 }
  0x43   :  { %761 = vmatmul.mubr.bf16.vlgmr.msra.gmra.mxu0 %v867_v20 }
  0x44   :  { %810 = vmatmul.mubr.bf16.vlgmr.msra.gmra.mxu1 %v869_v22  ;;  %768 = vmatprep.mubr.bf16.mxu0 %v876_v27 }
  0x45   :  { %817 = vmatprep.mubr.bf16.mxu1 %v878_v29 }
  0x4b   :  { %769 = vmatmul.mubr.bf16.gmra.mxu0 %v875_v30 }
  0x4c   :  { %818 = vmatmul.mubr.bf16.gmra.mxu1 %v877_v31 }
  0xe3   :  { %v978_v32 = vpop.f32.mrf.mxu0 }
  0xe4   :  { %v1006_v33 = vpop.f32.mrf.mxu1 }
  0xe5   :  { %v979_v34 = vpop.f32.mrf.mxu0 }
  0xe6   :  { %v1007_v35 = vpop.f32.mrf.mxu1  ;;  %v980_v46 = vadd.f32 %v979_v34, %v978_v32 }
  0xe7   :  { %v981_v36 = vpop.f32.mrf.mxu0  ;;  %v1008_v52 = vadd.f32 %v1007_v35, %v1006_v33 }
  0xe8   :  { %v1009_v37 = vpop.f32.mrf.mxu1  ;;  %v665_v51 = vadd.f32 %v980_v46, %v862_v47 }
  0xe9   :  { %v982_v38 = vpop.f32.mrf.mxu0 }
  0xea   :  { %v1010_v39 = vpop.f32.mrf.mxu1  ;;  %v983_v48 = vadd.f32 %v982_v38, %v981_v36  ;;  %v714_v58 = vadd.f32 %v1008_v52, %v665_v51 }
  0xeb   :  { %v984_v40 = vpop.f32.mrf.mxu0  ;;  %v1011_v61 = vadd.f32 %v1010_v39, %v1009_v37 }
  0xec   :  { %v1012_v41 = vpop.f32.mrf.mxu1  ;;  %v668_v55 = vadd.f32 %v983_v48, %v862_v47 }
  0xed   :  { %v985_v42 = vpop.f32.mrf.mxu0 }
  0xee   :  { %v1013_v43 = vpop.f32.mrf.mxu1  ;;  %v986_v59 = vadd.f32 %v985_v42, %v984_v40  ;;  %v717_v2 = vadd.f32 %v1011_v61, %v668_v55 }
  0xef   :  { %v987_v44 = vpop.f32.mrf.mxu0  ;;  %v1014_v7 = vadd.f32 %v1013_v43, %v1012_v41 }
  0xf0   :  { %v1015_v45 = vpop.f32.mrf.mxu1  ;;  %v673_v6 = vadd.f32 %v986_v59, %v862_v47 }
  0xf1   :  { %v988_v49 = vpop.f32.mrf.mxu0 }
  0xf2   :  { %v1016_v50 = vpop.f32.mrf.mxu1  ;;  %v989_v3 = vadd.f32 %v988_v49, %v987_v44  ;;  %v722_v18 = vadd.f32 %v1014_v7, %v673_v6 }
  0xf3   :  { %v1017_v15 = vadd.f32 %v1016_v50, %v1015_v45 }
  0xf4   :  { %v676_v14 = vadd.f32 %v989_v3, %v862_v47 }
  0xf6   :  { %v725_v27 = vadd.f32 %v1017_v15, %v676_v14 }
 0x103   :  { %v1034_v53 = vpop.f32.mrf.mxu0 }
 0x104   :  { %v1062_v54 = vpop.f32.mrf.mxu1 }
 0x105   :  { %v1035_v56 = vpop.f32.mrf.mxu0 }
 0x106   :  { %v1063_v57 = vpop.f32.mrf.mxu1  ;;  %v1036_v60 = vadd.f32 %v1035_v56, %v1034_v53 }
 0x107   :  { %v1037_v62 = vpop.f32.mrf.mxu0  ;;  %v1064_v1 = vadd.f32 %v1063_v57, %v1062_v54 }
 0x108   :  { %v1065_v63 = vpop.f32.mrf.mxu1  ;;  %v763_v0 = vadd.f32 %v1036_v60, %v714_v58 }
 0x109   :  { %v1038_v4 = vpop.f32.mrf.mxu0 }
 0x10a   :  { %v1066_v5 = vpop.f32.mrf.mxu1  ;;  %v812_v8 = vadd.f32 %v1064_v1, %v763_v0  ;;  %v1039_v9 = vadd.f32 %v1038_v4, %v1037_v62 }
 0x10b   :  { %v1040_v10 = vpop.f32.mrf.mxu0  ;;  %v1067_v13 = vadd.f32 %v1066_v5, %v1065_v63 }
 0x10c   :  { %v1068_v11 = vpop.f32.mrf.mxu1  ;;  %v766_v12 = vadd.f32 %v1039_v9, %v717_v2  ;;  %v830_v19 = vmul.f32 0.2, %v812_v8  ;;  %vm826_vm0 = vcmp.gt.f32.partialorder %v812_v8, 0.0 }
 0x10d   :  { %v1041_v16 = vpop.f32.mrf.mxu0 }
 0x10e   :  { %v1069_v17 = vpop.f32.mrf.mxu1  ;;  %v815_v20 = vadd.f32 %v1067_v13, %v766_v12  ;;  %v1042_v21 = vadd.f32 %v1041_v16, %v1040_v10  ;;  %v834_v30 = vsel %vm826_vm0, %v812_v8, %v830_v19 }
 0x10f   :  { %v1043_v22 = vpop.f32.mrf.mxu0  ;;  %v1070_v26 = vadd.f32 %v1069_v17, %v1068_v11 }
 0x110   :  { %v1071_v23 = vpop.f32.mrf.mxu1  ;;  %vm827_vm1 = vcmp.gt.f32.partialorder %v815_v20, 0.0  ;;  %v831_v24 = vmul.f32 0.2, %v815_v20  ;;  %v771_v25 = vadd.f32 %v1042_v21, %v722_v18 }
 0x111   :  { %v1044_v28 = vpop.f32.mrf.mxu0 }
 0x112   :  { %v1072_v29 = vpop.f32.mrf.mxu1  ;;  %v835_v31 = vsel %vm827_vm1, %v815_v20, %v831_v24  ;;  %v820_v32 = vadd.f32 %v1070_v26, %v771_v25  ;;  %v1045_v33 = vadd.f32 %v1044_v28, %v1043_v22 }
 0x113   :  { %v954_v34 = vpack.c.bf16 %v835_v31, %v834_v30  ;;  %v1073_v36 = vadd.f32 %v1072_v29, %v1071_v23 }
 0x114   :  { %v774_v35 = vadd.f32 %v1045_v33, %v725_v27  ;;  %v832_v37 = vmul.f32 0.2, %v820_v32  ;;  %vm828_vm2 = vcmp.gt.f32.partialorder %v820_v32, 0.0 }
 0x115   :  { %955 = vst [vmem:[%s1410_s3] sm:$0xff] %v954_v34  }
 0x116   :  { %v823_v38 = vadd.f32 %v1073_v36, %v774_v35  ;;  %v836_v40 = vsel %vm828_vm2, %v820_v32, %v832_v37 }
 0x118   :  { %vm829_vm3 = vcmp.gt.f32.partialorder %v823_v38, 0.0  ;;  %v833_v39 = vmul.f32 0.2, %v823_v38 }
 0x11a   :  { %v837_v41 = vsel %vm829_vm3, %v823_v38, %v833_v39 }
 0x11b   :  { %v959_v42 = vpack.c.bf16 %v837_v41, %v836_v40 }
 0x11d   :  { %961 = vst [vmem:[%s1410_s3 + $0x8] sm:$0xff] %v959_v42  }

// kernel: _lambda_.10
= control target key start
LH: loop header
LB: loop body
LE: loop exit
PB: predicated region body
PF: predicated region fallthrough
CT: control target
= control target key end

     0   :  { %s2917_s0 = inlined_call_operand.vmem [shape: bf16[2048,1], index: 0, kind: input, shape index: {}]   ;;  %s2918_s1 = inlined_call_operand.<no memory space> [shape: f32[1,1], index: 1, kind: input, shape index: {}]   ;;  %s2919_s2 = inlined_call_operand.vmem [shape: bf16[2,2048], index: 2, kind: input, shape index: {}]   ;;  %s2920_s3 = inlined_call_operand.<no memory space> [shape: bf16[], index: 3, kind: input, shape index: {}]   ;;  %s2921_s4 = inlined_call_operand.vmem [shape: f32[16,1], index: 4, kind: output, shape index: {}]  }
   0x1   :  { %v9_v0 = vstv %s2920_s3  ;;  %v14_v1 = vstv %s2918_s1 }
   0x2   :  { %v2393_v2 = vunpack.i.l.bf16 %v9_v0  ;;  %15 = vst [vmem:[#allocation7] sm:$0x1] %v14_v1 }
   0x3   :  { %v2224_v3 = vld [vmem:[%s2917_s0 + $0x78] sm:$0xff]   ;;  %v2228_v8 = vld [vmem:[%s2917_s0 + $0x70] sm:$0xff]   ;;  %v2232_v12 = vld [vmem:[%s2917_s0 + $0x68] sm:$0xff]   ;;  %v28_v28 = vlaneseq  ;;  %v2361_v51 = vmov 0.0   ;;  %vm1840_vm1 = vcmask 7168  }
   0x4   :  { %v2400_v4 = vpack.c.bf16 %v2393_v2, %v2393_v2  ;;  %v2225_v5 = vld [vmem:[%s2917_s0 + $0xf8] sm:$0xff]   ;;  %2047 = vmatprep.subr.bf16.mxu0 %v2224_v3  ;;  %v2229_v9 = vld [vmem:[%s2917_s0 + $0xf0] sm:$0xff]   ;;  %v2233_v13 = vld [vmem:[%s2917_s0 + $0xe8] sm:$0xff]  }
   0x5   :  { %v2226_v6 = vld [vmem:[%s2917_s0 + $0x38] sm:$0xff]   ;;  %2069 = vmatprep.subr.bf16.mxu1 %v2225_v5  ;;  %v2230_v10 = vld [vmem:[%s2917_s0 + $0x30] sm:$0xff]   ;;  %v2234_v14 = vld [vmem:[%s2917_s0 + $0x28] sm:$0xff]   ;;  %v2484_v33 = vshrl.u32 %v28_v28, 7 }
   0x6   :  { %2011 = vst [vmem:[#allocation8 + $0x40] sm:$0xff] %v2400_v4   ;;  %v2227_v7 = vld [vmem:[%s2917_s0 + $0xb8] sm:$0xff]   ;;  %2048 = vmatpush3.bf16.msra.mxu0 %v2226_v6  ;;  %v2231_v11 = vld [vmem:[%s2917_s0 + $0xb0] sm:$0xff]   ;;  %v2235_v15 = vld [vmem:[%s2917_s0 + $0xa8] sm:$0xff]  }
   0x7   :  { %2070 = vmatpush3.bf16.msra.mxu1 %v2227_v7  ;;  %2049 = vmatprep.subr.bf16.mxu0 %v2228_v8  ;;  %v2236_v16 = vld [vmem:[%s2917_s0 + $0x60] sm:$0xff]   ;;  %v2240_v20 = vld [vmem:[%s2917_s0 + $0x58] sm:$0xff]   ;;  %v2244_v24 = vld [vmem:[%s2917_s0 + $0x50] sm:$0xff]   ;;  %vm31_vm0 = vcmp.lt.s32.totalorder %v2484_v33, 2 }
   0x8   :  { %2071 = vmatprep.subr.bf16.mxu1 %v2229_v9  ;;  %v2237_v17 = vld [vmem:[%s2917_s0 + $0xe0] sm:$0xff]   ;;  %v2241_v21 = vld [vmem:[%s2917_s0 + $0xd8] sm:$0xff]   ;;  %v2245_v25 = vld [vmem:[%s2917_s0 + $0xd0] sm:$0xff]  }
   0x9   :  { %v2238_v18 = vld [vmem:[%s2917_s0 + $0x20] sm:$0xff]   ;;  %v2242_v22 = vld [vmem:[%s2917_s0 + $0x18] sm:$0xff]   ;;  %v2246_v26 = vld [vmem:[%s2917_s0 + $0x10] sm:$0xff]  }
   0xa   :  { %2050 = vmatpush3.bf16.msra.mxu0 %v2230_v10  ;;  %v2239_v19 = vld [vmem:[%s2917_s0 + $0xa0] sm:$0xff]   ;;  %v2243_v23 = vld [vmem:[%s2917_s0 + $0x98] sm:$0xff]   ;;  %v2247_v27 = vld [vmem:[%s2917_s0 + $0x90] sm:$0xff]  }
   0xb   :  { %2072 = vmatpush3.bf16.msra.mxu1 %v2231_v11  ;;  %2051 = vmatprep.subr.bf16.mxu0 %v2232_v12  ;;  %v2248_v29 = vld [vmem:[%s2917_s0 + $0x48] sm:$0xff]   ;;  %v2252_v34 = vld [vmem:[%s2917_s0 + $0x40] sm:$0xff]   ;;  %v2256_v46 = vld [vmem:[%s2917_s0 + $0x178] sm:$0xff]  }
   0xc   :  { %2073 = vmatprep.subr.bf16.mxu1 %v2233_v13  ;;  %v2249_v30 = vld [vmem:[%s2917_s0 + $0xc8] sm:$0xff]   ;;  %v2253_v35 = vld [vmem:[%s2917_s0 + $0xc0] sm:$0xff]   ;;  %v2257_v50 = vld [vmem:[%s2917_s0 + $0x1f8] sm:$0xff]  }
   0xd   :  { %v2250_v31 = vld [vmem:[%s2917_s0 + $0x8] sm:$0xff]   ;;  %v2254_v36 = vld [vmem:[%s2917_s0] sm:$0xff]   ;;  %v2258_v57 = vld [vmem:[%s2917_s0 + $0x138] sm:$0xff]  }
   0xe   :  { %2052 = vmatpush3.bf16.msra.mxu0 %v2234_v14  ;;  %v2251_v32 = vld [vmem:[%s2917_s0 + $0x88] sm:$0xff]   ;;  %v2255_v37 = vld [vmem:[%s2917_s0 + $0x80] sm:$0xff]   ;;  %v2259_v59 = vld [vmem:[%s2917_s0 + $0x1b8] sm:$0xff]  }
   0xf   :  { %2074 = vmatpush3.bf16.msra.mxu1 %v2235_v15  ;;  %2053 = vmatprep.subr.bf16.mxu0 %v2236_v16  ;;  %v25_v38 = vld [vmem:[%s2919_s2] sm:$0x1]  ;;  %v1847_v39 = vld [vmem:[%s2919_s2 + $0x1] sm:$0x1]  ;;  %v1848_v40 = vld [vmem:[%s2919_s2 + $0x2] sm:$0x1] }
  0x10   :  { %2075 = vmatprep.subr.bf16.mxu1 %v2237_v17  ;;  %v26_v41 = vunpack.c.l.bf16 %v25_v38  ;;  %v42_v42 = vunpack.c.l.bf16 %v1847_v39  ;;  %v59_v43 = vunpack.c.l.bf16 %v1848_v40  ;;  %v1849_v44 = vld [vmem:[%s2919_s2 + $0x3] sm:$0x1]  ;;  %v2260_v63 = vld [vmem:[%s2917_s0 + $0x170] sm:$0xff]   ;;  %v2264_v7 = vld [vmem:[%s2917_s0 + $0x168] sm:$0xff]  }
  0x11   :  { %v76_v45 = vunpack.c.l.bf16 %v1849_v44  ;;  %v2261_v3 = vld [vmem:[%s2917_s0 + $0x1f0] sm:$0xff]   ;;  %v2265_v8 = vld [vmem:[%s2917_s0 + $0x1e8] sm:$0xff]   ;;  %v2268_v11 = vld [vmem:[%s2917_s0 + $0x160] sm:$0xff]  }
  0x12   :  { %2054 = vmatpush3.bf16.msra.mxu0 %v2238_v18  ;;  %v32_v47 = vsel %vm31_vm0, %v26_v41, %v2393_v2  ;;  %v48_v48 = vsel %vm31_vm0, %v42_v42, %v2393_v2  ;;  %v65_v49 = vsel %vm31_vm0, %v59_v43, %v2393_v2  ;;  %v2262_v5 = vld [vmem:[%s2917_s0 + $0x130] sm:$0xff]   ;;  %v2266_v9 = vld [vmem:[%s2917_s0 + $0x128] sm:$0xff]   ;;  %v2269_v12 = vld [vmem:[%s2917_s0 + $0x1e0] sm:$0xff]  }
  0x13   :  { %2076 = vmatpush3.bf16.msra.mxu1 %v2239_v19  ;;  %2055 = vmatprep.subr.bf16.mxu0 %v2240_v20  ;;  %v33_v52 = vpack.c.bf16 %v2361_v51, %v32_v47  ;;  %v50_v53 = vpack.c.bf16 %v2361_v51, %v48_v48  ;;  %v67_v54 = vpack.c.bf16 %v2361_v51, %v65_v49  ;;  %v2263_v6 = vld [vmem:[%s2917_s0 + $0x1b0] sm:$0xff]   ;;  %v2267_v10 = vld [vmem:[%s2917_s0 + $0x1a8] sm:$0xff]   ;;  %v2270_v13 = vld [vmem:[%s2917_s0 + $0x120] sm:$0xff]  }
  0x14   :  { %2077 = vmatprep.subr.bf16.mxu1 %v2241_v21  ;;  %v82_v55 = vsel %vm31_vm0, %v76_v45, %v2393_v2  ;;  %v2271_v14 = vld [vmem:[%s2917_s0 + $0x1a0] sm:$0xff]   ;;  %v2272_v15 = vld [vmem:[%s2917_s0 + $0x158] sm:$0xff]   ;;  %v2276_v19 = vld [vmem:[%s2917_s0 + $0x150] sm:$0xff]  }
  0x15   :  { %v84_v56 = vpack.c.bf16 %v2361_v51, %v82_v55  ;;  %36 = vst [vmem:[#allocation8] sm:$0xf] %v33_v52  ;;  %53 = vst [vmem:[#allocation8 + $0x4] sm:$0xf] %v50_v53  ;;  %v2273_v16 = vld [vmem:[%s2917_s0 + $0x1d8] sm:$0xff]   ;;  %v2277_v20 = vld [vmem:[%s2917_s0 + $0x1d0] sm:$0xff]  }
  0x16   :  { %2056 = vmatpush3.bf16.msra.mxu0 %v2242_v22  ;;  %70 = vst [vmem:[#allocation8 + $0x8] sm:$0xf] %v67_v54  ;;  %v2274_v17 = vld [vmem:[%s2917_s0 + $0x118] sm:$0xff]   ;;  %v2278_v21 = vld [vmem:[%s2917_s0 + $0x110] sm:$0xff]   ;;  %v2283_v38 = vld [vmem:[%s2917_s0 + $0x188] sm:$0xff]  }
  0x17   :  { %2078 = vmatpush3.bf16.msra.mxu1 %v2243_v23  ;;  %2057 = vmatprep.subr.bf16.mxu0 %v2244_v24  ;;  %87 = vst [vmem:[#allocation8 + $0xc] sm:$0xf] %v84_v56  ;;  %v2275_v18 = vld [vmem:[%s2917_s0 + $0x198] sm:$0xff]   ;;  %v2279_v22 = vld [vmem:[%s2917_s0 + $0x190] sm:$0xff]   ;;  %v2280_v23 = vld [vmem:[%s2917_s0 + $0x148] sm:$0xff]  }
  0x18   :  { %2079 = vmatprep.subr.bf16.mxu1 %v2245_v25  ;;  %v1850_v24 = vld [vmem:[%s2919_s2 + $0x4] sm:$0x1]  ;;  %v1851_v25 = vld [vmem:[%s2919_s2 + $0x5] sm:$0x1]  ;;  %v2288_v48 = vld [vmem:[%s2917_s0 + $0x278] sm:$0xff]  }
  0x19   :  { %v110_v28 = vunpack.c.l.bf16 %v1851_v25  ;;  %v2284_v43 = vld [vmem:[%s2917_s0 + $0x140] sm:$0xff]   ;;  %v2289_v49 = vld [vmem:[%s2917_s0 + $0x2f8] sm:$0xff]   ;;  %v2313_v25 = vld [vmem:[%s2917_s0 + $0x2c8] sm:$0xff]  }
  0x1a   :  { %2058 = vmatpush3.bf16.msra.mxu0 %v2246_v26  ;;  %v1852_v26 = vld [vmem:[%s2919_s2 + $0x6] sm:$0x1]  ;;  %v2291_v53 = vld [vmem:[%s2917_s0 + $0x2b8] sm:$0xff]  }
  0x1b   :  { %2080 = vmatpush3.bf16.msra.mxu1 %v2247_v27  ;;  %2059 = vmatprep.subr.bf16.mxu0 %v2248_v29  ;;  %v93_v27 = vunpack.c.l.bf16 %v1850_v24  ;;  %v127_v29 = vunpack.c.l.bf16 %v1852_v26  ;;  %v2285_v45 = vld [vmem:[%s2917_s0 + $0x1c0] sm:$0xff]   ;;  %v1857_v24 = vld [vmem:[%s2919_s2 + $0xb] sm:$0x1] }
  0x1c   :  { %2081 = vmatprep.subr.bf16.mxu1 %v2249_v30  ;;  %v373_v58 = vld [vmem:[#allocation8] sm:$0xff]  ;;  %v212_v26 = vunpack.c.l.bf16 %v1857_v24 }
  0x1d   :  { %v1863_v60 = vcombine.low %v373_v58, %v2400_v4  ;;  %v1864_v61 = vcombine.high %v373_v58, %v2400_v4  ;;  %v1853_v30 = vld [vmem:[%s2919_s2 + $0x7] sm:$0x1] }
  0x1e   :  { %2060 = vmatpush3.bf16.msra.mxu0 %v2250_v31  ;;  %v374_v62 = vld [vmem:[#allocation8 + $0x8] sm:$0xff]  ;;  %v2287_v47 = vld [vmem:[%s2917_s0 + $0x180] sm:$0xff]  }
  0x1f   :  { %2082 = vmatpush3.bf16.msra.mxu1 %v2251_v32  ;;  %2061 = vmatprep.subr.bf16.mxu0 %v2252_v34  ;;  %v1865_v0 = vcombine.low %v374_v62, %v2400_v4  ;;  %v1866_v1 = vcombine.high %v374_v62, %v2400_v4  ;;  %v2281_v31 = vld [vmem:[%s2917_s0 + $0x1c8] sm:$0xff]   ;;  %v144_v32 = vunpack.c.l.bf16 %v1853_v30  ;;  %v2295_v62 = vld [vmem:[%s2917_s0 + $0x2b0] sm:$0xff]   ;;  %v2351_v33 = vld [vmem:[%s2917_s0 + $0x380] sm:$0xff]  }
  0x20   :  { %2083 = vmatprep.subr.bf16.mxu1 %v2253_v35  ;;  %1532 = vmatprep.mubr.bf16.mxu0 %v1864_v61  ;;  %v2282_v34 = vld [vmem:[%s2917_s0 + $0x108] sm:$0xff]   ;;  %v99_v35 = vsel %vm31_vm0, %v93_v27, %v2393_v2  ;;  %v2294_v61 = vld [vmem:[%s2917_s0 + $0x230] sm:$0xff]  }
  0x21   :  { %1573 = vmatprep.mubr.bf16.mxu1 %v1866_v1  ;;  %v101_v39 = vpack.c.bf16 %v2361_v51, %v99_v35  ;;  %v150_v42 = vsel %vm31_vm0, %v144_v32, %v2393_v2  ;;  %v2298_v1 = vld [vmem:[%s2917_s0 + $0x228] sm:$0xff]  }
  0x22   :  { %2062 = vmatpush3.bf16.msra.mxu0 %v2254_v36  ;;  %v116_v36 = vsel %vm31_vm0, %v110_v28, %v2393_v2  ;;  %v152_v44 = vpack.c.bf16 %v2361_v51, %v150_v42  ;;  %v2314_v27 = vld [vmem:[%s2917_s0 + $0x208] sm:$0xff]   ;;  %v2320_v42 = vld [vmem:[%s2917_s0 + $0x378] sm:$0xff]  }
  0x23   :  { %2084 = vmatpush3.bf16.msra.mxu1 %v2255_v37  ;;  %2091 = vmatprep.subr.bf16.mxu0 %v2256_v46  ;;  %v133_v37 = vsel %vm31_vm0, %v127_v29, %v2393_v2  ;;  %v118_v40 = vpack.c.bf16 %v2361_v51, %v116_v36  ;;  %104 = vst [vmem:[#allocation8 + $0x10] sm:$0xf] %v101_v39  ;;  %v2286_v46 = vld [vmem:[%s2917_s0 + $0x100] sm:$0xff]  }
  0x24   :  { %2113 = vmatprep.subr.bf16.mxu1 %v2257_v50  ;;  %v135_v41 = vpack.c.bf16 %v2361_v51, %v133_v37  ;;  %155 = vst [vmem:[#allocation8 + $0x1c] sm:$0xf] %v152_v44  ;;  %v2290_v50 = vld [vmem:[%s2917_s0 + $0x238] sm:$0xff]   ;;  %v218_v36 = vsel %vm31_vm0, %v212_v26, %v2393_v2  ;;  %v2316_v37 = vld [vmem:[%s2917_s0 + $0x240] sm:$0xff]  }
  0x25   :  { %1533 = vmatmul.mubr.bf16.vlgmr.msra.gmra.mxu0 %v1863_v60  ;;  %121 = vst [vmem:[#allocation8 + $0x14] sm:$0xf] %v118_v40  ;;  %v2293_v60 = vld [vmem:[%s2917_s0 + $0x2f0] sm:$0xff]   ;;  %v2317_v39 = vld [vmem:[%s2917_s0 + $0x2c0] sm:$0xff]  }
  0x26   :  { %1574 = vmatmul.mubr.bf16.vlgmr.msra.gmra.mxu1 %v1865_v0  ;;  %2092 = vmatpush3.bf16.msra.mxu0 %v2258_v57  ;;  %138 = vst [vmem:[#allocation8 + $0x18] sm:$0xf] %v135_v41  ;;  %v2292_v57 = vld [vmem:[%s2917_s0 + $0x270] sm:$0xff]   ;;  %v2297_v0 = vld [vmem:[%s2917_s0 + $0x2e8] sm:$0xff]   ;;  %v2318_v40 = vld [vmem:[%s2917_s0 + $0x200] sm:$0xff]  }
  0x27   :  { %2114 = vmatpush3.bf16.msra.mxu1 %v2259_v59  ;;  %2093 = vmatprep.subr.bf16.mxu0 %v2260_v63  ;;  %v2296_v63 = vld [vmem:[%s2917_s0 + $0x268] sm:$0xff]   ;;  %v2319_v41 = vld [vmem:[%s2917_s0 + $0x280] sm:$0xff]  }
  0x28   :  { %2115 = vmatprep.subr.bf16.mxu1 %v2261_v3  ;;  %v2299_v3 = vld [vmem:[%s2917_s0 + $0x2a8] sm:$0xff]  }
  0x2a   :  { %2094 = vmatpush3.bf16.msra.mxu0 %v2262_v5  ;;  %v2300_v5 = vld [vmem:[%s2917_s0 + $0x260] sm:$0xff]  }
  0x2b   :  { %2116 = vmatpush3.bf16.msra.mxu1 %v2263_v6  ;;  %2095 = vmatprep.subr.bf16.mxu0 %v2264_v7  ;;  %v2301_v6 = vld [vmem:[%s2917_s0 + $0x2e0] sm:$0xff]  }
  0x2c   :  { %2117 = vmatprep.subr.bf16.mxu1 %v2265_v8  ;;  %v375_v52 = vld [vmem:[#allocation8 + $0x10] sm:$0xff]  ;;  %v2302_v7 = vld [vmem:[%s2917_s0 + $0x220] sm:$0xff]  }
  0x2d   :  { %v1867_v54 = vcombine.low %v375_v52, %v2400_v4  ;;  %v1868_v55 = vcombine.high %v375_v52, %v2400_v4  ;;  %v376_v56 = vld [vmem:[#allocation8 + $0x18] sm:$0xff] }
  0x2e   :  { %2096 = vmatpush3.bf16.msra.mxu0 %v2266_v9  ;;  %v1869_v58 = vcombine.low %v376_v56, %v2400_v4  ;;  %v1870_v59 = vcombine.high %v376_v56, %v2400_v4  ;;  %v2303_v8 = vld [vmem:[%s2917_s0 + $0x2a0] sm:$0xff]   ;;  %v2304_v9 = vld [vmem:[%s2917_s0 + $0x258] sm:$0xff]   ;;  %v2328_v56 = vld [vmem:[%s2917_s0 + $0x368] sm:$0xff]  }
  0x2f   :  { %2118 = vmatpush3.bf16.msra.mxu1 %v2267_v10  ;;  %2097 = vmatprep.subr.bf16.mxu0 %v2268_v11  ;;  %v2305_v10 = vld [vmem:[%s2917_s0 + $0x2d8] sm:$0xff]  }
  0x30   :  { %2119 = vmatprep.subr.bf16.mxu1 %v2269_v12  ;;  %1614 = vmatprep.mubr.bf16.mxu0 %v1868_v55  ;;  %v2306_v11 = vld [vmem:[%s2917_s0 + $0x218] sm:$0xff]   ;;  %v2326_v55 = vld [vmem:[%s2917_s0 + $0x330] sm:$0xff]  }
  0x31   :  { %1655 = vmatprep.mubr.bf16.mxu1 %v1870_v59  ;;  %v2307_v12 = vld [vmem:[%s2917_s0 + $0x298] sm:$0xff]   ;;  %v2331_v59 = vld [vmem:[%s2917_s0 + $0x3a8] sm:$0xff]  }
  0x32   :  { %2098 = vmatpush3.bf16.msra.mxu0 %v2270_v13  ;;  %v2308_v13 = vld [vmem:[%s2917_s0 + $0x250] sm:$0xff]  }
  0x33   :  { %2120 = vmatpush3.bf16.msra.mxu1 %v2271_v14  ;;  %2099 = vmatprep.subr.bf16.mxu0 %v2272_v15  ;;  %v2309_v14 = vld [vmem:[%s2917_s0 + $0x2d0] sm:$0xff]  }
  0x34   :  { %2121 = vmatprep.subr.bf16.mxu1 %v2273_v16  ;;  %v2310_v15 = vld [vmem:[%s2917_s0 + $0x210] sm:$0xff]  }
  0x35   :  { %v2311_v16 = vld [vmem:[%s2917_s0 + $0x290] sm:$0xff]  }
  0x36   :  { %2100 = vmatpush3.bf16.msra.mxu0 %v2274_v17  ;;  %v2312_v17 = vld [vmem:[%s2917_s0 + $0x248] sm:$0xff]  }
  0x37   :  { %2122 = vmatpush3.bf16.msra.mxu1 %v2275_v18  ;;  %2101 = vmatprep.subr.bf16.mxu0 %v2276_v19  ;;  %v1854_v18 = vld [vmem:[%s2919_s2 + $0x8] sm:$0x1]  ;;  %v1855_v19 = vld [vmem:[%s2919_s2 + $0x9] sm:$0x1] }
  0x38   :  { %2123 = vmatprep.subr.bf16.mxu1 %v2277_v20  ;;  %v1856_v20 = vld [vmem:[%s2919_s2 + $0xa] sm:$0x1] }
  0x3a   :  { %2102 = vmatpush3.bf16.msra.mxu0 %v2278_v21  ;;  %v161_v21 = vunpack.c.l.bf16 %v1854_v18  ;;  %v2345_v18 = vld [vmem:[%s2917_s0 + $0x3c8] sm:$0xff]  }
  0x3b   :  { %2124 = vmatpush3.bf16.msra.mxu1 %v2279_v22  ;;  %2103 = vmatprep.subr.bf16.mxu0 %v2280_v23  ;;  %v178_v22 = vunpack.c.l.bf16 %v1855_v19  ;;  %v195_v23 = vunpack.c.l.bf16 %v1856_v20 }
  0x3c   :  { %2125 = vmatprep.subr.bf16.mxu1 %v2281_v31  ;;  %v167_v28 = vsel %vm31_vm0, %v161_v21, %v2393_v2  ;;  %v2315_v31 = vld [vmem:[%s2917_s0 + $0x288] sm:$0xff]  }
  0x3d   :  { %v184_v29 = vsel %vm31_vm0, %v178_v22, %v2393_v2  ;;  %v201_v30 = vsel %vm31_vm0, %v195_v23, %v2393_v2  ;;  %v169_v32 = vpack.c.bf16 %v2361_v51, %v167_v28  ;;  %v2346_v23 = vld [vmem:[%s2917_s0 + $0x308] sm:$0xff]  }
  0x3e   :  { %2104 = vmatpush3.bf16.msra.mxu0 %v2282_v34  ;;  %v186_v34 = vpack.c.bf16 %v2361_v51, %v184_v29  ;;  %v203_v35 = vpack.c.bf16 %v2361_v51, %v201_v30  ;;  %v2347_v28 = vld [vmem:[%s2917_s0 + $0x388] sm:$0xff]   ;;  %v2348_v29 = vld [vmem:[%s2917_s0 + $0x340] sm:$0xff]  }
  0x3f   :  { %2126 = vmatpush3.bf16.msra.mxu1 %v2283_v38  ;;  %2105 = vmatprep.subr.bf16.mxu0 %v2284_v43  ;;  %v220_v38 = vpack.c.bf16 %v2361_v51, %v218_v36  ;;  %172 = vst [vmem:[#allocation8 + $0x20] sm:$0xf] %v169_v32  ;;  %v2321_v43 = vld [vmem:[%s2917_s0 + $0x3f8] sm:$0xff]   ;;  %v2360_v32 = vld [vmem:[#allocation8 + $0x40] sm:$0xff] }
  0x40   :  { %2127 = vmatprep.subr.bf16.mxu1 %v2285_v45  ;;  %189 = vst [vmem:[#allocation8 + $0x24] sm:$0xf] %v186_v34  ;;  %206 = vst [vmem:[#allocation8 + $0x28] sm:$0xf] %v203_v35  ;;  %v2322_v45 = vld [vmem:[%s2917_s0 + $0x338] sm:$0xff]  }
  0x41   :  { %223 = vst [vmem:[#allocation8 + $0x2c] sm:$0xf] %v220_v38 }
  0x42   :  { %2106 = vmatpush3.bf16.msra.mxu0 %v2286_v46 }
  0x43   :  { %2128 = vmatpush3.bf16.msra.mxu1 %v2287_v47  ;;  %2135 = vmatprep.subr.bf16.mxu0 %v2288_v48 }
  0x44   :  { %2157 = vmatprep.subr.bf16.mxu1 %v2289_v49  ;;  %v2323_v49 = vld [vmem:[%s2917_s0 + $0x3b8] sm:$0xff]  }
  0x45   :  { %1615 = vmatmul.mubr.bf16.vlgmr.msra.gmra.mxu0 %v1867_v54  ;;  %v2325_v54 = vld [vmem:[%s2917_s0 + $0x3f0] sm:$0xff]  }
  0x46   :  { %1656 = vmatmul.mubr.bf16.vlgmr.msra.gmra.mxu1 %v1869_v58  ;;  %2136 = vmatpush3.bf16.msra.mxu0 %v2290_v50  ;;  %v2330_v58 = vld [vmem:[%s2917_s0 + $0x328] sm:$0xff]  }
  0x47   :  { %2158 = vmatpush3.bf16.msra.mxu1 %v2291_v53  ;;  %2137 = vmatprep.subr.bf16.mxu0 %v2292_v57  ;;  %v377_v44 = vld [vmem:[#allocation8 + $0x20] sm:$0xff]  ;;  %v2324_v53 = vld [vmem:[%s2917_s0 + $0x370] sm:$0xff]  }
  0x48   :  { %2159 = vmatprep.subr.bf16.mxu1 %v2293_v60  ;;  %v1871_v46 = vcombine.low %v377_v44, %v2400_v4  ;;  %v1872_v47 = vcombine.high %v377_v44, %v2400_v4  ;;  %v378_v48 = vld [vmem:[#allocation8 + $0x28] sm:$0xff]  ;;  %v2332_v60 = vld [vmem:[%s2917_s0 + $0x360] sm:$0xff]  }
  0x49   :  { %v1873_v50 = vcombine.low %v378_v48, %v2400_v4  ;;  %v1874_v52 = vcombine.high %v378_v48, %v2400_v4  ;;  %v2327_v4 = vld [vmem:[%s2917_s0 + $0x3b0] sm:$0xff]   ;;  %v2329_v57 = vld [vmem:[%s2917_s0 + $0x3e8] sm:$0xff]  }
  0x4a   :  { %2138 = vmatpush3.bf16.msra.mxu0 %v2294_v61  ;;  %1696 = vmatprep.mubr.bf16.mxu0 %v1872_v47  ;;  %v2333_v61 = vld [vmem:[%s2917_s0 + $0x3e0] sm:$0xff]  }
  0x4b   :  { %2160 = vmatpush3.bf16.msra.mxu1 %v2295_v62  ;;  %2139 = vmatprep.subr.bf16.mxu0 %v2296_v63  ;;  %v2334_v62 = vld [vmem:[%s2917_s0 + $0x320] sm:$0xff]  }
  0x4c   :  { %2161 = vmatprep.subr.bf16.mxu1 %v2297_v0  ;;  %1737 = vmatprep.mubr.bf16.mxu1 %v1874_v52  ;;  %v2335_v63 = vld [vmem:[%s2917_s0 + $0x3a0] sm:$0xff]   ;;  %v2336_v0 = vld [vmem:[%s2917_s0 + $0x358] sm:$0xff]  }
  0x4e   :  { %2140 = vmatpush3.bf16.msra.mxu0 %v2298_v1  ;;  %v2337_v1 = vld [vmem:[%s2917_s0 + $0x3d8] sm:$0xff]  }
  0x4f   :  { %2162 = vmatpush3.bf16.msra.mxu1 %v2299_v3  ;;  %2141 = vmatprep.subr.bf16.mxu0 %v2300_v5  ;;  %v2338_v3 = vld [vmem:[%s2917_s0 + $0x318] sm:$0xff]  }
  0x50   :  { %2163 = vmatprep.subr.bf16.mxu1 %v2301_v6  ;;  %v2339_v5 = vld [vmem:[%s2917_s0 + $0x398] sm:$0xff]   ;;  %v2340_v6 = vld [vmem:[%s2917_s0 + $0x350] sm:$0xff]  }
  0x52   :  { %2142 = vmatpush3.bf16.msra.mxu0 %v2302_v7  ;;  %v2341_v7 = vld [vmem:[%s2917_s0 + $0x3d0] sm:$0xff]  }
  0x53   :  { %2164 = vmatpush3.bf16.msra.mxu1 %v2303_v8  ;;  %2143 = vmatprep.subr.bf16.mxu0 %v2304_v9  ;;  %v2342_v8 = vld [vmem:[%s2917_s0 + $0x310] sm:$0xff]   ;;  %v1858_v9 = vld [vmem:[%s2919_s2 + $0xc] sm:$0x1] }
  0x54   :  { %2165 = vmatprep.subr.bf16.mxu1 %v2305_v10  ;;  %v1859_v10 = vld [vmem:[%s2919_s2 + $0xd] sm:$0x1] }
  0x56   :  { %2144 = vmatpush3.bf16.msra.mxu0 %v2306_v11  ;;  %v1860_v11 = vld [vmem:[%s2919_s2 + $0xe] sm:$0x1] }
  0x57   :  { %2166 = vmatpush3.bf16.msra.mxu1 %v2307_v12  ;;  %2145 = vmatprep.subr.bf16.mxu0 %v2308_v13  ;;  %v2343_v12 = vld [vmem:[%s2917_s0 + $0x390] sm:$0xff]   ;;  %v2344_v13 = vld [vmem:[%s2917_s0 + $0x348] sm:$0xff]  }
  0x58   :  { %2167 = vmatprep.subr.bf16.mxu1 %v2309_v14  ;;  %v229_v14 = vunpack.c.l.bf16 %v1858_v9 }
  0x5a   :  { %2146 = vmatpush3.bf16.msra.mxu0 %v2310_v15  ;;  %v246_v15 = vunpack.c.l.bf16 %v1859_v10  ;;  %v235_v20 = vsel %vm31_vm0, %v229_v14, %v2393_v2 }
  0x5b   :  { %2168 = vmatpush3.bf16.msra.mxu1 %v2311_v16  ;;  %2147 = vmatprep.subr.bf16.mxu0 %v2312_v17  ;;  %v263_v16 = vunpack.c.l.bf16 %v1860_v11  ;;  %v1861_v17 = vld [vmem:[%s2919_s2 + $0xf] sm:$0x1]  ;;  %v237_v24 = vpack.c.bf16 %v2361_v51, %v235_v20 }
  0x5c   :  { %2169 = vmatprep.subr.bf16.mxu1 %v2313_v25  ;;  %v280_v19 = vunpack.c.l.bf16 %v1861_v17  ;;  %v252_v21 = vsel %vm31_vm0, %v246_v15, %v2393_v2 }
  0x5d   :  { %v269_v22 = vsel %vm31_vm0, %v263_v16, %v2393_v2  ;;  %v254_v25 = vpack.c.bf16 %v2361_v51, %v252_v21  ;;  %240 = vst [vmem:[#allocation8 + $0x30] sm:$0xf] %v237_v24 }
  0x5e   :  { %2148 = vmatpush3.bf16.msra.mxu0 %v2314_v27  ;;  %v271_v26 = vpack.c.bf16 %v2361_v51, %v269_v22  ;;  %v286_v27 = vsel %vm31_vm0, %v280_v19, %v2393_v2  ;;  %v2350_v2 = vld [vmem:[%s2917_s0 + $0x300] sm:$0xff]  }
  0x5f   :  { %2170 = vmatpush3.bf16.msra.mxu1 %v2315_v31  ;;  %2149 = vmatprep.subr.bf16.mxu0 %v2316_v37  ;;  %v288_v30 = vpack.c.bf16 %v2361_v51, %v286_v27  ;;  %v2349_v31 = vld [vmem:[%s2917_s0 + $0x3c0] sm:$0xff]   ;;  %257 = vst [vmem:[#allocation8 + $0x34] sm:$0xf] %v254_v25 }
  0x60   :  { %2171 = vmatprep.subr.bf16.mxu1 %v2317_v39  ;;  %274 = vst [vmem:[#allocation8 + $0x38] sm:$0xf] %v271_v26 }
  0x61   :  { %291 = vst [vmem:[#allocation8 + $0x3c] sm:$0xf] %v288_v30 }
  0x62   :  { %2150 = vmatpush3.bf16.msra.mxu0 %v2318_v40 }
  0x63   :  { %2172 = vmatpush3.bf16.msra.mxu1 %v2319_v41  ;;  %2179 = vmatprep.subr.bf16.mxu0 %v2320_v42 }
  0x64   :  { %2201 = vmatprep.subr.bf16.mxu1 %v2321_v43 }
  0x65   :  { %1697 = vmatmul.mubr.bf16.vlgmr.msra.gmra.mxu0 %v1871_v46 }
  0x66   :  { %1738 = vmatmul.mubr.bf16.vlgmr.msra.gmra.mxu1 %v1873_v50  ;;  %2180 = vmatpush3.bf16.msra.mxu0 %v2322_v45  ;;  %v379_v51 = vld [vmem:[#allocation8 + $0x30] sm:$0xff] }
  0x67   :  { %2202 = vmatpush3.bf16.msra.mxu1 %v2323_v49  ;;  %2181 = vmatprep.subr.bf16.mxu0 %v2324_v53  ;;  %v1875_v34 = vcombine.low %v379_v51, %v2360_v32  ;;  %v1876_v35 = vcombine.high %v379_v51, %v2360_v32 }
  0x68   :  { %2203 = vmatprep.subr.bf16.mxu1 %v2325_v54  ;;  %v380_v36 = vld [vmem:[#allocation8 + $0x38] sm:$0xff] }
  0x69   :  { %v1877_v37 = vcombine.low %v380_v36, %v2360_v32  ;;  %v1878_v38 = vcombine.high %v380_v36, %v2360_v32  ;;  %1778 = vmatprep.mubr.bf16.mxu0 %v1876_v35 }
  0x6a   :  { %2182 = vmatpush3.bf16.msra.mxu0 %v2326_v55 }
  0x6b   :  { %2204 = vmatpush3.bf16.msra.mxu1 %v2327_v4  ;;  %2183 = vmatprep.subr.bf16.mxu0 %v2328_v56  ;;  %v1862_v4 = vld [vmem:[#allocation7] ss:$0 sm:$0xff] }
  0x6c   :  { %2205 = vmatprep.subr.bf16.mxu1 %v2329_v57  ;;  %1819 = vmatprep.mubr.bf16.mxu1 %v1878_v38 }
  0x6e   :  { %2184 = vmatpush3.bf16.msra.mxu0 %v2330_v58 }
  0x6f   :  { %2206 = vmatpush3.bf16.msra.mxu1 %v2331_v59  ;;  %2185 = vmatprep.subr.bf16.mxu0 %v2332_v60 }
  0x70   :  { %2207 = vmatprep.subr.bf16.mxu1 %v2333_v61 }
  0x72   :  { %2186 = vmatpush3.bf16.msra.mxu0 %v2334_v62 }
  0x73   :  { %2208 = vmatpush3.bf16.msra.mxu1 %v2335_v63  ;;  %2187 = vmatprep.subr.bf16.mxu0 %v2336_v0 }
  0x74   :  { %2209 = vmatprep.subr.bf16.mxu1 %v2337_v1 }
  0x76   :  { %2188 = vmatpush3.bf16.msra.mxu0 %v2338_v3 }
  0x77   :  { %2210 = vmatpush3.bf16.msra.mxu1 %v2339_v5  ;;  %2189 = vmatprep.subr.bf16.mxu0 %v2340_v6 }
  0x78   :  { %2211 = vmatprep.subr.bf16.mxu1 %v2341_v7 }
  0x7a   :  { %2190 = vmatpush3.bf16.msra.mxu0 %v2342_v8 }
  0x7b   :  { %2212 = vmatpush3.bf16.msra.mxu1 %v2343_v12  ;;  %2191 = vmatprep.subr.bf16.mxu0 %v2344_v13 }
  0x7c   :  { %2213 = vmatprep.subr.bf16.mxu1 %v2345_v18 }
  0x7e   :  { %2192 = vmatpush3.bf16.msra.mxu0 %v2346_v23 }
  0x7f   :  { %2214 = vmatpush3.bf16.msra.mxu1 %v2347_v28  ;;  %2193 = vmatprep.subr.bf16.mxu0 %v2348_v29 }
  0x80   :  { %2215 = vmatprep.subr.bf16.mxu1 %v2349_v31 }
  0x82   :  { %2194 = vmatpush3.bf16.msra.mxu0 %v2350_v2 }
  0x83   :  { %2216 = vmatpush3.bf16.msra.mxu1 %v2351_v33 }
  0x85   :  { %1779 = vmatmul.mubr.bf16.vlgmr.msra.gmra.mxu0 %v1875_v34 }
  0x86   :  { %1820 = vmatmul.mubr.bf16.vlgmr.msra.gmra.mxu1 %v1877_v37 }
  0xe5   :  { %v2063_v39 = vpop.f32.mrf.mxu0 }
  0xe6   :  { %v2085_v40 = vpop.f32.mrf.mxu1 }
  0xe7   :  { %v2064_v41 = vpop.f32.mrf.mxu0 }
  0xe8   :  { %v2086_v42 = vpop.f32.mrf.mxu1  ;;  %v2065_v55 = vadd.f32 %v2064_v41, %v2063_v39 }
  0xe9   :  { %v2066_v43 = vpop.f32.mrf.mxu0  ;;  %v2087_v59 = vadd.f32 %v2086_v42, %v2085_v40 }
  0xea   :  { %v2088_v44 = vpop.f32.mrf.mxu1  ;;  %v1535_v58 = vadd.f32 %v2065_v55, %v1862_v4 }
  0xeb   :  { %v2067_v45 = vpop.f32.mrf.mxu0 }
  0xec   :  { %v2089_v47 = vpop.f32.mrf.mxu1  ;;  %v2068_v60 = vadd.f32 %v2067_v45, %v2066_v43  ;;  %v1576_v0 = vadd.f32 %v2087_v59, %v1535_v58 }
  0xed   :  { %v2090_v6 = vadd.f32 %v2089_v47, %v2088_v44 }
  0xee   :  { %v1538_v1 = vadd.f32 %v2068_v60, %v1862_v4 }
  0xf0   :  { %v1579_v10 = vadd.f32 %v2090_v6, %v1538_v1 }
 0x105   :  { %v2107_v46 = vpop.f32.mrf.mxu0 }
 0x106   :  { %v2129_v48 = vpop.f32.mrf.mxu1 }
 0x107   :  { %v2108_v49 = vpop.f32.mrf.mxu0 }
 0x108   :  { %v2130_v50 = vpop.f32.mrf.mxu1  ;;  %v2109_v63 = vadd.f32 %v2108_v49, %v2107_v46 }
 0x109   :  { %v2110_v52 = vpop.f32.mrf.mxu0  ;;  %v2131_v8 = vadd.f32 %v2130_v50, %v2129_v48 }
 0x10a   :  { %v2132_v53 = vpop.f32.mrf.mxu1  ;;  %v1617_v7 = vadd.f32 %v2109_v63, %v1576_v0 }
 0x10b   :  { %v2111_v54 = vpop.f32.mrf.mxu0 }
 0x10c   :  { %v2133_v57 = vpop.f32.mrf.mxu1  ;;  %v2112_v9 = vadd.f32 %v2111_v54, %v2110_v52  ;;  %v1658_v14 = vadd.f32 %v2131_v8, %v1617_v7 }
 0x10d   :  { %v2134_v16 = vadd.f32 %v2133_v57, %v2132_v53 }
 0x10e   :  { %v1620_v15 = vadd.f32 %v2112_v9, %v1579_v10 }
 0x110   :  { %v1661_v22 = vadd.f32 %v2134_v16, %v1620_v15 }
 0x125   :  { %v2151_v56 = vpop.f32.mrf.mxu0 }
 0x126   :  { %v2173_v61 = vpop.f32.mrf.mxu1 }
 0x127   :  { %v2152_v62 = vpop.f32.mrf.mxu0 }
 0x128   :  { %v2174_v3 = vpop.f32.mrf.mxu1  ;;  %v2153_v11 = vadd.f32 %v2152_v62, %v2151_v56 }
 0x129   :  { %v2154_v5 = vpop.f32.mrf.mxu0  ;;  %v2175_v18 = vadd.f32 %v2174_v3, %v2173_v61 }
 0x12a   :  { %v2176_v12 = vpop.f32.mrf.mxu1  ;;  %v1699_v17 = vadd.f32 %v2153_v11, %v1658_v14 }
 0x12b   :  { %v2155_v13 = vpop.f32.mrf.mxu0 }
 0x12c   :  { %v2156_v19 = vadd.f32 %v2155_v13, %v2154_v5  ;;  %v2177_v20 = vpop.f32.mrf.mxu1  ;;  %v1740_v25 = vadd.f32 %v2175_v18, %v1699_v17 }
 0x12d   :  { %v2178_v30 = vadd.f32 %v2177_v20, %v2176_v12 }
 0x12e   :  { %v1702_v26 = vadd.f32 %v2156_v19, %v1661_v22 }
 0x130   :  { %v1743_v32 = vadd.f32 %v2178_v30, %v1702_v26 }
 0x145   :  { %v2195_v21 = vpop.f32.mrf.mxu0 }
 0x146   :  { %v2217_v23 = vpop.f32.mrf.mxu1 }
 0x147   :  { %v2196_v24 = vpop.f32.mrf.mxu0 }
 0x148   :  { %v2197_v27 = vadd.f32 %v2196_v24, %v2195_v21  ;;  %v2218_v28 = vpop.f32.mrf.mxu1 }
 0x149   :  { %v2198_v29 = vpop.f32.mrf.mxu0  ;;  %v2219_v2 = vadd.f32 %v2218_v28, %v2217_v23 }
 0x14a   :  { %v1781_v31 = vadd.f32 %v2197_v27, %v1740_v25  ;;  %v2220_v33 = vpop.f32.mrf.mxu1 }
 0x14b   :  { %v2199_v51 = vpop.f32.mrf.mxu0 }
 0x14c   :  { %v1822_v34 = vadd.f32 %v2219_v2, %v1781_v31  ;;  %v2200_v35 = vadd.f32 %v2199_v51, %v2198_v29  ;;  %v2221_v36 = vpop.f32.mrf.mxu1 }
 0x14d   :  { %v2222_v39 = vadd.f32 %v2221_v36, %v2220_v33 }
 0x14e   :  { %v1828_v37 = vsub.f32 0.0, %v1822_v34  ;;  %v1784_v38 = vadd.f32 %v2200_v35, %v1743_v32 }
 0x150   :  { %v1830_v40 = vmul.f32 1.442695, %v1828_v37  ;;  %v1825_v41 = vadd.f32 %v2222_v39, %v1784_v38 }
 0x152   :  { %2352 = vpow2.f32 %v1830_v40  ;;  %v1829_v42 = vsub.f32 0.0, %v1825_v41 }
 0x154   :  { %v1832_v43 = vmul.f32 1.442695, %v1829_v42 }
 0x156   :  { %2354 = vpow2.f32 %v1832_v43 }
 0x15f   :  { %v2353_v44 = vpop.eup %2352 }
 0x160   :  { %v1834_v45 = vadd.f32 1.0, %v2353_v44 }
 0x162   :  { %2356 = vrcp.f32 %v1834_v45 }
 0x163   :  { %v2355_v46 = vpop.eup %2354 }
 0x164   :  { %v1835_v47 = vadd.f32 1.0, %v2355_v46 }
 0x166   :  { %2358 = vrcp.f32 %v1835_v47 }
 0x16f   :  { %v2357_v48 = vpop.eup %2356 }
 0x170   :  { %1841 = vst.msk [vmem:[%s2921_s4] sm:$0xff] %vm1840_vm1, %v2357_v48 }
 0x173   :  { %v2359_v49 = vpop.eup %2358 }
 0x174   :  { %1842 = vst.msk [vmem:[%s2921_s4 + $0x8] sm:$0xff] %vm1840_vm1, %v2359_v49 }

</bundles_post_ra>
